<compile_context>
chip_gen: v5e
topology: v5e:2x2
jax: 0.10.0
libtpu: 0.0.40
codegen_flags: <defaults>
</compile_context>

<pallas_src>
import functools

import jax
import jax.numpy as jnp
from jax.experimental import pallas as pl
from jax.experimental.pallas import tpu as pltpu

HIDDEN = 2048          # hidden width of the ScoringNetwork MLP
TN = 512               # tile along the layer-2 hidden (output) dimension
OUT_PAD = 128          # lane-padded width of the final 1-wide output
NUM_CORES = 2          # leading parallel grid axis (v7x dual TC; serial on v5e/v6e)


def _round_up(x: int, m: int) -> int:
    return (x + m - 1) // m * m


def scoring_kernel(x_ref, w1_ref, b1_ref, w2_ref, b2_ref, w3_ref,
                   out_ref, h1_ref):
    """Fused 3-layer MLP.

    Grid = (NUM_CORES, n_tiles): axis 0 ("parallel") splits the layer-2 hidden
    columns across TensorCores; axis 1 ("arbitrary") is the reduction over the
    column tiles of this core's range.  out_ref is this core's partial result
    (its block index is constant along axis 1, so it stays resident and acts
    as the accumulator).
    """
    j = pl.program_id(1)

    @pl.when(j == 0)
    def _():
        # layer 1: relu(x @ W1 + b1) -- computed once per core, kept in VMEM.
        h1 = jnp.dot(x_ref[...], w1_ref[...],
                     preferred_element_type=jnp.float32) + b1_ref[...]
        h1_ref[...] = jnp.maximum(h1, 0.0)
        out_ref[...] = jnp.zeros_like(out_ref)

    # layer 2 (one TN-wide column tile): relu(h1 @ W2[:, tile] + b2[tile])
    h2 = jnp.dot(h1_ref[...], w2_ref[...],
                 preferred_element_type=jnp.float32) + b2_ref[...]
    h2 = jnp.maximum(h2, 0.0)

    # layer 3 partial: (h2 * w3_row).sum(-1)  -> VPU multiply + XLU reduction,
    # no zero-padded MXU op and no 1 MiB zero DMA for W3.
    partial = jnp.sum(h2 * w3_ref[...], axis=-1, keepdims=True)   # (Bp, 1)
    out_ref[...] += partial   # broadcasts into the lane-padded (Bp, 128) block


def prepare_params(params, seq_len: int, K: int):
    """One-time padding / reshaping of the weights (hoisted out of forward)."""
    input_dim = seq_len * (K - 1)
    Dp = _round_up(input_dim, 128)
    w1, b1, w2, b2, w3, b3 = params
    w1_p = jnp.zeros((Dp, HIDDEN), jnp.float32).at[:input_dim, :].set(
        jnp.asarray(w1, jnp.float32))
    b1_p = jnp.asarray(b1, jnp.float32).reshape(1, HIDDEN)
    w2_p = jnp.asarray(w2, jnp.float32)
    b2_p = jnp.asarray(b2, jnp.float32).reshape(1, HIDDEN)
    w3_row = jnp.asarray(w3, jnp.float32).reshape(1, HIDDEN)   # (2048,1) -> row
    b3_s = jnp.asarray(b3, jnp.float32).reshape(())
    return (w1_p, b1_p, w2_p, b2_p, w3_row, b3_s)


@functools.partial(jax.jit, static_argnames=("seq_len", "K"))
def scoring_network_forward(log_x, prepped, *, seq_len: int, K: int):
    """JAX/Pallas equivalent of ScoringNetwork.forward.

    log_x: (B, seq_len, K-1) or (B, seq_len*(K-1)), float32
    prepped: output of prepare_params (pre-padded weights)
    returns: (B,) float32
    """
    input_dim = seq_len * (K - 1)
    if log_x.ndim == 3:
        log_x = log_x.reshape(log_x.shape[0], input_dim)
    B = log_x.shape[0]

    w1_p, b1_p, w2_p, b2_p, w3_row, b3_s = prepped
    Dp = w1_p.shape[0]
    Bp = _round_up(max(B, 1), 8)

    # only the (tiny) activation pad happens per call; weight pads are hoisted.
    x_p = jnp.zeros((Bp, Dp), jnp.float32).at[:B, :input_dim].set(
        log_x.astype(jnp.float32))

    n_tiles = HIDDEN // (NUM_CORES * TN)   # column tiles per core

    partials = pl.pallas_call(
        scoring_kernel,
        out_shape=jax.ShapeDtypeStruct((NUM_CORES, Bp, OUT_PAD), jnp.float32),
        grid_spec=pltpu.PrefetchScalarGridSpec(
            num_scalar_prefetch=0,
            grid=(NUM_CORES, n_tiles),
            in_specs=[
                pl.BlockSpec((Bp, Dp), lambda c, j: (0, 0)),          # x
                pl.BlockSpec((Dp, HIDDEN), lambda c, j: (0, 0)),      # W1
                pl.BlockSpec((1, HIDDEN), lambda c, j: (0, 0)),       # b1
                pl.BlockSpec((HIDDEN, TN),
                             lambda c, j: (0, c * n_tiles + j)),      # W2 tile
                pl.BlockSpec((1, TN),
                             lambda c, j: (0, c * n_tiles + j)),      # b2 tile
                pl.BlockSpec((1, TN),
                             lambda c, j: (0, c * n_tiles + j)),      # w3 row tile
            ],
            out_specs=pl.BlockSpec((None, Bp, OUT_PAD),
                                   lambda c, j: (c, 0, 0)),
            scratch_shapes=[
                pltpu.VMEM((Bp, HIDDEN), jnp.float32),   # resident h1
            ],
        ),
        compiler_params=pltpu.CompilerParams(
            dimension_semantics=("parallel", "arbitrary"),
            vmem_limit_bytes=32 * 1024 * 1024),
    )(x_p, w1_p, b1_p, w2_p, b2_p, w3_row)

    # sum the per-core partials, take real batch rows and lane 0, add b3.
    out = partials.sum(axis=0)[:B, 0] + b3_s
    return out   # shape (B,) -- matches .squeeze(-1)


def init_params(seq_len: int, K: int, key):
    """Deterministic synthetic init matching nn.Linear shapes."""
    input_dim = seq_len * (K - 1)
    k1, k2, k3, k4, k5, k6 = jax.random.split(key, 6)
    s1 = 1.0 / jnp.sqrt(input_dim)
    s2 = 1.0 / jnp.sqrt(HIDDEN)
    w1 = jax.random.uniform(k1, (input_dim, HIDDEN), jnp.float32, -s1, s1)
    b1 = jax.random.uniform(k2, (HIDDEN,), jnp.float32, -s1, s1)
    w2 = jax.random.uniform(k3, (HIDDEN, HIDDEN), jnp.float32, -s2, s2)
    b2 = jax.random.uniform(k4, (HIDDEN,), jnp.float32, -s2, s2)
    w3 = jax.random.uniform(k5, (HIDDEN, 1), jnp.float32, -s2, s2)
    b3 = jax.random.uniform(k6, (1,), jnp.float32, -s2, s2)
    return (w1, b1, w2, b2, w3, b3)


def reference_forward(log_x, params, seq_len, K):
    input_dim = seq_len * (K - 1)
    if log_x.ndim == 3:
        log_x = log_x.reshape(log_x.shape[0], input_dim)
    w1, b1, w2, b2, w3, b3 = params
    h = jnp.maximum(log_x @ w1 + b1, 0.0)
    h = jnp.maximum(h @ w2 + b2, 0.0)
    return (h @ w3 + b3)[:, 0]


if __name__ == "__main__":
    seq_len, K, B = 8, 4, 2           # RNA-like alphabet -> input_dim = 24
    key = jax.random.PRNGKey(0)
    kx, kp = jax.random.split(key)

    params = init_params(seq_len, K, kp)
    prepped = prepare_params(params, seq_len, K)   # pad weights once, not per call
    log_x = jax.random.normal(kx, (B, seq_len, K - 1), jnp.float32)

    out = scoring_network_forward(log_x, prepped, seq_len=seq_len, K=K)
    out = jax.block_until_ready(out)

    ref = reference_forward(log_x, params, seq_len, K)
    assert out.shape == (B,)
    # tolerance covers MXU-vs-XLA default matmul precision differences
    assert jnp.allclose(out, ref, atol=2e-2, rtol=2e-2), (out, ref)

    print("KERNEL_OK")
</pallas_src>

<mosaic_0001>
module attributes {stable_mosaic.version = 11 : i64} {
  func.func @scoring_kernel(%arg0: i32, %arg1: i32, %arg2: memref<8x128xf32, #tpu.memory_space<vmem>>, %arg3: memref<128x2048xf32, #tpu.memory_space<vmem>>, %arg4: memref<1x2048xf32, #tpu.memory_space<vmem>>, %arg5: memref<2048x512xf32, #tpu.memory_space<vmem>>, %arg6: memref<1x512xf32, #tpu.memory_space<vmem>>, %arg7: memref<1x512xf32, #tpu.memory_space<vmem>>, %arg8: memref<1x8x128xf32, #tpu.memory_space<vmem>>, %arg9: memref<8x2048xf32, #tpu.memory_space<vmem>>) attributes {dimension_semantics = [#tpu.dimension_semantics<parallel>, #tpu.dimension_semantics<arbitrary>], iteration_bounds = array<i64: 2, 2>, scalar_prefetch = 0 : i64, scratch_operands = 1 : i64, tpu.core_type = #tpu.core_type<tc>, window_params = [{pipeline_mode = #tpu.pipeline_mode<synchronous>, transform_indices = @transform_0, window_bounds = array<i64: 8, 128>}, {pipeline_mode = #tpu.pipeline_mode<synchronous>, transform_indices = @transform_1, window_bounds = array<i64: 128, 2048>}, {pipeline_mode = #tpu.pipeline_mode<synchronous>, transform_indices = @transform_2, window_bounds = array<i64: 1, 2048>}, {transform_indices = @transform_3, window_bounds = array<i64: 2048, 512>}, {transform_indices = @transform_4, window_bounds = array<i64: 1, 512>}, {transform_indices = @transform_5, window_bounds = array<i64: 1, 512>}, {transform_indices = @transform_6, window_bounds = array<i64: 1, 8, 128>}]} {
    %c0_i32 = arith.constant 0 : i32
    %0 = arith.cmpi eq, %arg1, %c0_i32 : i32
    %1 = arith.extui %0 : i1 to i32
    %c0_i32_0 = arith.constant 0 : i32
    %2 = arith.cmpi ne, %1, %c0_i32_0 : i32
    scf.if %2 {
      %c0_16 = arith.constant 0 : index
      %c0_17 = arith.constant 0 : index
      %23 = vector.load %arg2[%c0_16, %c0_17] : memref<8x128xf32, #tpu.memory_space<vmem>>, vector<8x128xf32>
      %c0_18 = arith.constant 0 : index
      %c0_19 = arith.constant 0 : index
      %24 = vector.load %arg3[%c0_18, %c0_19] : memref<128x2048xf32, #tpu.memory_space<vmem>>, vector<128x2048xf32>
      %cst_20 = arith.constant dense<0.000000e+00> : vector<8x2048xf32>
      %25 = tpu.matmul %23, %24, %cst_20 {dimension_numbers = #tpu.dot_dimension_numbers<[1], [0], [0], [1], [0, 0, 1, 1], [], []>} : vector<8x128xf32>, vector<128x2048xf32>, vector<8x2048xf32> -> vector<8x2048xf32>
      %c0_21 = arith.constant 0 : index
      %c0_22 = arith.constant 0 : index
      %26 = vector.load %arg4[%c0_21, %c0_22] : memref<1x2048xf32, #tpu.memory_space<vmem>>, vector<1x2048xf32>
      %27 = vector.broadcast %26 : vector<1x2048xf32> to vector<8x2048xf32>
      %28 = arith.addf %25, %27 : vector<8x2048xf32>
      %cst_23 = arith.constant 0.000000e+00 : f32
      %29 = vector.broadcast %cst_23 : f32 to vector<8x2048xf32>
      %30 = arith.maximumf %28, %29 : vector<8x2048xf32>
      %c0_24 = arith.constant 0 : index
      %c0_25 = arith.constant 0 : index
      %31 = vector.load %arg9[%c0_24, %c0_25] : memref<8x2048xf32, #tpu.memory_space<vmem>>, vector<8x2048xf32>
      tpu.vector_store %arg9[%c0_24, %c0_25], %30 {strides = array<i32>} : memref<8x2048xf32, #tpu.memory_space<vmem>>, vector<8x2048xf32>,
      %cst_26 = arith.constant 0.000000e+00 : f32
      %32 = vector.broadcast %cst_26 : f32 to vector<8x128xf32>
      %c0_27 = arith.constant 0 : index
      %c0_28 = arith.constant 0 : index
      %c0_29 = arith.constant 0 : index
      %33 = vector.load %arg8[%c0_27, %c0_28, %c0_29] : memref<1x8x128xf32, #tpu.memory_space<vmem>>, vector<1x8x128xf32>
      %34 = vector.shape_cast %33 : vector<1x8x128xf32> to vector<8x128xf32>
      %35 = vector.shape_cast %32 : vector<8x128xf32> to vector<1x8x128xf32>
      tpu.vector_store %arg8[%c0_27, %c0_28, %c0_29], %35 {strides = array<i32>} : memref<1x8x128xf32, #tpu.memory_space<vmem>>, vector<1x8x128xf32>,
    } else {
    }
    %c0 = arith.constant 0 : index
    %c0_1 = arith.constant 0 : index
    %3 = vector.load %arg9[%c0, %c0_1] : memref<8x2048xf32, #tpu.memory_space<vmem>>, vector<8x2048xf32>
    %c0_2 = arith.constant 0 : index
    %c0_3 = arith.constant 0 : index
    %4 = vector.load %arg5[%c0_2, %c0_3] : memref<2048x512xf32, #tpu.memory_space<vmem>>, vector<2048x512xf32>
    %cst = arith.constant dense<0.000000e+00> : vector<8x512xf32>
    %5 = tpu.matmul %3, %4, %cst {dimension_numbers = #tpu.dot_dimension_numbers<[1], [0], [0], [1], [0, 0, 1, 1], [], []>} : vector<8x2048xf32>, vector<2048x512xf32>, vector<8x512xf32> -> vector<8x512xf32>
    %c0_4 = arith.constant 0 : index
    %c0_5 = arith.constant 0 : index
    %6 = vector.load %arg6[%c0_4, %c0_5] : memref<1x512xf32, #tpu.memory_space<vmem>>, vector<1x512xf32>
    %7 = vector.broadcast %6 : vector<1x512xf32> to vector<8x512xf32>
    %8 = arith.addf %5, %7 : vector<8x512xf32>
    %cst_6 = arith.constant 0.000000e+00 : f32
    %9 = vector.broadcast %cst_6 : f32 to vector<8x512xf32>
    %10 = arith.maximumf %8, %9 : vector<8x512xf32>
    %c0_7 = arith.constant 0 : index
    %c0_8 = arith.constant 0 : index
    %11 = vector.load %arg7[%c0_7, %c0_8] : memref<1x512xf32, #tpu.memory_space<vmem>>, vector<1x512xf32>
    %12 = vector.broadcast %11 : vector<1x512xf32> to vector<8x512xf32>
    %13 = arith.mulf %10, %12 : vector<8x512xf32>
    %cst_9 = arith.constant dense<0.000000e+00> : vector<8xf32>
    %14 = vector.multi_reduction <add>, %13, %cst_9 [1] : vector<8x512xf32> to vector<8xf32>
    %15 = vector.shape_cast %14 : vector<8xf32> to vector<8x1xf32>
    %c0_10 = arith.constant 0 : index
    %c0_11 = arith.constant 0 : index
    %c0_12 = arith.constant 0 : index
    %16 = vector.load %arg8[%c0_10, %c0_11, %c0_12] : memref<1x8x128xf32, #tpu.memory_space<vmem>>, vector<1x8x128xf32>
    %17 = vector.shape_cast %16 : vector<1x8x128xf32> to vector<8x128xf32>
    %18 = vector.broadcast %15 : vector<8x1xf32> to vector<8x128xf32>
    %19 = arith.addf %17, %18 : vector<8x128xf32>
    %c0_13 = arith.constant 0 : index
    %c0_14 = arith.constant 0 : index
    %c0_15 = arith.constant 0 : index
    %20 = vector.load %arg8[%c0_13, %c0_14, %c0_15] : memref<1x8x128xf32, #tpu.memory_space<vmem>>, vector<1x8x128xf32>
    %21 = vector.shape_cast %20 : vector<1x8x128xf32> to vector<8x128xf32>
    %22 = vector.shape_cast %19 : vector<8x128xf32> to vector<1x8x128xf32>
    tpu.vector_store %arg8[%c0_13, %c0_14, %c0_15], %22 {strides = array<i32>} : memref<1x8x128xf32, #tpu.memory_space<vmem>>, vector<1x8x128xf32>,
    return
  }
  func.func @transform_0(%arg0: i32, %arg1: i32) -> (i32, i32) {
    %c0_i32 = arith.constant 0 : i32
    %c0_i32_0 = arith.constant 0 : i32
    %c0_i32_1 = arith.constant 0 : i32
    return %c0_i32, %c0_i32_0 : i32, i32
  }
  func.func @transform_1(%arg0: i32, %arg1: i32) -> (i32, i32) {
    %c0_i32 = arith.constant 0 : i32
    %c0_i32_0 = arith.constant 0 : i32
    %c0_i32_1 = arith.constant 0 : i32
    return %c0_i32, %c0_i32_0 : i32, i32
  }
  func.func @transform_2(%arg0: i32, %arg1: i32) -> (i32, i32) {
    %c0_i32 = arith.constant 0 : i32
    %c0_i32_0 = arith.constant 0 : i32
    %c0_i32_1 = arith.constant 0 : i32
    return %c0_i32, %c0_i32_0 : i32, i32
  }
  func.func @transform_3(%arg0: i32, %arg1: i32) -> (i32, i32) {
    %c2_i32 = arith.constant 2 : i32
    %0 = arith.muli %arg0, %c2_i32 : i32
    %1 = arith.addi %0, %arg1 : i32
    %c0_i32 = arith.constant 0 : i32
    %c0_i32_0 = arith.constant 0 : i32
    return %c0_i32, %1 : i32, i32
  }
  func.func @transform_4(%arg0: i32, %arg1: i32) -> (i32, i32) {
    %c2_i32 = arith.constant 2 : i32
    %0 = arith.muli %arg0, %c2_i32 : i32
    %1 = arith.addi %0, %arg1 : i32
    %c0_i32 = arith.constant 0 : i32
    %c0_i32_0 = arith.constant 0 : i32
    return %c0_i32, %1 : i32, i32
  }
  func.func @transform_5(%arg0: i32, %arg1: i32) -> (i32, i32) {
    %c2_i32 = arith.constant 2 : i32
    %0 = arith.muli %arg0, %c2_i32 : i32
    %1 = arith.addi %0, %arg1 : i32
    %c0_i32 = arith.constant 0 : i32
    %c0_i32_0 = arith.constant 0 : i32
    return %c0_i32, %1 : i32, i32
  }
  func.func @transform_6(%arg0: i32, %arg1: i32) -> (i32, i32, i32) {
    %c0_i32 = arith.constant 0 : i32
    %c0_i32_0 = arith.constant 0 : i32
    %c0_i32_1 = arith.constant 0 : i32
    return %arg0, %c0_i32, %c0_i32_0 : i32, i32, i32
  }
}

</mosaic_0001>

<bundles_post_ra>
// kernel: scoring_network_forward.1
= control target key start
LH: loop header
LB: loop body
LE: loop exit
PB: predicated region body
PF: predicated region fallthrough
CT: control target
= control target key end

     0   :  { %s5285_s0 = inlined_call_operand.vmem [shape: f32[8,128], index: 0, kind: input, shape index: {}]   ;;  %s5286_s1 = inlined_call_operand.hbm [shape: f32[128,2048], index: 1, kind: input, shape index: {}]   ;;  %s5287_s2 = inlined_call_operand.hbm [shape: f32[1,2048], index: 2, kind: input, shape index: {}]   ;;  %s5288_s3 = inlined_call_operand.hbm [shape: f32[2048,2048], index: 3, kind: input, shape index: {}]   ;;  %s5289_s4 = inlined_call_operand.hbm [shape: f32[1,2048], index: 4, kind: input, shape index: {}]   ;;  %s5290_s5 = inlined_call_operand.hbm [shape: f32[1,2048], index: 5, kind: input, shape index: {}]   ;;  %s5291_s6 = inlined_call_operand.vmem [shape: f32[2,8,128], index: 6, kind: output, shape index: {}]  }
   0x1   :  { %5301 = sst [smem:[#allocation20_spill]] %s5285_s0 }
   0x2   :  { %5302 = sst [smem:[#allocation21_spill]] %s5286_s1 }
   0x3   :  { %5303 = sst [smem:[#allocation22_spill]] %s5291_s6 }
   0x4   :  { %11 = vsyncpa [#allocation4], 0 }
   0x5   :  { %12 = vsyncpa [#allocation6], 0  ;;  %s4016_s21 = smov 0   ;;  %s4018_s22 = smov 0  }
   0x6   :  { %s4020_s23 = smov 0   ;;  %s4022_s24 = smov 0  }
   0x7   :  { %s4024_s25 = smov 0   ;;  %s4026_s26 = smov 0  }
   0x8   :  { %s4028_s27 = smov 0   ;;  %s4030_s28 = smov 0  }
   0x9 LB: > { %5304 = sst [smem:[#allocation13_spill]] %s3948_s22  ;;  %s5292_s29 = sadd.s32 4294967295, %s3972_s28   ;;  %s3972_s28 = sphi %s4030_s28, %s18_s28   ;;  %s3968_s27 = sphi %s4028_s27, %s5334_s27   ;;  %s3964_s26 = sphi %s4026_s26, %s5333_s26   ;;  %s3960_s25 = sphi %s4024_s25, %s5330_s25   ;;  %s3956_s24 = sphi %s4022_s24, %s5329_s24   ;;  %s3952_s23 = sphi %s4020_s23, %s5332_s23   ;;  %s3948_s22 = sphi %s4018_s22, %s5331_s22   ;;  %s3944_s21 = sphi %s4016_s21, %s5328_s21  }
   0xa   : > { %5305 = sst [smem:[#allocation14_spill]] %s3956_s24  ;;  %p111_p0 = scmp.ne.s32.totalorder %s3952_s23, %s3948_s22 }
   0xb   : > { %5306 = sst [smem:[#allocation15_spill]] %s3960_s25  ;;  %p112_p1 = scmp.eq.s32.totalorder %s3972_s28, 0 }
   0xc   : > { %5307 = sst [smem:[#allocation16_spill]] %s3964_s26  ;;  %p117_p2 = scmp.ne.s32.totalorder %s3948_s22, %s3944_s21 }
   0xd   : > { %5308 = sst [smem:[#allocation17_spill]] %s3968_s27  ;;  %p4061_p3 = scmp.eq.s32.totalorder %s5292_s29, 0 }
   0xe   : > { %5309 = sst [smem:[#allocation18_spill]] %s3972_s28  ;;  %p3567_p4 = scmp.ge.s32.totalorder %s3972_s28, 1 }
   0xf   : > { %p4066_p5 = por %p112_p1, %p111_p0  ;;  %p214_p6 = scmp.lt.s32.totalorder %s3972_s28, 5 }
  0x10   : > { %p4073_p7 = por %p4061_p3, %p117_p2  ;;  %s5315_s1 = sld [smem:[#allocation21_spill]] }
  0x11   : > { %p4077_p8 = pnand %p3567_p4, %p214_p6  ;;  %s3974_s13 = smov [#allocation3]  }
  0x12   : > { %s5312_s8 = scalar_select %p4073_p7, 1, 0 }
  0x13   : > { %p3606_p9 = pneg %p4077_p8  ;;  %s230_s14 = sshll.u32 %s3974_s13, 4  ;;  %s231_s14 = int_to_ptr.vmem [resolvable:$true] %s230_s14 }
  0x14   : > { %5313 = sst [smem:[#allocation19_spill]] %s5312_s8  ;;  %p3625_p11 = scmp.lt.s32.totalorder %s3972_s28, 4 }
  0x15   : > { %p4088_p10 = pnand %p3606_p9, %p4061_p3  ;;  %s5293_s16 = smov 2048  }
  0x16   : > { %s228_s12 = sshll.u32 %s5315_s1, 4  ;;  %s3976_s17 = smov 128   ;;  %s229_s12 = int_to_ptr.hbm [resolvable:$true] %s228_s12 }
  0x17   : > { %3609 = dma.hbm_to_vmem [thread:$0]  (!%p4088_p10), %s229_s12, 32768, %s231_s14, [#allocation4], %s5293_s16, %s5293_s16, %s3976_s17  }
  0x18   : > { %p4099_p12 = pnand %p3625_p11, %p4066_p5  ;;  %s27_s19 = sadd.s32 1, %s3964_s26 }
  0x19   : > { %p28_p13 = scmp.ge.s32.totalorder %s27_s19, 2  ;;  %s30_s20 = sadd.s32 1, %s3968_s27 }
  0x1a   : > { %s3561_s21 = sshll.u32 %s3968_s27, 1  ;;  %s104_s10 = sadd.s32 1, %s3952_s23 }
  0x1b   : > { %s5336_s19 = smov (%p28_p13, %s27_s19), 0  ;;  %s5338_s20 = smov (!%p28_p13, %s30_s20), %s3968_s27 }
  0x1c   : > { %s4111_s11 = sadd.s32 %s3964_s26, %s3561_s21  ;;  %s256_s13 = sand.u32 1, %s3972_s28  }
  0x1d   : > { %p32_p0 = scmp.ge.s32.totalorder %s5338_s20, 2  ;;  %s258_s7 = sand.u32 1, %s3952_s23  }
  0x1e   : > { %s3591_s12 = sshll.u32 %s4111_s11, 5  ;;  %s3571_s14 = sshll.u32 %s258_s7, 13 }
  0x1f   : > { %s5340_s20 = smov (%p32_p0, %s5338_s20), 0  ;;  %s267_s16 = scalar_lea.hbm %s5288_s3, %s3591_s12 }
  0x20   : > { %s3562_s1 = sshll.u32 %s5340_s20, 1  ;;  %s268_s27 = sshll.u32 %s267_s16, 4  ;;  %s269_s27 = int_to_ptr.hbm [resolvable:$true] %s268_s27 }
  0x21   : > { %s100_s21 = sadd.s32 %s3562_s1, %s5336_s19  ;;  %s260_s0 = scalar_lea.vmem [#allocation7], %s3571_s14 }
  0x22   : > { %s101_s26 = ssub.s32 %s4111_s11, %s100_s21  ;;  %s270_s24 = sshll.u32 %s260_s0, 4  ;;  %s271_s24 = int_to_ptr.vmem [resolvable:$true] %s270_s24 }
  0x23   : > { %p102_p1 = scmp.eq.s32.totalorder %s101_s26, 0  ;;  %s3575_s25 = sshll.u32 %s258_s7, 2 }
  0x24   : > { %s257_s8 = scalar_lea.sflag [#allocation4], %s256_s13  ;;  %s3977_s22 = smov 512  }
  0x25   : > { %s4125_s6 = scalar_select %p102_p1, %s3952_s23, %s104_s10  }
  0x26   : > { %s3978_s28 = smov 32   ;;  %s5318_s29 = smov 2048  }
  0x27   : > { %3616 = dma.hbm_to_vmem [thread:$0]  (!%p4099_p12), %s269_s27, 131072, %s271_s24, %s257_s8, %s5318_s29, %s3977_s22, %s3978_s28  }
  0x28   : > { %s3577_s12 = sshll.u32 %s4111_s11, 2  ;;  %s284_s26 = scalar_lea.vmem [#allocation8], %s3575_s25 }
  0x29   : > { %s290_s17 = scalar_lea.hbm %s5289_s4, %s3577_s12  ;;  %s294_s14 = sshll.u32 %s284_s26, 4  ;;  %s295_s14 = int_to_ptr.vmem [resolvable:$true] %s294_s14 }
  0x2a   : > { %s292_s0 = sshll.u32 %s290_s17, 4  ;;  %s243_s13 = sshll.u32 %s5287_s2, 4  ;;  %s293_s0 = int_to_ptr.hbm [resolvable:$true] %s292_s0  ;;  %s244_s13 = int_to_ptr.hbm [resolvable:$true] %s243_s13 }
  0x2b   : > { %3619 = dma.hbm_to_vmem [thread:$0]  (!%p4099_p12), %s293_s0, 64, %s295_s14, %s257_s8  }
  0x2c   : > { %s3979_s21 = smov [#allocation5]   ;;  %s311_s28 = scalar_lea.hbm %s5290_s5, %s3577_s12 }
  0x2d   : > { %s245_s22 = sshll.u32 %s3979_s21, 4  ;;  %s313_s11 = sshll.u32 %s311_s28, 4  ;;  %s246_s22 = int_to_ptr.vmem [resolvable:$true] %s245_s22  ;;  %s314_s11 = int_to_ptr.hbm [resolvable:$true] %s313_s11 }
  0x2e   : > { %3612 = dma.hbm_to_vmem [thread:$0]  (!%p4088_p10), %s244_s13, 256, %s246_s22, [#allocation6]  }
  0x2f   : > { %s305_s29 = scalar_lea.vmem [#allocation9], %s3575_s25  ;;  %324 = sbr.rel (%p4077_p8) target bundleno = 1474 (0x5c2), region = 44 }
  0x30   : > { %s315_s1 = sshll.u32 %s305_s29, 4  ;;  %s316_s1 = int_to_ptr.vmem [resolvable:$true] %s315_s1 }
  0x31   : > { %3622 = dma.hbm_to_vmem [thread:$0]  (!%p4099_p12), %s314_s11, 64, %s316_s1, %s257_s8  }
  0x34   : > { %3931 = dma.done.wait (%p4061_p3), [#allocation4], 32768  }
  0x35   : > { %3933 = vsyncadd (%p4061_p3), [#allocation4], 4294934528 }
  0x36   : > { %3935 = dma.done.wait (%p4061_p3), [#allocation6], 256  }
  0x37   : > { %3937 = vsyncadd (%p4061_p3), [#allocation6], 4294967040  ;;  %s5319_s25 = sld [smem:[#allocation18_spill]] }
  0x38   : > { %s5321_s12 = sld [smem:[#allocation13_spill]] }
  0x3d   : > { %s5320_s15 = sadd.s32 4294967295, %s5319_s25  }
  0x3e   : > { %s336_s8 = sand.u32 1, %s5320_s15   ;;  %s338_s16 = sand.u32 1, %s5321_s12  }
  0x3f   : > { %s3584_s9 = sshll.u32 %s338_s16, 13  ;;  %s337_s17 = scalar_lea.sflag [#allocation4], %s336_s8 }
  0x40   : > { %s4159_s26 = scalar_lea.vmem [#allocation7], %s3584_s9 }
  0x41   : > { %3939 = dma.done.wait (%p4073_p7), %s337_s17, 131200  }
  0x42   : > { %3941 = vsyncadd (%p4073_p7), %s337_s17, 4294836096  ;;  %s5323_s14 = sld [smem:[#allocation15_spill]]  ;;  %s4165_s0 = sshll.u32 %s338_s16, 2 }
  0x43   : > { %s5324_s13 = sld [smem:[#allocation22_spill]]  ;;  %s350_s22 = scalar_lea.vmem [#allocation8], %s4165_s0 }
  0x44   : > { %s360_s24 = scalar_lea.vmem [#allocation9], %s4165_s0  ;;  %s5325_s27 = sld [smem:[#allocation14_spill]] }
  0x48   : > { %p408_p2 = scmp.lt.s32.totalorder %s5323_s14, 1 }
  0x4a   : > { %s5342_s14 = smov (!%p408_p2, %s5323_s14), 1  ;;  %p3588_p3 = scmp.ne.s32.totalorder %s5325_s27, 0 }
  0x4b   : > { %s3587_s30 = sshll.u32 %s5342_s14, 3  ;;  %s5326_s29 = sld [smem:[#allocation20_spill]] (!%p3588_p3) }
  0x4c   : > { %s4172_s21 = scalar_lea.vmem %s5324_s13, %s3587_s30  ;;  %415 = sbr.rel (%p3588_p3) target bundleno = 353 (0x161), region = 68 }
  0x51   : > { %v659_v0 = vld [vmem:[#allocation3 + $0x790] sm:$0xff]  ;;  %v660_v1 = vld [vmem:[#allocation3 + $0x798] sm:$0xff]  ;;  %v657_v6 = vld [vmem:[#allocation3 + $0x780] sm:$0xff] }
  0x52   : > { %v643_v2 = vld [vmem:[#allocation3 + $0x710] sm:$0xff]  ;;  %749 = vmatpush.msra.mxu2 %v659_v0  ;;  %769 = vmatpush.msra.mxu3 %v660_v1  ;;  %v644_v3 = vld [vmem:[#allocation3 + $0x718] sm:$0xff]  ;;  %v658_v7 = vld [vmem:[#allocation3 + $0x788] sm:$0xff] }
  0x53   : > { %v627_v4 = vld [vmem:[#allocation3 + $0x690] sm:$0xff]  ;;  %v628_v5 = vld [vmem:[#allocation3 + $0x698] sm:$0xff]  ;;  %v641_v8 = vld [vmem:[#allocation3 + $0x700] sm:$0xff]  ;;  %709 = vmatpush.msra.mxu0 %v657_v6  ;;  %729 = vmatpush.msra.mxu1 %v658_v7 }
  0x54   : > { %750 = vmatpush.msra.mxu2 %v643_v2  ;;  %770 = vmatpush.msra.mxu3 %v644_v3  ;;  %v642_v9 = vld [vmem:[#allocation3 + $0x708] sm:$0xff]  ;;  %v611_v10 = vld [vmem:[#allocation3 + $0x610] sm:$0xff]  ;;  %v612_v11 = vld [vmem:[#allocation3 + $0x618] sm:$0xff] }
  0x55   : > { %v625_v12 = vld [vmem:[#allocation3 + $0x680] sm:$0xff]  ;;  %v626_v13 = vld [vmem:[#allocation3 + $0x688] sm:$0xff]  ;;  %710 = vmatpush.msra.mxu0 %v641_v8  ;;  %730 = vmatpush.msra.mxu1 %v642_v9  ;;  %v595_v14 = vld [vmem:[#allocation3 + $0x590] sm:$0xff] }
  0x56   : > { %751 = vmatpush.msra.mxu2 %v627_v4  ;;  %771 = vmatpush.msra.mxu3 %v628_v5  ;;  %v596_v15 = vld [vmem:[#allocation3 + $0x598] sm:$0xff]  ;;  %v609_v16 = vld [vmem:[#allocation3 + $0x600] sm:$0xff]  ;;  %v610_v17 = vld [vmem:[#allocation3 + $0x608] sm:$0xff] }
  0x57   : > { %711 = vmatpush.msra.mxu0 %v625_v12  ;;  %731 = vmatpush.msra.mxu1 %v626_v13  ;;  %v579_v18 = vld [vmem:[#allocation3 + $0x510] sm:$0xff]  ;;  %v580_v19 = vld [vmem:[#allocation3 + $0x518] sm:$0xff]  ;;  %v593_v20 = vld [vmem:[#allocation3 + $0x580] sm:$0xff] }
  0x58   : > { %752 = vmatpush.msra.mxu2 %v611_v10  ;;  %772 = vmatpush.msra.mxu3 %v612_v11  ;;  %v594_v21 = vld [vmem:[#allocation3 + $0x588] sm:$0xff]  ;;  %v563_v22 = vld [vmem:[#allocation3 + $0x490] sm:$0xff]  ;;  %v564_v23 = vld [vmem:[#allocation3 + $0x498] sm:$0xff] }
  0x59   : > { %712 = vmatpush.msra.mxu0 %v609_v16  ;;  %732 = vmatpush.msra.mxu1 %v610_v17  ;;  %v577_v24 = vld [vmem:[#allocation3 + $0x500] sm:$0xff]  ;;  %v578_v25 = vld [vmem:[#allocation3 + $0x508] sm:$0xff]  ;;  %v547_v26 = vld [vmem:[#allocation3 + $0x410] sm:$0xff] }
  0x5a   : > { %753 = vmatpush.msra.mxu2 %v595_v14  ;;  %773 = vmatpush.msra.mxu3 %v596_v15  ;;  %v548_v27 = vld [vmem:[#allocation3 + $0x418] sm:$0xff]  ;;  %v561_v28 = vld [vmem:[#allocation3 + $0x480] sm:$0xff]  ;;  %v562_v29 = vld [vmem:[#allocation3 + $0x488] sm:$0xff] }
  0x5b   : > { %713 = vmatpush.msra.mxu0 %v593_v20  ;;  %733 = vmatpush.msra.mxu1 %v594_v21  ;;  %v531_v30 = vld [vmem:[#allocation3 + $0x390] sm:$0xff]  ;;  %v532_v31 = vld [vmem:[#allocation3 + $0x398] sm:$0xff]  ;;  %v545_v32 = vld [vmem:[#allocation3 + $0x400] sm:$0xff] }
  0x5c   : > { %754 = vmatpush.msra.mxu2 %v579_v18  ;;  %774 = vmatpush.msra.mxu3 %v580_v19  ;;  %v546_v33 = vld [vmem:[#allocation3 + $0x408] sm:$0xff]  ;;  %v515_v34 = vld [vmem:[#allocation3 + $0x310] sm:$0xff]  ;;  %v516_v35 = vld [vmem:[#allocation3 + $0x318] sm:$0xff] }
  0x5d   : > { %714 = vmatpush.msra.mxu0 %v577_v24  ;;  %734 = vmatpush.msra.mxu1 %v578_v25  ;;  %v529_v36 = vld [vmem:[#allocation3 + $0x380] sm:$0xff]  ;;  %v530_v37 = vld [vmem:[#allocation3 + $0x388] sm:$0xff]  ;;  %v499_v38 = vld [vmem:[#allocation3 + $0x290] sm:$0xff] }
  0x5e   : > { %755 = vmatpush.msra.mxu2 %v563_v22  ;;  %775 = vmatpush.msra.mxu3 %v564_v23  ;;  %v500_v39 = vld [vmem:[#allocation3 + $0x298] sm:$0xff]  ;;  %v513_v40 = vld [vmem:[#allocation3 + $0x300] sm:$0xff]  ;;  %v514_v41 = vld [vmem:[#allocation3 + $0x308] sm:$0xff] }
  0x5f   : > { %715 = vmatpush.msra.mxu0 %v561_v28  ;;  %735 = vmatpush.msra.mxu1 %v562_v29  ;;  %v483_v42 = vld [vmem:[#allocation3 + $0x210] sm:$0xff]  ;;  %v484_v43 = vld [vmem:[#allocation3 + $0x218] sm:$0xff]  ;;  %v497_v44 = vld [vmem:[#allocation3 + $0x280] sm:$0xff] }
  0x60   : > { %756 = vmatpush.msra.mxu2 %v547_v26  ;;  %776 = vmatpush.msra.mxu3 %v548_v27  ;;  %v498_v45 = vld [vmem:[#allocation3 + $0x288] sm:$0xff]  ;;  %v467_v46 = vld [vmem:[#allocation3 + $0x190] sm:$0xff]  ;;  %v468_v47 = vld [vmem:[#allocation3 + $0x198] sm:$0xff] }
  0x61   : > { %716 = vmatpush.msra.mxu0 %v545_v32  ;;  %736 = vmatpush.msra.mxu1 %v546_v33  ;;  %v481_v48 = vld [vmem:[#allocation3 + $0x200] sm:$0xff]  ;;  %v482_v49 = vld [vmem:[#allocation3 + $0x208] sm:$0xff]  ;;  %v451_v50 = vld [vmem:[#allocation3 + $0x110] sm:$0xff] }
  0x62   : > { %757 = vmatpush.msra.mxu2 %v531_v30  ;;  %777 = vmatpush.msra.mxu3 %v532_v31  ;;  %v452_v51 = vld [vmem:[#allocation3 + $0x118] sm:$0xff]  ;;  %v465_v52 = vld [vmem:[#allocation3 + $0x180] sm:$0xff]  ;;  %v466_v53 = vld [vmem:[#allocation3 + $0x188] sm:$0xff] }
  0x63   : > { %717 = vmatpush.msra.mxu0 %v529_v36  ;;  %737 = vmatpush.msra.mxu1 %v530_v37  ;;  %v435_v54 = vld [vmem:[#allocation3 + $0x90] sm:$0xff]  ;;  %v436_v55 = vld [vmem:[#allocation3 + $0x98] sm:$0xff]  ;;  %v449_v56 = vld [vmem:[#allocation3 + $0x100] sm:$0xff] }
  0x64   : > { %758 = vmatpush.msra.mxu2 %v515_v34  ;;  %778 = vmatpush.msra.mxu3 %v516_v35  ;;  %v450_v57 = vld [vmem:[#allocation3 + $0x108] sm:$0xff]  ;;  %v419_v58 = vld [vmem:[#allocation3 + $0x10] sm:$0xff]  ;;  %v420_v59 = vld [vmem:[#allocation3 + $0x18] sm:$0xff] }
  0x65   : > { %718 = vmatpush.msra.mxu0 %v513_v40  ;;  %738 = vmatpush.msra.mxu1 %v514_v41  ;;  %v663_v60 = vld [vmem:[#allocation3 + $0x7b0] sm:$0xff]  ;;  %v664_v61 = vld [vmem:[#allocation3 + $0x7b8] sm:$0xff]  ;;  %v433_v62 = vld [vmem:[#allocation3 + $0x80] sm:$0xff] }
  0x66   : > { %759 = vmatpush.msra.mxu2 %v499_v38  ;;  %779 = vmatpush.msra.mxu3 %v500_v39  ;;  %v434_v63 = vld [vmem:[#allocation3 + $0x88] sm:$0xff]  ;;  %v647_v0 = vld [vmem:[#allocation3 + $0x730] sm:$0xff]  ;;  %v648_v1 = vld [vmem:[#allocation3 + $0x738] sm:$0xff] }
  0x67   : > { %719 = vmatpush.msra.mxu0 %v497_v44  ;;  %739 = vmatpush.msra.mxu1 %v498_v45  ;;  %v417_v2 = vld [vmem:[#allocation3] sm:$0xff]  ;;  %v418_v3 = vld [vmem:[#allocation3 + $0x8] sm:$0xff]  ;;  %v631_v4 = vld [vmem:[#allocation3 + $0x6b0] sm:$0xff] }
  0x68   : > { %760 = vmatpush.msra.mxu2 %v483_v42  ;;  %780 = vmatpush.msra.mxu3 %v484_v43  ;;  %v632_v5 = vld [vmem:[#allocation3 + $0x6b8] sm:$0xff]  ;;  %v661_v6 = vld [vmem:[#allocation3 + $0x7a0] sm:$0xff]  ;;  %v662_v7 = vld [vmem:[#allocation3 + $0x7a8] sm:$0xff] }
  0x69   : > { %720 = vmatpush.msra.mxu0 %v481_v48  ;;  %740 = vmatpush.msra.mxu1 %v482_v49  ;;  %v615_v8 = vld [vmem:[#allocation3 + $0x630] sm:$0xff]  ;;  %v616_v9 = vld [vmem:[#allocation3 + $0x638] sm:$0xff]  ;;  %v645_v10 = vld [vmem:[#allocation3 + $0x720] sm:$0xff] }
  0x6a   : > { %761 = vmatpush.msra.mxu2 %v467_v46  ;;  %781 = vmatpush.msra.mxu3 %v468_v47  ;;  %v646_v11 = vld [vmem:[#allocation3 + $0x728] sm:$0xff]  ;;  %v599_v12 = vld [vmem:[#allocation3 + $0x5b0] sm:$0xff]  ;;  %v600_v13 = vld [vmem:[#allocation3 + $0x5b8] sm:$0xff] }
  0x6b   : > { %721 = vmatpush.msra.mxu0 %v465_v52  ;;  %741 = vmatpush.msra.mxu1 %v466_v53  ;;  %v629_v14 = vld [vmem:[#allocation3 + $0x6a0] sm:$0xff]  ;;  %v630_v15 = vld [vmem:[#allocation3 + $0x6a8] sm:$0xff]  ;;  %v583_v16 = vld [vmem:[#allocation3 + $0x530] sm:$0xff] }
  0x6c   : > { %762 = vmatpush.msra.mxu2 %v451_v50  ;;  %782 = vmatpush.msra.mxu3 %v452_v51  ;;  %v584_v17 = vld [vmem:[#allocation3 + $0x538] sm:$0xff]  ;;  %v613_v18 = vld [vmem:[#allocation3 + $0x620] sm:$0xff]  ;;  %v614_v19 = vld [vmem:[#allocation3 + $0x628] sm:$0xff] }
  0x6d   : > { %722 = vmatpush.msra.mxu0 %v449_v56  ;;  %742 = vmatpush.msra.mxu1 %v450_v57  ;;  %v567_v20 = vld [vmem:[#allocation3 + $0x4b0] sm:$0xff]  ;;  %v568_v21 = vld [vmem:[#allocation3 + $0x4b8] sm:$0xff]  ;;  %v597_v22 = vld [vmem:[#allocation3 + $0x5a0] sm:$0xff] }
  0x6e   : > { %763 = vmatpush.msra.mxu2 %v435_v54  ;;  %783 = vmatpush.msra.mxu3 %v436_v55  ;;  %v598_v23 = vld [vmem:[#allocation3 + $0x5a8] sm:$0xff]  ;;  %v551_v24 = vld [vmem:[#allocation3 + $0x430] sm:$0xff]  ;;  %v552_v25 = vld [vmem:[#allocation3 + $0x438] sm:$0xff] }
  0x6f   : > { %723 = vmatpush.msra.mxu0 %v433_v62  ;;  %743 = vmatpush.msra.mxu1 %v434_v63  ;;  %v581_v26 = vld [vmem:[#allocation3 + $0x520] sm:$0xff]  ;;  %v582_v27 = vld [vmem:[#allocation3 + $0x528] sm:$0xff]  ;;  %v535_v28 = vld [vmem:[#allocation3 + $0x3b0] sm:$0xff] }
  0x70   : > { %764 = vmatpush.msra.mxu2 %v419_v58  ;;  %784 = vmatpush.msra.mxu3 %v420_v59  ;;  %v536_v29 = vld [vmem:[#allocation3 + $0x3b8] sm:$0xff]  ;;  %v565_v30 = vld [vmem:[#allocation3 + $0x4a0] sm:$0xff]  ;;  %v566_v31 = vld [vmem:[#allocation3 + $0x4a8] sm:$0xff] }
  0x71   : > { %724 = vmatpush.msra.mxu0 %v417_v2  ;;  %744 = vmatpush.msra.mxu1 %v418_v3  ;;  %v519_v32 = vld [vmem:[#allocation3 + $0x330] sm:$0xff]  ;;  %v520_v33 = vld [vmem:[#allocation3 + $0x338] sm:$0xff]  ;;  %v549_v34 = vld [vmem:[#allocation3 + $0x420] sm:$0xff] }
  0x72   : > { %829 = vmatpush.msrb.mxu2 %v663_v60  ;;  %849 = vmatpush.msrb.mxu3 %v664_v61  ;;  %v550_v35 = vld [vmem:[#allocation3 + $0x428] sm:$0xff]  ;;  %v503_v36 = vld [vmem:[#allocation3 + $0x2b0] sm:$0xff]  ;;  %v504_v37 = vld [vmem:[#allocation3 + $0x2b8] sm:$0xff] }
  0x73   : > { %789 = vmatpush.msrb.mxu0 %v661_v6  ;;  %809 = vmatpush.msrb.mxu1 %v662_v7  ;;  %v533_v38 = vld [vmem:[#allocation3 + $0x3a0] sm:$0xff]  ;;  %v534_v39 = vld [vmem:[#allocation3 + $0x3a8] sm:$0xff]  ;;  %v487_v40 = vld [vmem:[#allocation3 + $0x230] sm:$0xff] }
  0x74   : > { %830 = vmatpush.msrb.mxu2 %v647_v0  ;;  %850 = vmatpush.msrb.mxu3 %v648_v1  ;;  %v488_v41 = vld [vmem:[#allocation3 + $0x238] sm:$0xff]  ;;  %v517_v42 = vld [vmem:[#allocation3 + $0x320] sm:$0xff]  ;;  %v518_v43 = vld [vmem:[#allocation3 + $0x328] sm:$0xff] }
  0x75   : > { %790 = vmatpush.msrb.mxu0 %v645_v10  ;;  %810 = vmatpush.msrb.mxu1 %v646_v11  ;;  %v471_v44 = vld [vmem:[#allocation3 + $0x1b0] sm:$0xff]  ;;  %v472_v45 = vld [vmem:[#allocation3 + $0x1b8] sm:$0xff]  ;;  %v501_v46 = vld [vmem:[#allocation3 + $0x2a0] sm:$0xff] }
  0x76   : > { %831 = vmatpush.msrb.mxu2 %v631_v4  ;;  %851 = vmatpush.msrb.mxu3 %v632_v5  ;;  %v502_v47 = vld [vmem:[#allocation3 + $0x2a8] sm:$0xff]  ;;  %v455_v48 = vld [vmem:[#allocation3 + $0x130] sm:$0xff]  ;;  %v456_v49 = vld [vmem:[#allocation3 + $0x138] sm:$0xff] }
  0x77   : > { %791 = vmatpush.msrb.mxu0 %v629_v14  ;;  %811 = vmatpush.msrb.mxu1 %v630_v15  ;;  %v485_v50 = vld [vmem:[#allocation3 + $0x220] sm:$0xff]  ;;  %v486_v51 = vld [vmem:[#allocation3 + $0x228] sm:$0xff]  ;;  %v439_v52 = vld [vmem:[#allocation3 + $0xb0] sm:$0xff] }
  0x78   : > { %832 = vmatpush.msrb.mxu2 %v615_v8  ;;  %852 = vmatpush.msrb.mxu3 %v616_v9  ;;  %v440_v53 = vld [vmem:[#allocation3 + $0xb8] sm:$0xff]  ;;  %v469_v54 = vld [vmem:[#allocation3 + $0x1a0] sm:$0xff]  ;;  %v470_v55 = vld [vmem:[#allocation3 + $0x1a8] sm:$0xff] }
  0x79   : > { %792 = vmatpush.msrb.mxu0 %v613_v18  ;;  %812 = vmatpush.msrb.mxu1 %v614_v19  ;;  %v423_v56 = vld [vmem:[#allocation3 + $0x30] sm:$0xff]  ;;  %v424_v57 = vld [vmem:[#allocation3 + $0x38] sm:$0xff]  ;;  %v4180_v58 = vld [vmem:[%s5326_s29] sm:$0xff] }
  0x7a   : > { %833 = vmatpush.msrb.mxu2 %v599_v12  ;;  %853 = vmatpush.msrb.mxu3 %v600_v13  ;;  %v667_v59 = vld [vmem:[#allocation3 + $0x7d0] sm:$0xff]  ;;  %v668_v60 = vld [vmem:[#allocation3 + $0x7d8] sm:$0xff]  ;;  %v453_v61 = vld [vmem:[#allocation3 + $0x120] sm:$0xff] }
  0x7b   : > { %793 = vmatpush.msrb.mxu0 %v597_v22  ;;  %813 = vmatpush.msrb.mxu1 %v598_v23  ;;  %v454_v62 = vld [vmem:[#allocation3 + $0x128] sm:$0xff]  ;;  %v651_v63 = vld [vmem:[#allocation3 + $0x750] sm:$0xff]  ;;  %v652_v0 = vld [vmem:[#allocation3 + $0x758] sm:$0xff] }
  0x7c   : > { %834 = vmatpush.msrb.mxu2 %v583_v16  ;;  %854 = vmatpush.msrb.mxu3 %v584_v17  ;;  %v437_v1 = vld [vmem:[#allocation3 + $0xa0] sm:$0xff]  ;;  %v438_v2 = vld [vmem:[#allocation3 + $0xa8] sm:$0xff]  ;;  %v635_v3 = vld [vmem:[#allocation3 + $0x6d0] sm:$0xff] }
  0x7d   : > { %794 = vmatpush.msrb.mxu0 %v581_v26  ;;  %814 = vmatpush.msrb.mxu1 %v582_v27  ;;  %v636_v4 = vld [vmem:[#allocation3 + $0x6d8] sm:$0xff]  ;;  %v421_v5 = vld [vmem:[#allocation3 + $0x20] sm:$0xff]  ;;  %v422_v6 = vld [vmem:[#allocation3 + $0x28] sm:$0xff] }
  0x7e   : > { %835 = vmatpush.msrb.mxu2 %v567_v20  ;;  %855 = vmatpush.msrb.mxu3 %v568_v21  ;;  %v665_v7 = vld [vmem:[#allocation3 + $0x7c0] sm:$0xff]  ;;  %v666_v8 = vld [vmem:[#allocation3 + $0x7c8] sm:$0xff]  ;;  %v619_v9 = vld [vmem:[#allocation3 + $0x650] sm:$0xff] }
  0x7f   : > { %795 = vmatpush.msrb.mxu0 %v565_v30  ;;  %815 = vmatpush.msrb.mxu1 %v566_v31  ;;  %v620_v10 = vld [vmem:[#allocation3 + $0x658] sm:$0xff]  ;;  %v649_v11 = vld [vmem:[#allocation3 + $0x740] sm:$0xff]  ;;  %v650_v12 = vld [vmem:[#allocation3 + $0x748] sm:$0xff] }
  0x80   : > { %836 = vmatpush.msrb.mxu2 %v551_v24  ;;  %856 = vmatpush.msrb.mxu3 %v552_v25  ;;  %v603_v13 = vld [vmem:[#allocation3 + $0x5d0] sm:$0xff]  ;;  %v604_v14 = vld [vmem:[#allocation3 + $0x5d8] sm:$0xff]  ;;  %v633_v15 = vld [vmem:[#allocation3 + $0x6c0] sm:$0xff] }
  0x81   : > { %796 = vmatpush.msrb.mxu0 %v549_v34  ;;  %816 = vmatpush.msrb.mxu1 %v550_v35  ;;  %v634_v16 = vld [vmem:[#allocation3 + $0x6c8] sm:$0xff]  ;;  %v587_v17 = vld [vmem:[#allocation3 + $0x550] sm:$0xff]  ;;  %v588_v18 = vld [vmem:[#allocation3 + $0x558] sm:$0xff] }
  0x82   : > { %837 = vmatpush.msrb.mxu2 %v535_v28  ;;  %857 = vmatpush.msrb.mxu3 %v536_v29  ;;  %v617_v19 = vld [vmem:[#allocation3 + $0x640] sm:$0xff]  ;;  %v618_v20 = vld [vmem:[#allocation3 + $0x648] sm:$0xff]  ;;  %v571_v21 = vld [vmem:[#allocation3 + $0x4d0] sm:$0xff] }
  0x83   : > { %797 = vmatpush.msrb.mxu0 %v533_v38  ;;  %817 = vmatpush.msrb.mxu1 %v534_v39  ;;  %v572_v22 = vld [vmem:[#allocation3 + $0x4d8] sm:$0xff]  ;;  %v601_v23 = vld [vmem:[#allocation3 + $0x5c0] sm:$0xff]  ;;  %v602_v24 = vld [vmem:[#allocation3 + $0x5c8] sm:$0xff] }
  0x84   : > { %838 = vmatpush.msrb.mxu2 %v519_v32  ;;  %858 = vmatpush.msrb.mxu3 %v520_v33  ;;  %v555_v25 = vld [vmem:[#allocation3 + $0x450] sm:$0xff]  ;;  %v556_v26 = vld [vmem:[#allocation3 + $0x458] sm:$0xff]  ;;  %v585_v27 = vld [vmem:[#allocation3 + $0x540] sm:$0xff] }
  0x85   : > { %798 = vmatpush.msrb.mxu0 %v517_v42  ;;  %818 = vmatpush.msrb.mxu1 %v518_v43  ;;  %v586_v28 = vld [vmem:[#allocation3 + $0x548] sm:$0xff]  ;;  %v539_v29 = vld [vmem:[#allocation3 + $0x3d0] sm:$0xff]  ;;  %v540_v30 = vld [vmem:[#allocation3 + $0x3d8] sm:$0xff] }
  0x86   : > { %839 = vmatpush.msrb.mxu2 %v503_v36  ;;  %859 = vmatpush.msrb.mxu3 %v504_v37  ;;  %v569_v31 = vld [vmem:[#allocation3 + $0x4c0] sm:$0xff]  ;;  %v570_v32 = vld [vmem:[#allocation3 + $0x4c8] sm:$0xff]  ;;  %v523_v33 = vld [vmem:[#allocation3 + $0x350] sm:$0xff] }
  0x87   : > { %799 = vmatpush.msrb.mxu0 %v501_v46  ;;  %819 = vmatpush.msrb.mxu1 %v502_v47  ;;  %v524_v34 = vld [vmem:[#allocation3 + $0x358] sm:$0xff]  ;;  %v553_v35 = vld [vmem:[#allocation3 + $0x440] sm:$0xff]  ;;  %v554_v36 = vld [vmem:[#allocation3 + $0x448] sm:$0xff] }
  0x88   : > { %840 = vmatpush.msrb.mxu2 %v487_v40  ;;  %860 = vmatpush.msrb.mxu3 %v488_v41  ;;  %v507_v37 = vld [vmem:[#allocation3 + $0x2d0] sm:$0xff]  ;;  %v508_v38 = vld [vmem:[#allocation3 + $0x2d8] sm:$0xff]  ;;  %v537_v39 = vld [vmem:[#allocation3 + $0x3c0] sm:$0xff] }
  0x89   : > { %800 = vmatpush.msrb.mxu0 %v485_v50  ;;  %820 = vmatpush.msrb.mxu1 %v486_v51  ;;  %v538_v40 = vld [vmem:[#allocation3 + $0x3c8] sm:$0xff]  ;;  %v491_v41 = vld [vmem:[#allocation3 + $0x250] sm:$0xff]  ;;  %v492_v42 = vld [vmem:[#allocation3 + $0x258] sm:$0xff] }
  0x8a   : > { %841 = vmatpush.msrb.mxu2 %v471_v44  ;;  %861 = vmatpush.msrb.mxu3 %v472_v45  ;;  %v521_v43 = vld [vmem:[#allocation3 + $0x340] sm:$0xff]  ;;  %v522_v44 = vld [vmem:[#allocation3 + $0x348] sm:$0xff]  ;;  %v475_v45 = vld [vmem:[#allocation3 + $0x1d0] sm:$0xff] }
  0x8b   : > { %801 = vmatpush.msrb.mxu0 %v469_v54  ;;  %821 = vmatpush.msrb.mxu1 %v470_v55  ;;  %v476_v46 = vld [vmem:[#allocation3 + $0x1d8] sm:$0xff]  ;;  %v505_v47 = vld [vmem:[#allocation3 + $0x2c0] sm:$0xff] }
  0x8c   : > { %842 = vmatpush.msrb.mxu2 %v455_v48  ;;  %862 = vmatpush.msrb.mxu3 %v456_v49  ;;  %v506_v48 = vld [vmem:[#allocation3 + $0x2c8] sm:$0xff]  ;;  %v459_v49 = vld [vmem:[#allocation3 + $0x150] sm:$0xff]  ;;  %v460_v50 = vld [vmem:[#allocation3 + $0x158] sm:$0xff] }
  0x8d   : > { %765 = vmatmul.f32.vlgmr.msra.gmra.mxu2 %v4180_v58  ;;  %785 = vmatmul.f32.vlgmr.msra.gmra.mxu3 %v4180_v58  ;;  %v489_v51 = vld [vmem:[#allocation3 + $0x240] sm:$0xff]  ;;  %v444_v54 = vld [vmem:[#allocation3 + $0xd8] sm:$0xff] }
  0x8e   : > { %843 = vmatpush.msrb.mxu2 %v439_v52  ;;  %863 = vmatpush.msrb.mxu3 %v440_v53  ;;  %v490_v52 = vld [vmem:[#allocation3 + $0x248] sm:$0xff]  ;;  %v443_v53 = vld [vmem:[#allocation3 + $0xd0] sm:$0xff]  ;;  %v473_v55 = vld [vmem:[#allocation3 + $0x1c0] sm:$0xff] }
  0x8f   : > { %802 = vmatpush.msrb.mxu0 %v453_v61  ;;  %822 = vmatpush.msrb.mxu1 %v454_v62  ;;  %v672_v61 = vld [vmem:[#allocation3 + $0x7f8] sm:$0xff]  ;;  %v457_v62 = vld [vmem:[#allocation3 + $0x140] sm:$0xff] }
  0x90   : > { %844 = vmatpush.msrb.mxu2 %v423_v56  ;;  %864 = vmatpush.msrb.mxu3 %v424_v57  ;;  %v474_v56 = vld [vmem:[#allocation3 + $0x1c8] sm:$0xff]  ;;  %v427_v57 = vld [vmem:[#allocation3 + $0x50] sm:$0xff] }
  0x91   : > { %803 = vmatpush.msrb.mxu0 %v437_v1  ;;  %823 = vmatpush.msrb.mxu1 %v438_v2  ;;  %v656_v1 = vld [vmem:[#allocation3 + $0x778] sm:$0xff]  ;;  %v441_v2 = vld [vmem:[#allocation3 + $0xc0] sm:$0xff] }
  0x92   : > { %909 = vmatpush.msra.mxu2 %v667_v59  ;;  %929 = vmatpush.msra.mxu3 %v668_v60  ;;  %v428_v59 = vld [vmem:[#allocation3 + $0x58] sm:$0xff]  ;;  %v671_v60 = vld [vmem:[#allocation3 + $0x7f0] sm:$0xff] }
  0x93   : > { %804 = vmatpush.msrb.mxu0 %v421_v5  ;;  %824 = vmatpush.msrb.mxu1 %v422_v6  ;;  %v640_v5 = vld [vmem:[#allocation3 + $0x6f8] sm:$0xff]  ;;  %v425_v6 = vld [vmem:[#allocation3 + $0x40] sm:$0xff] }
  0x94   : > { %910 = vmatpush.msra.mxu2 %v651_v63  ;;  %930 = vmatpush.msra.mxu3 %v652_v0  ;;  %v458_v63 = vld [vmem:[#allocation3 + $0x148] sm:$0xff]  ;;  %v655_v0 = vld [vmem:[#allocation3 + $0x770] sm:$0xff] }
  0x95   : > { %725 = vmatmul.f32.vlgmr.msra.gmra.mxu0 %v4180_v58  ;;  %745 = vmatmul.f32.vlgmr.msra.gmra.mxu1 %v4180_v58 }
  0x96   : > { %911 = vmatpush.msra.mxu2 %v635_v3  ;;  %931 = vmatpush.msra.mxu3 %v636_v4  ;;  %v442_v3 = vld [vmem:[#allocation3 + $0xc8] sm:$0xff]  ;;  %v639_v4 = vld [vmem:[#allocation3 + $0x6f0] sm:$0xff] }
  0x97   : > { %869 = vmatpush.msra.mxu0 %v665_v7  ;;  %889 = vmatpush.msra.mxu1 %v666_v8  ;;  %v426_v7 = vld [vmem:[#allocation3 + $0x48] sm:$0xff]  ;;  %v669_v8 = vld [vmem:[#allocation3 + $0x7e0] sm:$0xff] }
  0x98   : > { %912 = vmatpush.msra.mxu2 %v619_v9  ;;  %932 = vmatpush.msra.mxu3 %v620_v10  ;;  %v670_v9 = vld [vmem:[#allocation3 + $0x7e8] sm:$0xff]  ;;  %v623_v10 = vld [vmem:[#allocation3 + $0x670] sm:$0xff] }
  0x99   : > { %870 = vmatpush.msra.mxu0 %v649_v11  ;;  %890 = vmatpush.msra.mxu1 %v650_v12  ;;  %v624_v11 = vld [vmem:[#allocation3 + $0x678] sm:$0xff]  ;;  %v653_v12 = vld [vmem:[#allocation3 + $0x760] sm:$0xff] }
  0x9a   : > { %913 = vmatpush.msra.mxu2 %v603_v13  ;;  %933 = vmatpush.msra.mxu3 %v604_v14  ;;  %v654_v13 = vld [vmem:[#allocation3 + $0x768] sm:$0xff]  ;;  %v607_v14 = vld [vmem:[#allocation3 + $0x5f0] sm:$0xff] }
  0x9b   : > { %871 = vmatpush.msra.mxu0 %v633_v15  ;;  %891 = vmatpush.msra.mxu1 %v634_v16  ;;  %v608_v15 = vld [vmem:[#allocation3 + $0x5f8] sm:$0xff]  ;;  %v637_v16 = vld [vmem:[#allocation3 + $0x6e0] sm:$0xff] }
  0x9c   : > { %914 = vmatpush.msra.mxu2 %v587_v17  ;;  %934 = vmatpush.msra.mxu3 %v588_v18  ;;  %v638_v17 = vld [vmem:[#allocation3 + $0x6e8] sm:$0xff]  ;;  %v591_v18 = vld [vmem:[#allocation3 + $0x570] sm:$0xff] }
  0x9d   : > { %872 = vmatpush.msra.mxu0 %v617_v19  ;;  %892 = vmatpush.msra.mxu1 %v618_v20  ;;  %v592_v19 = vld [vmem:[#allocation3 + $0x578] sm:$0xff]  ;;  %v621_v20 = vld [vmem:[#allocation3 + $0x660] sm:$0xff] }
  0x9e   : > { %915 = vmatpush.msra.mxu2 %v571_v21  ;;  %935 = vmatpush.msra.mxu3 %v572_v22  ;;  %v622_v21 = vld [vmem:[#allocation3 + $0x668] sm:$0xff]  ;;  %v575_v22 = vld [vmem:[#allocation3 + $0x4f0] sm:$0xff] }
  0x9f   : > { %873 = vmatpush.msra.mxu0 %v601_v23  ;;  %893 = vmatpush.msra.mxu1 %v602_v24  ;;  %v576_v23 = vld [vmem:[#allocation3 + $0x4f8] sm:$0xff]  ;;  %v605_v24 = vld [vmem:[#allocation3 + $0x5e0] sm:$0xff] }
  0xa0   : > { %916 = vmatpush.msra.mxu2 %v555_v25  ;;  %936 = vmatpush.msra.mxu3 %v556_v26  ;;  %v606_v25 = vld [vmem:[#allocation3 + $0x5e8] sm:$0xff]  ;;  %v559_v26 = vld [vmem:[#allocation3 + $0x470] sm:$0xff] }
  0xa1   : > { %874 = vmatpush.msra.mxu0 %v585_v27  ;;  %894 = vmatpush.msra.mxu1 %v586_v28  ;;  %v560_v27 = vld [vmem:[#allocation3 + $0x478] sm:$0xff]  ;;  %v589_v28 = vld [vmem:[#allocation3 + $0x560] sm:$0xff] }
  0xa2   : > { %917 = vmatpush.msra.mxu2 %v539_v29  ;;  %937 = vmatpush.msra.mxu3 %v540_v30  ;;  %v590_v29 = vld [vmem:[#allocation3 + $0x568] sm:$0xff]  ;;  %v543_v30 = vld [vmem:[#allocation3 + $0x3f0] sm:$0xff] }
  0xa3   : > { %875 = vmatpush.msra.mxu0 %v569_v31  ;;  %895 = vmatpush.msra.mxu1 %v570_v32  ;;  %v544_v31 = vld [vmem:[#allocation3 + $0x3f8] sm:$0xff]  ;;  %v573_v32 = vld [vmem:[#allocation3 + $0x4e0] sm:$0xff] }
  0xa4   : > { %918 = vmatpush.msra.mxu2 %v523_v33  ;;  %938 = vmatpush.msra.mxu3 %v524_v34  ;;  %v574_v33 = vld [vmem:[#allocation3 + $0x4e8] sm:$0xff]  ;;  %v527_v34 = vld [vmem:[#allocation3 + $0x370] sm:$0xff] }
  0xa5   : > { %876 = vmatpush.msra.mxu0 %v553_v35  ;;  %896 = vmatpush.msra.mxu1 %v554_v36  ;;  %v528_v35 = vld [vmem:[#allocation3 + $0x378] sm:$0xff]  ;;  %v557_v36 = vld [vmem:[#allocation3 + $0x460] sm:$0xff] }
  0xa6   : > { %919 = vmatpush.msra.mxu2 %v507_v37  ;;  %939 = vmatpush.msra.mxu3 %v508_v38  ;;  %v558_v37 = vld [vmem:[#allocation3 + $0x468] sm:$0xff]  ;;  %v511_v38 = vld [vmem:[#allocation3 + $0x2f0] sm:$0xff] }
  0xa7   : > { %877 = vmatpush.msra.mxu0 %v537_v39  ;;  %897 = vmatpush.msra.mxu1 %v538_v40  ;;  %v512_v39 = vld [vmem:[#allocation3 + $0x2f8] sm:$0xff]  ;;  %v541_v40 = vld [vmem:[#allocation3 + $0x3e0] sm:$0xff] }
  0xa8   : > { %920 = vmatpush.msra.mxu2 %v491_v41  ;;  %940 = vmatpush.msra.mxu3 %v492_v42  ;;  %v542_v41 = vld [vmem:[#allocation3 + $0x3e8] sm:$0xff]  ;;  %v495_v42 = vld [vmem:[#allocation3 + $0x270] sm:$0xff] }
  0xa9   : > { %878 = vmatpush.msra.mxu0 %v521_v43  ;;  %898 = vmatpush.msra.mxu1 %v522_v44  ;;  %v496_v43 = vld [vmem:[#allocation3 + $0x278] sm:$0xff]  ;;  %v525_v44 = vld [vmem:[#allocation3 + $0x360] sm:$0xff] }
  0xaa   : > { %921 = vmatpush.msra.mxu2 %v475_v45  ;;  %941 = vmatpush.msra.mxu3 %v476_v46  ;;  %v526_v45 = vld [vmem:[#allocation3 + $0x368] sm:$0xff]  ;;  %v479_v46 = vld [vmem:[#allocation3 + $0x1f0] sm:$0xff] }
  0xab   : > { %879 = vmatpush.msra.mxu0 %v505_v47  ;;  %899 = vmatpush.msra.mxu1 %v506_v48  ;;  %v480_v47 = vld [vmem:[#allocation3 + $0x1f8] sm:$0xff]  ;;  %v509_v48 = vld [vmem:[#allocation3 + $0x2e0] sm:$0xff] }
  0xac   : > { %922 = vmatpush.msra.mxu2 %v459_v49  ;;  %942 = vmatpush.msra.mxu3 %v460_v50  ;;  %v510_v49 = vld [vmem:[#allocation3 + $0x2e8] sm:$0xff]  ;;  %v463_v50 = vld [vmem:[#allocation3 + $0x170] sm:$0xff] }
  0xad   : > { %880 = vmatpush.msra.mxu0 %v489_v51  ;;  %900 = vmatpush.msra.mxu1 %v490_v52  ;;  %v464_v51 = vld [vmem:[#allocation3 + $0x178] sm:$0xff]  ;;  %v493_v52 = vld [vmem:[#allocation3 + $0x260] sm:$0xff] }
  0xae   : > { %923 = vmatpush.msra.mxu2 %v443_v53  ;;  %943 = vmatpush.msra.mxu3 %v444_v54  ;;  %v494_v53 = vld [vmem:[#allocation3 + $0x268] sm:$0xff]  ;;  %v447_v54 = vld [vmem:[#allocation3 + $0xf0] sm:$0xff] }
  0xaf   : > { %881 = vmatpush.msra.mxu0 %v473_v55  ;;  %901 = vmatpush.msra.mxu1 %v474_v56  ;;  %v448_v55 = vld [vmem:[#allocation3 + $0xf8] sm:$0xff]  ;;  %v477_v56 = vld [vmem:[#allocation3 + $0x1e0] sm:$0xff] }
  0xb0   : > { %924 = vmatpush.msra.mxu2 %v427_v57  ;;  %944 = vmatpush.msra.mxu3 %v428_v59  ;;  %v478_v57 = vld [vmem:[#allocation3 + $0x1e8] sm:$0xff]  ;;  %v431_v59 = vld [vmem:[#allocation3 + $0x70] sm:$0xff] }
  0xb1   : > { %845 = vmatmul.f32.vlgmr.msrb.gmra.mxu2 %v4180_v58  ;;  %865 = vmatmul.f32.vlgmr.msrb.gmra.mxu3 %v4180_v58 }
  0xb2   : > { %989 = vmatpush.msrb.mxu2 %v671_v60  ;;  %1009 = vmatpush.msrb.mxu3 %v672_v61  ;;  %v432_v60 = vld [vmem:[#allocation3 + $0x78] sm:$0xff]  ;;  %v461_v61 = vld [vmem:[#allocation3 + $0x160] sm:$0xff] }
  0xb3   : > { %882 = vmatpush.msra.mxu0 %v457_v62  ;;  %902 = vmatpush.msra.mxu1 %v458_v63  ;;  %v462_v62 = vld [vmem:[#allocation3 + $0x168] sm:$0xff]  ;;  %v445_v63 = vld [vmem:[#allocation3 + $0xe0] sm:$0xff] }
  0xb4   : > { %990 = vmatpush.msrb.mxu2 %v655_v0  ;;  %1010 = vmatpush.msrb.mxu3 %v656_v1  ;;  %v446_v0 = vld [vmem:[#allocation3 + $0xe8] sm:$0xff]  ;;  %v429_v1 = vld [vmem:[#allocation3 + $0x60] sm:$0xff] }
  0xb5   : > { %883 = vmatpush.msra.mxu0 %v441_v2  ;;  %903 = vmatpush.msra.mxu1 %v442_v3  ;;  %v430_v2 = vld [vmem:[#allocation3 + $0x68] sm:$0xff]  ;;  %v673_v3 = vld [vmem:[#allocation5] sm:$0xff] }
  0xb6   : > { %991 = vmatpush.msrb.mxu2 %v639_v4  ;;  %1011 = vmatpush.msrb.mxu3 %v640_v5  ;;  %v679_v4 = vperm.slane %v673_v3, 2  ;;  %v680_v5 = vperm.slane %v673_v3, 3 }
  0xb7   : > { %884 = vmatpush.msra.mxu0 %v425_v6  ;;  %904 = vmatpush.msra.mxu1 %v426_v7  ;;  %v677_v6 = vperm.slane %v673_v3, 0  ;;  %v678_v7 = vperm.slane %v673_v3, 1 }
  0xb8   : > { %805 = vmatmul.f32.vlgmr.msrb.gmra.mxu0 %v4180_v58  ;;  %825 = vmatmul.f32.vlgmr.msrb.gmra.mxu1 %v4180_v58 }
  0xb9   : > { %949 = vmatpush.msrb.mxu0 %v669_v8  ;;  %969 = vmatpush.msrb.mxu1 %v670_v9 }
  0xba   : > { %992 = vmatpush.msrb.mxu2 %v623_v10  ;;  %1012 = vmatpush.msrb.mxu3 %v624_v11 }
  0xbb   : > { %950 = vmatpush.msrb.mxu0 %v653_v12  ;;  %970 = vmatpush.msrb.mxu1 %v654_v13 }
  0xbc   : > { %993 = vmatpush.msrb.mxu2 %v607_v14  ;;  %1013 = vmatpush.msrb.mxu3 %v608_v15 }
  0xbd   : > { %951 = vmatpush.msrb.mxu0 %v637_v16  ;;  %971 = vmatpush.msrb.mxu1 %v638_v17 }
  0xbe   : > { %994 = vmatpush.msrb.mxu2 %v591_v18  ;;  %1014 = vmatpush.msrb.mxu3 %v592_v19 }
  0xbf   : > { %952 = vmatpush.msrb.mxu0 %v621_v20  ;;  %972 = vmatpush.msrb.mxu1 %v622_v21  ;;  %v684_v20 = vperm.slane %v673_v3, 7  ;;  %v681_v21 = vperm.slane %v673_v3, 4 }
  0xc0   : > { %995 = vmatpush.msrb.mxu2 %v575_v22  ;;  %1015 = vmatpush.msrb.mxu3 %v576_v23  ;;  %v682_v22 = vperm.slane %v673_v3, 5 }
  0xc1   : > { %953 = vmatpush.msrb.mxu0 %v605_v24  ;;  %973 = vmatpush.msrb.mxu1 %v606_v25 }
  0xc2   : > { %996 = vmatpush.msrb.mxu2 %v559_v26  ;;  %1016 = vmatpush.msrb.mxu3 %v560_v27 }
  0xc3   : > { %954 = vmatpush.msrb.mxu0 %v589_v28  ;;  %974 = vmatpush.msrb.mxu1 %v590_v29 }
  0xc4   : > { %997 = vmatpush.msrb.mxu2 %v543_v30  ;;  %1017 = vmatpush.msrb.mxu3 %v544_v31 }
  0xc5   : > { %955 = vmatpush.msrb.mxu0 %v573_v32  ;;  %975 = vmatpush.msrb.mxu1 %v574_v33 }
  0xc6   : > { %998 = vmatpush.msrb.mxu2 %v527_v34  ;;  %1018 = vmatpush.msrb.mxu3 %v528_v35  ;;  %v3980_v35 = vmov 0.0  }
  0xc7   : > { %956 = vmatpush.msrb.mxu0 %v557_v36  ;;  %976 = vmatpush.msrb.mxu1 %v558_v37  ;;  %1061 = vst [vmem:[%s4172_s21] sm:$0xff] %v3980_v35  ;;  %v674_v36 = vld [vmem:[#allocation5 + $0x8] sm:$0xff] }
  0xc8   : > { %999 = vmatpush.msrb.mxu2 %v511_v38  ;;  %1019 = vmatpush.msrb.mxu3 %v512_v39  ;;  %v687_v37 = vperm.slane %v674_v36, 2  ;;  %v688_v38 = vperm.slane %v674_v36, 3  ;;  %v685_v39 = vperm.slane %v674_v36, 0 }
  0xc9   : > { %957 = vmatpush.msrb.mxu0 %v541_v40  ;;  %977 = vmatpush.msrb.mxu1 %v542_v41  ;;  %v686_v40 = vperm.slane %v674_v36, 1 }
  0xca   : > { %1000 = vmatpush.msrb.mxu2 %v495_v42  ;;  %1020 = vmatpush.msrb.mxu3 %v496_v43 }
  0xcb   : > { %925 = vmatmul.f32.vlgmr.msra.gmra.mxu2 %v4180_v58  ;;  %945 = vmatmul.f32.vlgmr.msra.gmra.mxu3 %v4180_v58 }
  0xcc   : > { %958 = vmatpush.msrb.mxu0 %v525_v44  ;;  %978 = vmatpush.msrb.mxu1 %v526_v45 }
  0xcd   : > { %1001 = vmatpush.msrb.mxu2 %v479_v46  ;;  %1021 = vmatpush.msrb.mxu3 %v480_v47 }
  0xce   : > { %959 = vmatpush.msrb.mxu0 %v509_v48  ;;  %979 = vmatpush.msrb.mxu1 %v510_v49 }
  0xcf   : > { %1002 = vmatpush.msrb.mxu2 %v463_v50  ;;  %1022 = vmatpush.msrb.mxu3 %v464_v51 }
  0xd0   : > { %960 = vmatpush.msrb.mxu0 %v493_v52  ;;  %980 = vmatpush.msrb.mxu1 %v494_v53  ;;  %v689_v53 = vperm.slane %v674_v36, 4 }
  0xd1   : > { %1003 = vmatpush.msrb.mxu2 %v447_v54  ;;  %1023 = vmatpush.msrb.mxu3 %v448_v55  ;;  %v690_v54 = vperm.slane %v674_v36, 5  ;;  %v691_v55 = vperm.slane %v674_v36, 6 }
  0xd2   : > { %885 = vmatmul.f32.vlgmr.msra.gmra.mxu0 %v4180_v58  ;;  %905 = vmatmul.f32.vlgmr.msra.gmra.mxu1 %v4180_v58 }
  0xd3   : > { %961 = vmatpush.msrb.mxu0 %v477_v56  ;;  %981 = vmatpush.msrb.mxu1 %v478_v57  ;;  %v692_v56 = vperm.slane %v674_v36, 7 }
  0xd4   : > { %1004 = vmatpush.msrb.mxu2 %v431_v59  ;;  %1024 = vmatpush.msrb.mxu3 %v432_v60 }
  0xd5   : > { %1005 = vmatmul.f32.vlgmr.msrb.gmra.mxu2 %v4180_v58  ;;  %1025 = vmatmul.f32.vlgmr.msrb.gmra.mxu3 %v4180_v58 }
  0xd6   : > { %962 = vmatpush.msrb.mxu0 %v461_v61  ;;  %982 = vmatpush.msrb.mxu1 %v462_v62 }
  0xd8   : > { %963 = vmatpush.msrb.mxu0 %v445_v63  ;;  %983 = vmatpush.msrb.mxu1 %v446_v0 }
  0xda   : > { %964 = vmatpush.msrb.mxu0 %v429_v1  ;;  %984 = vmatpush.msrb.mxu1 %v430_v2 }
  0xdb   : > { %965 = vmatmul.f32.vlgmr.msrb.gmra.mxu0 %v4180_v58  ;;  %985 = vmatmul.f32.vlgmr.msrb.gmra.mxu1 %v4180_v58  ;;  %v683_v58 = vperm.slane %v673_v3, 6 }
 0x110   : > { %v766_v8 = vpop.f32.mrf.mxu2  ;;  %v786_v9 = vpop.f32.mrf.mxu3 }
 0x111   : > { %v767_v12 = vadd.f32 %v766_v8, %v679_v4  ;;  %v787_v13 = vadd.f32 %v786_v9, %v680_v5 }
 0x112   : > { %v726_v10 = vpop.f32.mrf.mxu0  ;;  %v746_v11 = vpop.f32.mrf.mxu1 }
 0x113   : > { %v727_v14 = vadd.f32 %v726_v10, %v677_v6  ;;  %v747_v15 = vadd.f32 %v746_v11, %v678_v7  ;;  %v1031_v16 = vmax.f32 %v767_v12, 0.0  ;;  %v1032_v19 = vmax.f32 %v787_v13, 0.0 }
 0x115   : > { %v1029_v17 = vmax.f32 %v727_v14, 0.0  ;;  %v1030_v18 = vmax.f32 %v747_v15, 0.0  ;;  %1047 = vst [vmem:[#allocation2 + $0x58] sm:$0xff] %v1031_v16 }
 0x116   : > { %1048 = vst [vmem:[#allocation2 + $0x18] sm:$0xff] %v1032_v19 }
 0x117   : > { %1045 = vst [vmem:[#allocation2 + $0x30] sm:$0xff] %v1029_v17 }
 0x118   : > { %1046 = vst [vmem:[#allocation2] sm:$0xff] %v1030_v18 }
 0x134   : > { %v846_v23 = vpop.f32.mrf.mxu2  ;;  %v866_v24 = vpop.f32.mrf.mxu3 }
 0x135   : > { %v806_v25 = vpop.f32.mrf.mxu0  ;;  %v826_v26 = vpop.f32.mrf.mxu1  ;;  %v847_v27 = vadd.f32 %v846_v23, %v683_v58  ;;  %v867_v28 = vadd.f32 %v866_v24, %v684_v20 }
 0x136   : > { %v807_v29 = vadd.f32 %v806_v25, %v681_v21  ;;  %v827_v30 = vadd.f32 %v826_v26, %v682_v22 }
 0x137   : > { %v1035_v31 = vmax.f32 %v847_v27, 0.0  ;;  %v1036_v34 = vmax.f32 %v867_v28, 0.0 }
 0x138   : > { %v1033_v32 = vmax.f32 %v807_v29, 0.0  ;;  %v1034_v33 = vmax.f32 %v827_v30, 0.0 }
 0x139   : > { %1051 = vst [vmem:[#allocation2 + $0x8] sm:$0xff] %v1035_v31 }
 0x13a   : > { %1049 = vst [vmem:[#allocation2 + $0x50] sm:$0xff] %v1033_v32 }
 0x13b   : > { %1050 = vst [vmem:[#allocation2 + $0x68] sm:$0xff] %v1034_v33 }
 0x13c   : > { %1052 = vst [vmem:[#allocation2 + $0x48] sm:$0xff] %v1036_v34 }
 0x14e   : > { %v926_v41 = vpop.f32.mrf.mxu2  ;;  %v946_v42 = vpop.f32.mrf.mxu3 }
 0x14f   : > { %v886_v43 = vpop.f32.mrf.mxu0  ;;  %v906_v44 = vpop.f32.mrf.mxu1  ;;  %v927_v45 = vadd.f32 %v926_v41, %v687_v37  ;;  %v947_v46 = vadd.f32 %v946_v42, %v688_v38 }
 0x150   : > { %v887_v47 = vadd.f32 %v886_v43, %v685_v39  ;;  %v907_v48 = vadd.f32 %v906_v44, %v686_v40 }
 0x151   : > { %v1039_v49 = vmax.f32 %v927_v45, 0.0  ;;  %v1040_v52 = vmax.f32 %v947_v46, 0.0 }
 0x152   : > { %v1037_v50 = vmax.f32 %v887_v47, 0.0  ;;  %v1038_v51 = vmax.f32 %v907_v48, 0.0 }
 0x153   : > { %1055 = vst [vmem:[#allocation2 + $0x10] sm:$0xff] %v1039_v49 }
 0x154   : > { %1053 = vst [vmem:[#allocation2 + $0x40] sm:$0xff] %v1037_v50 }
 0x155   : > { %1054 = vst [vmem:[#allocation2 + $0x20] sm:$0xff] %v1038_v51 }
 0x156   : > { %1056 = vst [vmem:[#allocation2 + $0x38] sm:$0xff] %v1040_v52 }
 0x158   : > { %v966_v57 = vpop.f32.mrf.mxu0  ;;  %v986_v59 = vpop.f32.mrf.mxu1 }
 0x159   : > { %v967_v60 = vadd.f32 %v966_v57, %v689_v53  ;;  %v987_v61 = vadd.f32 %v986_v59, %v690_v54  ;;  %v1006_v62 = vpop.f32.mrf.mxu2  ;;  %v1026_v63 = vpop.f32.mrf.mxu3 }
 0x15a   : > { %v1007_v0 = vadd.f32 %v1006_v62, %v691_v55  ;;  %v1027_v1 = vadd.f32 %v1026_v63, %v692_v56 }
 0x15b   : > { %v1041_v2 = vmax.f32 %v967_v60, 0.0  ;;  %v1042_v3 = vmax.f32 %v987_v61, 0.0 }
 0x15c   : > { %v1043_v4 = vmax.f32 %v1007_v0, 0.0  ;;  %v1044_v5 = vmax.f32 %v1027_v1, 0.0 }
 0x15d   : > { %1057 = vst [vmem:[#allocation2 + $0x60] sm:$0xff] %v1041_v2 }
 0x15e   : > { %1058 = vst [vmem:[#allocation2 + $0x70] sm:$0xff] %v1042_v3 }
 0x15f   : > { %1059 = vst [vmem:[#allocation2 + $0x78] sm:$0xff] %v1043_v4 }
 0x160   : > { %1060 = vst [vmem:[#allocation2 + $0x28] sm:$0xff] %v1044_v5 }
 0x161 PF: > { %v1138_v6 = vld [vmem:[%s4159_s26 + $0x1e0] sm:$0xff] }
 0x162   : > { %v1266_v7 = vld [vmem:[%s4159_s26 + $0x5e0] sm:$0xff]  ;;  %2112 = vmatpush.msra.mxu0 %v1138_v6 }
 0x163   : > { %v1134_v8 = vld [vmem:[%s4159_s26 + $0x1c0] sm:$0xff]  ;;  %2152 = vmatpush.msra.mxu2 %v1266_v7 }
 0x164   : > { %v1202_v9 = vld [vmem:[%s4159_s26 + $0x3e0] sm:$0xff]  ;;  %2113 = vmatpush.msra.mxu0 %v1134_v8 }
 0x165   : > { %v1262_v10 = vld [vmem:[%s4159_s26 + $0x5c0] sm:$0xff]  ;;  %2132 = vmatpush.msra.mxu1 %v1202_v9 }
 0x166   : > { %v1330_v11 = vld [vmem:[%s4159_s26 + $0x7e0] sm:$0xff]  ;;  %2153 = vmatpush.msra.mxu2 %v1262_v10 }
 0x167   : > { %2172 = vmatpush.msra.mxu3 %v1330_v11  ;;  %v1130_v12 = vld [vmem:[%s4159_s26 + $0x1a0] sm:$0xff] }
 0x168   : > { %v1198_v13 = vld [vmem:[%s4159_s26 + $0x3c0] sm:$0xff]  ;;  %2114 = vmatpush.msra.mxu0 %v1130_v12 }
 0x169   : > { %v1258_v14 = vld [vmem:[%s4159_s26 + $0x5a0] sm:$0xff]  ;;  %2133 = vmatpush.msra.mxu1 %v1198_v13 }
 0x16a   : > { %v1326_v15 = vld [vmem:[%s4159_s26 + $0x7c0] sm:$0xff]  ;;  %2154 = vmatpush.msra.mxu2 %v1258_v14 }
 0x16b   : > { %v1194_v16 = vld [vmem:[%s4159_s26 + $0x3a0] sm:$0xff]  ;;  %2173 = vmatpush.msra.mxu3 %v1326_v15 }
 0x16c   : > { %v1126_v17 = vld [vmem:[%s4159_s26 + $0x180] sm:$0xff]  ;;  %2134 = vmatpush.msra.mxu1 %v1194_v16 }
 0x16d   : > { %v1254_v18 = vld [vmem:[%s4159_s26 + $0x580] sm:$0xff]  ;;  %2115 = vmatpush.msra.mxu0 %v1126_v17 }
 0x16e   : > { %v1322_v19 = vld [vmem:[%s4159_s26 + $0x7a0] sm:$0xff]  ;;  %2155 = vmatpush.msra.mxu2 %v1254_v18 }
 0x16f   : > { %v1190_v58 = vld [vmem:[%s4159_s26 + $0x380] sm:$0xff]  ;;  %2174 = vmatpush.msra.mxu3 %v1322_v19 }
 0x170   : > { %v1318_v20 = vld [vmem:[%s4159_s26 + $0x780] sm:$0xff]  ;;  %2135 = vmatpush.msra.mxu1 %v1190_v58 }
 0x171   : > { %v1122_v21 = vld [vmem:[%s4159_s26 + $0x160] sm:$0xff]  ;;  %2175 = vmatpush.msra.mxu3 %v1318_v20 }
 0x172   : > { %v1250_v22 = vld [vmem:[%s4159_s26 + $0x560] sm:$0xff]  ;;  %2116 = vmatpush.msra.mxu0 %v1122_v21 }
 0x173   : > { %v1186_v23 = vld [vmem:[%s4159_s26 + $0x360] sm:$0xff]  ;;  %2156 = vmatpush.msra.mxu2 %v1250_v22 }
 0x174   : > { %v1314_v24 = vld [vmem:[%s4159_s26 + $0x760] sm:$0xff]  ;;  %2136 = vmatpush.msra.mxu1 %v1186_v23 }
 0x175   : > { %v1118_v25 = vld [vmem:[%s4159_s26 + $0x140] sm:$0xff]  ;;  %2176 = vmatpush.msra.mxu3 %v1314_v24 }
 0x176   : > { %v1246_v26 = vld [vmem:[%s4159_s26 + $0x540] sm:$0xff]  ;;  %2117 = vmatpush.msra.mxu0 %v1118_v25 }
 0x177   : > { %v1182_v27 = vld [vmem:[%s4159_s26 + $0x340] sm:$0xff]  ;;  %2157 = vmatpush.msra.mxu2 %v1246_v26 }
 0x178   : > { %v1310_v28 = vld [vmem:[%s4159_s26 + $0x740] sm:$0xff]  ;;  %2137 = vmatpush.msra.mxu1 %v1182_v27 }
 0x179   : > { %v1114_v29 = vld [vmem:[%s4159_s26 + $0x120] sm:$0xff]  ;;  %2177 = vmatpush.msra.mxu3 %v1310_v28 }
 0x17a   : > { %v1242_v30 = vld [vmem:[%s4159_s26 + $0x520] sm:$0xff]  ;;  %2118 = vmatpush.msra.mxu0 %v1114_v29 }
 0x17b   : > { %v1178_v31 = vld [vmem:[%s4159_s26 + $0x320] sm:$0xff]  ;;  %2158 = vmatpush.msra.mxu2 %v1242_v30 }
 0x17c   : > { %v1306_v32 = vld [vmem:[%s4159_s26 + $0x720] sm:$0xff]  ;;  %2138 = vmatpush.msra.mxu1 %v1178_v31 }
 0x17d   : > { %v1110_v33 = vld [vmem:[%s4159_s26 + $0x100] sm:$0xff]  ;;  %2178 = vmatpush.msra.mxu3 %v1306_v32 }
 0x17e   : > { %v1238_v34 = vld [vmem:[%s4159_s26 + $0x500] sm:$0xff]  ;;  %2119 = vmatpush.msra.mxu0 %v1110_v33 }
 0x17f   : > { %v1174_v35 = vld [vmem:[%s4159_s26 + $0x300] sm:$0xff]  ;;  %2159 = vmatpush.msra.mxu2 %v1238_v34 }
 0x180   : > { %v1302_v36 = vld [vmem:[%s4159_s26 + $0x700] sm:$0xff]  ;;  %2139 = vmatpush.msra.mxu1 %v1174_v35 }
 0x181   : > { %v1106_v37 = vld [vmem:[%s4159_s26 + $0xe0] sm:$0xff]  ;;  %2179 = vmatpush.msra.mxu3 %v1302_v36 }
 0x182   : > { %v1234_v38 = vld [vmem:[%s4159_s26 + $0x4e0] sm:$0xff]  ;;  %2120 = vmatpush.msra.mxu0 %v1106_v37 }
 0x183   : > { %v1170_v39 = vld [vmem:[%s4159_s26 + $0x2e0] sm:$0xff]  ;;  %2160 = vmatpush.msra.mxu2 %v1234_v38 }
 0x184   : > { %v1298_v40 = vld [vmem:[%s4159_s26 + $0x6e0] sm:$0xff]  ;;  %2140 = vmatpush.msra.mxu1 %v1170_v39 }
 0x185   : > { %v1102_v41 = vld [vmem:[%s4159_s26 + $0xc0] sm:$0xff]  ;;  %2180 = vmatpush.msra.mxu3 %v1298_v40 }
 0x186   : > { %v1230_v42 = vld [vmem:[%s4159_s26 + $0x4c0] sm:$0xff]  ;;  %2121 = vmatpush.msra.mxu0 %v1102_v41 }
 0x187   : > { %v1166_v43 = vld [vmem:[%s4159_s26 + $0x2c0] sm:$0xff]  ;;  %2161 = vmatpush.msra.mxu2 %v1230_v42 }
 0x188   : > { %v1294_v44 = vld [vmem:[%s4159_s26 + $0x6c0] sm:$0xff]  ;;  %2141 = vmatpush.msra.mxu1 %v1166_v43 }
 0x189   : > { %v1098_v45 = vld [vmem:[%s4159_s26 + $0xa0] sm:$0xff]  ;;  %2181 = vmatpush.msra.mxu3 %v1294_v44 }
 0x18a   : > { %v1226_v46 = vld [vmem:[%s4159_s26 + $0x4a0] sm:$0xff]  ;;  %2122 = vmatpush.msra.mxu0 %v1098_v45 }
 0x18b   : > { %v1162_v47 = vld [vmem:[%s4159_s26 + $0x2a0] sm:$0xff]  ;;  %2162 = vmatpush.msra.mxu2 %v1226_v46 }
 0x18c   : > { %v1290_v48 = vld [vmem:[%s4159_s26 + $0x6a0] sm:$0xff]  ;;  %2142 = vmatpush.msra.mxu1 %v1162_v47 }
 0x18d   : > { %v1094_v49 = vld [vmem:[%s4159_s26 + $0x80] sm:$0xff]  ;;  %2182 = vmatpush.msra.mxu3 %v1290_v48 }
 0x18e   : > { %v1222_v50 = vld [vmem:[%s4159_s26 + $0x480] sm:$0xff]  ;;  %2123 = vmatpush.msra.mxu0 %v1094_v49 }
 0x18f   : > { %v1158_v51 = vld [vmem:[%s4159_s26 + $0x280] sm:$0xff]  ;;  %2163 = vmatpush.msra.mxu2 %v1222_v50 }
 0x190   : > { %v1286_v52 = vld [vmem:[%s4159_s26 + $0x680] sm:$0xff]  ;;  %2143 = vmatpush.msra.mxu1 %v1158_v51 }
 0x191   : > { %v1090_v53 = vld [vmem:[%s4159_s26 + $0x60] sm:$0xff]  ;;  %2183 = vmatpush.msra.mxu3 %v1286_v52 }
 0x192   : > { %v1218_v54 = vld [vmem:[%s4159_s26 + $0x460] sm:$0xff]  ;;  %2124 = vmatpush.msra.mxu0 %v1090_v53 }
 0x193   : > { %v1154_v55 = vld [vmem:[%s4159_s26 + $0x260] sm:$0xff]  ;;  %2164 = vmatpush.msra.mxu2 %v1218_v54 }
 0x194   : > { %v1282_v56 = vld [vmem:[%s4159_s26 + $0x660] sm:$0xff]  ;;  %2144 = vmatpush.msra.mxu1 %v1154_v55 }
 0x195   : > { %v1086_v57 = vld [vmem:[%s4159_s26 + $0x40] sm:$0xff]  ;;  %2184 = vmatpush.msra.mxu3 %v1282_v56 }
 0x196   : > { %v1214_v59 = vld [vmem:[%s4159_s26 + $0x440] sm:$0xff]  ;;  %2125 = vmatpush.msra.mxu0 %v1086_v57 }
 0x197   : > { %v1150_v60 = vld [vmem:[%s4159_s26 + $0x240] sm:$0xff]  ;;  %2165 = vmatpush.msra.mxu2 %v1214_v59 }
 0x198   : > { %v1278_v61 = vld [vmem:[%s4159_s26 + $0x640] sm:$0xff]  ;;  %2145 = vmatpush.msra.mxu1 %v1150_v60 }
 0x199   : > { %v1082_v62 = vld [vmem:[%s4159_s26 + $0x20] sm:$0xff]  ;;  %2185 = vmatpush.msra.mxu3 %v1278_v61 }
 0x19a   : > { %v1210_v63 = vld [vmem:[%s4159_s26 + $0x420] sm:$0xff]  ;;  %2126 = vmatpush.msra.mxu0 %v1082_v62 }
 0x19b   : > { %v1146_v0 = vld [vmem:[%s4159_s26 + $0x220] sm:$0xff]  ;;  %2166 = vmatpush.msra.mxu2 %v1210_v63 }
 0x19c   : > { %v1274_v1 = vld [vmem:[%s4159_s26 + $0x620] sm:$0xff]  ;;  %2146 = vmatpush.msra.mxu1 %v1146_v0 }
 0x19d   : > { %v1078_v2 = vld [vmem:[%s4159_s26] sm:$0xff]  ;;  %2186 = vmatpush.msra.mxu3 %v1274_v1 }
 0x19e   : > { %v1206_v3 = vld [vmem:[%s4159_s26 + $0x400] sm:$0xff]  ;;  %2127 = vmatpush.msra.mxu0 %v1078_v2 }
 0x19f   : > { %v1394_v4 = vld [vmem:[%s4159_s26 + $0x9e0] sm:$0xff]  ;;  %2167 = vmatpush.msra.mxu2 %v1206_v3 }
 0x1a0   : > { %v1522_v5 = vld [vmem:[%s4159_s26 + $0xde0] sm:$0xff]  ;;  %2192 = vmatpush.msrb.mxu0 %v1394_v4 }
 0x1a1   : > { %v1142_v6 = vld [vmem:[%s4159_s26 + $0x200] sm:$0xff]  ;;  %2232 = vmatpush.msrb.mxu2 %v1522_v5  ;;  %v1064_v5 = vld [vmem:[#allocation2 + $0x58] sm:$0xff] }
 0x1a2   : > { %v1270_v7 = vld [vmem:[%s4159_s26 + $0x600] sm:$0xff]  ;;  %2147 = vmatpush.msra.mxu1 %v1142_v6  ;;  %2168 = vmatmul.f32.vlgmr.msra.gmra.mxu2 %v1064_v5 }
 0x1a3   : > { %v1390_v8 = vld [vmem:[%s4159_s26 + $0x9c0] sm:$0xff]  ;;  %2187 = vmatpush.msra.mxu3 %v1270_v7 }
 0x1a4   : > { %v1458_v9 = vld [vmem:[%s4159_s26 + $0xbe0] sm:$0xff]  ;;  %2193 = vmatpush.msrb.mxu0 %v1390_v8 }
 0x1a5   : > { %v1518_v10 = vld [vmem:[%s4159_s26 + $0xdc0] sm:$0xff]  ;;  %2212 = vmatpush.msrb.mxu1 %v1458_v9 }
 0x1a6   : > { %v1586_v11 = vld [vmem:[%s4159_s26 + $0xfe0] sm:$0xff]  ;;  %2233 = vmatpush.msrb.mxu2 %v1518_v10  ;;  %v1063_v10 = vld [vmem:[#allocation2] sm:$0xff] }
 0x1a7   : > { %v1386_v12 = vld [vmem:[%s4159_s26 + $0x9a0] sm:$0xff]  ;;  %2252 = vmatpush.msrb.mxu3 %v1586_v11  ;;  %v1065_v11 = vld [vmem:[#allocation2 + $0x18] sm:$0xff]  ;;  %2148 = vmatmul.f32.vlgmr.msra.gmra.mxu1 %v1063_v10 }
 0x1a8   : > { %v1454_v13 = vld [vmem:[%s4159_s26 + $0xbc0] sm:$0xff]  ;;  %2194 = vmatpush.msrb.mxu0 %v1386_v12  ;;  %2188 = vmatmul.f32.vlgmr.msra.gmra.mxu3 %v1065_v11 }
 0x1a9   : > { %v1514_v14 = vld [vmem:[%s4159_s26 + $0xda0] sm:$0xff]  ;;  %2213 = vmatpush.msrb.mxu1 %v1454_v13 }
 0x1aa   : > { %v1582_v15 = vld [vmem:[%s4159_s26 + $0xfc0] sm:$0xff]  ;;  %2234 = vmatpush.msrb.mxu2 %v1514_v14 }
 0x1ab   : > { %v1382_v16 = vld [vmem:[%s4159_s26 + $0x980] sm:$0xff]  ;;  %2253 = vmatpush.msrb.mxu3 %v1582_v15 }
 0x1ac   : > { %v1450_v17 = vld [vmem:[%s4159_s26 + $0xba0] sm:$0xff]  ;;  %2195 = vmatpush.msrb.mxu0 %v1382_v16 }
 0x1ad   : > { %v1510_v18 = vld [vmem:[%s4159_s26 + $0xd80] sm:$0xff]  ;;  %2214 = vmatpush.msrb.mxu1 %v1450_v17 }
 0x1ae   : > { %v1578_v19 = vld [vmem:[%s4159_s26 + $0xfa0] sm:$0xff]  ;;  %2235 = vmatpush.msrb.mxu2 %v1510_v18 }
 0x1af   : > { %v1378_v58 = vld [vmem:[%s4159_s26 + $0x960] sm:$0xff]  ;;  %2254 = vmatpush.msrb.mxu3 %v1578_v19 }
 0x1b0   : > { %v1446_v20 = vld [vmem:[%s4159_s26 + $0xb80] sm:$0xff]  ;;  %2196 = vmatpush.msrb.mxu0 %v1378_v58 }
 0x1b1   : > { %v1506_v21 = vld [vmem:[%s4159_s26 + $0xd60] sm:$0xff]  ;;  %2215 = vmatpush.msrb.mxu1 %v1446_v20 }
 0x1b2   : > { %v1574_v22 = vld [vmem:[%s4159_s26 + $0xf80] sm:$0xff]  ;;  %2236 = vmatpush.msrb.mxu2 %v1506_v21 }
 0x1b3   : > { %v1374_v23 = vld [vmem:[%s4159_s26 + $0x940] sm:$0xff]  ;;  %2255 = vmatpush.msrb.mxu3 %v1574_v22 }
 0x1b4   : > { %v1442_v24 = vld [vmem:[%s4159_s26 + $0xb60] sm:$0xff]  ;;  %2197 = vmatpush.msrb.mxu0 %v1374_v23  ;;  %v1068_v23 = vld [vmem:[#allocation2 + $0x8] sm:$0xff] }
 0x1b5   : > { %v1502_v25 = vld [vmem:[%s4159_s26 + $0xd40] sm:$0xff]  ;;  %2216 = vmatpush.msrb.mxu1 %v1442_v24 }
 0x1b6   : > { %v1570_v26 = vld [vmem:[%s4159_s26 + $0xf60] sm:$0xff]  ;;  %2237 = vmatpush.msrb.mxu2 %v1502_v25 }
 0x1b7   : > { %v1370_v27 = vld [vmem:[%s4159_s26 + $0x920] sm:$0xff]  ;;  %2256 = vmatpush.msrb.mxu3 %v1570_v26 }
 0x1b8   : > { %v1438_v28 = vld [vmem:[%s4159_s26 + $0xb40] sm:$0xff]  ;;  %2198 = vmatpush.msrb.mxu0 %v1370_v27 }
 0x1b9   : > { %v1498_v29 = vld [vmem:[%s4159_s26 + $0xd20] sm:$0xff]  ;;  %2217 = vmatpush.msrb.mxu1 %v1438_v28 }
 0x1ba   : > { %v1566_v30 = vld [vmem:[%s4159_s26 + $0xf40] sm:$0xff]  ;;  %2238 = vmatpush.msrb.mxu2 %v1498_v29  ;;  %v1069_v29 = vld [vmem:[#allocation2 + $0x48] sm:$0xff] }
 0x1bb   : > { %v1366_v31 = vld [vmem:[%s4159_s26 + $0x900] sm:$0xff]  ;;  %2257 = vmatpush.msrb.mxu3 %v1566_v30 }
 0x1bc   : > { %v1434_v32 = vld [vmem:[%s4159_s26 + $0xb20] sm:$0xff]  ;;  %2199 = vmatpush.msrb.mxu0 %v1366_v31 }
 0x1bd   : > { %v1494_v33 = vld [vmem:[%s4159_s26 + $0xd00] sm:$0xff]  ;;  %2218 = vmatpush.msrb.mxu1 %v1434_v32 }
 0x1be   : > { %v1562_v34 = vld [vmem:[%s4159_s26 + $0xf20] sm:$0xff]  ;;  %2239 = vmatpush.msrb.mxu2 %v1494_v33 }
 0x1bf   : > { %v1362_v35 = vld [vmem:[%s4159_s26 + $0x8e0] sm:$0xff]  ;;  %2258 = vmatpush.msrb.mxu3 %v1562_v34  ;;  %v1067_v34 = vld [vmem:[#allocation2 + $0x68] sm:$0xff] }
 0x1c0   : > { %v1430_v36 = vld [vmem:[%s4159_s26 + $0xb00] sm:$0xff]  ;;  %2200 = vmatpush.msrb.mxu0 %v1362_v35 }
 0x1c1   : > { %v1490_v37 = vld [vmem:[%s4159_s26 + $0xce0] sm:$0xff]  ;;  %2219 = vmatpush.msrb.mxu1 %v1430_v36 }
 0x1c2   : > { %v1558_v38 = vld [vmem:[%s4159_s26 + $0xf00] sm:$0xff]  ;;  %2240 = vmatpush.msrb.mxu2 %v1490_v37 }
 0x1c3   : > { %v1358_v39 = vld [vmem:[%s4159_s26 + $0x8c0] sm:$0xff]  ;;  %2259 = vmatpush.msrb.mxu3 %v1558_v38 }
 0x1c4   : > { %v1426_v40 = vld [vmem:[%s4159_s26 + $0xae0] sm:$0xff]  ;;  %2201 = vmatpush.msrb.mxu0 %v1358_v39 }
 0x1c5   : > { %v1486_v41 = vld [vmem:[%s4159_s26 + $0xcc0] sm:$0xff]  ;;  %2220 = vmatpush.msrb.mxu1 %v1426_v40 }
 0x1c6   : > { %v1554_v42 = vld [vmem:[%s4159_s26 + $0xee0] sm:$0xff]  ;;  %2241 = vmatpush.msrb.mxu2 %v1486_v41 }
 0x1c7   : > { %v1354_v43 = vld [vmem:[%s4159_s26 + $0x8a0] sm:$0xff]  ;;  %2260 = vmatpush.msrb.mxu3 %v1554_v42 }
 0x1c8   : > { %v1422_v44 = vld [vmem:[%s4159_s26 + $0xac0] sm:$0xff]  ;;  %2202 = vmatpush.msrb.mxu0 %v1354_v43 }
 0x1c9   : > { %v1482_v45 = vld [vmem:[%s4159_s26 + $0xca0] sm:$0xff]  ;;  %2221 = vmatpush.msrb.mxu1 %v1422_v44 }
 0x1ca   : > { %v1550_v46 = vld [vmem:[%s4159_s26 + $0xec0] sm:$0xff]  ;;  %2242 = vmatpush.msrb.mxu2 %v1482_v45 }
 0x1cb   : > { %v1350_v47 = vld [vmem:[%s4159_s26 + $0x880] sm:$0xff]  ;;  %2261 = vmatpush.msrb.mxu3 %v1550_v46 }
 0x1cc   : > { %v1418_v48 = vld [vmem:[%s4159_s26 + $0xaa0] sm:$0xff]  ;;  %2203 = vmatpush.msrb.mxu0 %v1350_v47 }
 0x1cd   : > { %v1478_v49 = vld [vmem:[%s4159_s26 + $0xc80] sm:$0xff]  ;;  %2222 = vmatpush.msrb.mxu1 %v1418_v48 }
 0x1ce   : > { %v1546_v50 = vld [vmem:[%s4159_s26 + $0xea0] sm:$0xff]  ;;  %2243 = vmatpush.msrb.mxu2 %v1478_v49 }
 0x1cf   : > { %v1346_v51 = vld [vmem:[%s4159_s26 + $0x860] sm:$0xff]  ;;  %2262 = vmatpush.msrb.mxu3 %v1546_v50 }
 0x1d0   : > { %v1414_v52 = vld [vmem:[%s4159_s26 + $0xa80] sm:$0xff]  ;;  %2204 = vmatpush.msrb.mxu0 %v1346_v51 }
 0x1d1   : > { %v1474_v53 = vld [vmem:[%s4159_s26 + $0xc60] sm:$0xff]  ;;  %2223 = vmatpush.msrb.mxu1 %v1414_v52 }
 0x1d2   : > { %v1542_v54 = vld [vmem:[%s4159_s26 + $0xe80] sm:$0xff]  ;;  %2244 = vmatpush.msrb.mxu2 %v1474_v53 }
 0x1d3   : > { %v1342_v55 = vld [vmem:[%s4159_s26 + $0x840] sm:$0xff]  ;;  %2263 = vmatpush.msrb.mxu3 %v1542_v54 }
 0x1d4   : > { %v1410_v56 = vld [vmem:[%s4159_s26 + $0xa60] sm:$0xff]  ;;  %2205 = vmatpush.msrb.mxu0 %v1342_v55 }
 0x1d5   : > { %v1470_v57 = vld [vmem:[%s4159_s26 + $0xc40] sm:$0xff]  ;;  %2224 = vmatpush.msrb.mxu1 %v1410_v56 }
 0x1d6   : > { %v1538_v59 = vld [vmem:[%s4159_s26 + $0xe60] sm:$0xff]  ;;  %2245 = vmatpush.msrb.mxu2 %v1470_v57 }
 0x1d7   : > { %v1338_v60 = vld [vmem:[%s4159_s26 + $0x820] sm:$0xff]  ;;  %2264 = vmatpush.msrb.mxu3 %v1538_v59 }
 0x1d8   : > { %v1406_v61 = vld [vmem:[%s4159_s26 + $0xa40] sm:$0xff]  ;;  %2206 = vmatpush.msrb.mxu0 %v1338_v60 }
 0x1d9   : > { %v1466_v62 = vld [vmem:[%s4159_s26 + $0xc20] sm:$0xff]  ;;  %2225 = vmatpush.msrb.mxu1 %v1406_v61 }
 0x1da   : > { %v1534_v63 = vld [vmem:[%s4159_s26 + $0xe40] sm:$0xff]  ;;  %2246 = vmatpush.msrb.mxu2 %v1466_v62 }
 0x1db   : > { %v1334_v0 = vld [vmem:[%s4159_s26 + $0x800] sm:$0xff]  ;;  %2265 = vmatpush.msrb.mxu3 %v1534_v63 }
 0x1dc   : > { %v1402_v1 = vld [vmem:[%s4159_s26 + $0xa20] sm:$0xff]  ;;  %2207 = vmatpush.msrb.mxu0 %v1334_v0 }
 0x1dd   : > { %v1462_v2 = vld [vmem:[%s4159_s26 + $0xc00] sm:$0xff]  ;;  %2226 = vmatpush.msrb.mxu1 %v1402_v1 }
 0x1de   : > { %v1530_v3 = vld [vmem:[%s4159_s26 + $0xe20] sm:$0xff]  ;;  %2247 = vmatpush.msrb.mxu2 %v1462_v2 }
 0x1df   : > { %v1062_v4 = vld [vmem:[#allocation2 + $0x30] sm:$0xff]  ;;  %2266 = vmatpush.msrb.mxu3 %v1530_v3  ;;  %2248 = vmatmul.f32.vlgmr.msrb.gmra.mxu2 %v1068_v23 }
 0x1e0   : > { %v1650_v6 = vld [vmem:[%s4159_s26 + $0x11e0] sm:$0xff]  ;;  %2128 = vmatmul.f32.vlgmr.msra.gmra.mxu0 %v1062_v4 }
 0x1e1   : > { %v1778_v7 = vld [vmem:[%s4159_s26 + $0x15e0] sm:$0xff]  ;;  %2272 = vmatpush.msra.mxu0 %v1650_v6 }
 0x1e2   : > { %v1398_v8 = vld [vmem:[%s4159_s26 + $0xa00] sm:$0xff]  ;;  %2312 = vmatpush.msra.mxu2 %v1778_v7 }
 0x1e3   : > { %v1526_v9 = vld [vmem:[%s4159_s26 + $0xe00] sm:$0xff]  ;;  %2227 = vmatpush.msrb.mxu1 %v1398_v8 }
 0x1e4   : > { %v1646_v12 = vld [vmem:[%s4159_s26 + $0x11c0] sm:$0xff]  ;;  %2267 = vmatpush.msrb.mxu3 %v1526_v9  ;;  %2228 = vmatmul.f32.vlgmr.msrb.gmra.mxu1 %v1067_v34 }
 0x1e5   : > { %v1714_v13 = vld [vmem:[%s4159_s26 + $0x13e0] sm:$0xff]  ;;  %2273 = vmatpush.msra.mxu0 %v1646_v12  ;;  %2268 = vmatmul.f32.vlgmr.msrb.gmra.mxu3 %v1069_v29  ;;  %v1070_v12 = vld [vmem:[#allocation2 + $0x40] sm:$0xff] }
 0x1e6   : > { %v1774_v14 = vld [vmem:[%s4159_s26 + $0x15c0] sm:$0xff]  ;;  %2292 = vmatpush.msra.mxu1 %v1714_v13 }
 0x1e7   : > { %v1842_v15 = vld [vmem:[%s4159_s26 + $0x17e0] sm:$0xff]  ;;  %2313 = vmatpush.msra.mxu2 %v1774_v14 }
 0x1e8   : > { %v1642_v16 = vld [vmem:[%s4159_s26 + $0x11a0] sm:$0xff]  ;;  %2332 = vmatpush.msra.mxu3 %v1842_v15 }
 0x1e9   : > { %v1710_v17 = vld [vmem:[%s4159_s26 + $0x13c0] sm:$0xff]  ;;  %2274 = vmatpush.msra.mxu0 %v1642_v16 }
 0x1ea   : > { %v1770_v18 = vld [vmem:[%s4159_s26 + $0x15a0] sm:$0xff]  ;;  %2293 = vmatpush.msra.mxu1 %v1710_v17 }
 0x1eb   : > { %v1838_v19 = vld [vmem:[%s4159_s26 + $0x17c0] sm:$0xff]  ;;  %2314 = vmatpush.msra.mxu2 %v1770_v18  ;;  %v1071_v18 = vld [vmem:[#allocation2 + $0x20] sm:$0xff] }
 0x1ec   : > { %v1638_v58 = vld [vmem:[%s4159_s26 + $0x1180] sm:$0xff]  ;;  %2333 = vmatpush.msra.mxu3 %v1838_v19  ;;  %v1073_v19 = vld [vmem:[#allocation2 + $0x38] sm:$0xff] }
 0x1ed   : > { %v1706_v20 = vld [vmem:[%s4159_s26 + $0x13a0] sm:$0xff]  ;;  %2275 = vmatpush.msra.mxu0 %v1638_v58 }
 0x1ee   : > { %v1766_v21 = vld [vmem:[%s4159_s26 + $0x1580] sm:$0xff]  ;;  %2294 = vmatpush.msra.mxu1 %v1706_v20 }
 0x1ef   : > { %v1834_v22 = vld [vmem:[%s4159_s26 + $0x17a0] sm:$0xff]  ;;  %2315 = vmatpush.msra.mxu2 %v1766_v21 }
 0x1f0   : > { %v1634_v24 = vld [vmem:[%s4159_s26 + $0x1160] sm:$0xff]  ;;  %2334 = vmatpush.msra.mxu3 %v1834_v22 }
 0x1f1   : > { %v1702_v25 = vld [vmem:[%s4159_s26 + $0x1380] sm:$0xff]  ;;  %2276 = vmatpush.msra.mxu0 %v1634_v24 }
 0x1f2   : > { %v1762_v26 = vld [vmem:[%s4159_s26 + $0x1560] sm:$0xff]  ;;  %2295 = vmatpush.msra.mxu1 %v1702_v25 }
 0x1f3   : > { %v1830_v27 = vld [vmem:[%s4159_s26 + $0x1780] sm:$0xff]  ;;  %2316 = vmatpush.msra.mxu2 %v1762_v26 }
 0x1f4   : > { %v1066_v28 = vld [vmem:[#allocation2 + $0x50] sm:$0xff]  ;;  %2335 = vmatpush.msra.mxu3 %v1830_v27 }
 0x1f5   : > { %v1630_v30 = vld [vmem:[%s4159_s26 + $0x1140] sm:$0xff]  ;;  %2208 = vmatmul.f32.vlgmr.msrb.gmra.mxu0 %v1066_v28 }
 0x1f6   : > { %v1698_v31 = vld [vmem:[%s4159_s26 + $0x1360] sm:$0xff]  ;;  %2277 = vmatpush.msra.mxu0 %v1630_v30 }
 0x1f7   : > { %v1758_v32 = vld [vmem:[%s4159_s26 + $0x1540] sm:$0xff]  ;;  %2296 = vmatpush.msra.mxu1 %v1698_v31 }
 0x1f8   : > { %v1826_v33 = vld [vmem:[%s4159_s26 + $0x1760] sm:$0xff]  ;;  %2317 = vmatpush.msra.mxu2 %v1758_v32 }
 0x1f9   : > { %v1626_v35 = vld [vmem:[%s4159_s26 + $0x1120] sm:$0xff]  ;;  %2336 = vmatpush.msra.mxu3 %v1826_v33 }
 0x1fa   : > { %v1694_v36 = vld [vmem:[%s4159_s26 + $0x1340] sm:$0xff]  ;;  %2278 = vmatpush.msra.mxu0 %v1626_v35 }
 0x1fb   : > { %v1754_v37 = vld [vmem:[%s4159_s26 + $0x1520] sm:$0xff]  ;;  %2297 = vmatpush.msra.mxu1 %v1694_v36 }
 0x1fc   : > { %v1822_v38 = vld [vmem:[%s4159_s26 + $0x1740] sm:$0xff]  ;;  %2318 = vmatpush.msra.mxu2 %v1754_v37 }
 0x1fd   : > { %v1622_v39 = vld [vmem:[%s4159_s26 + $0x1100] sm:$0xff]  ;;  %2337 = vmatpush.msra.mxu3 %v1822_v38 }
 0x1fe   : > { %v1690_v40 = vld [vmem:[%s4159_s26 + $0x1320] sm:$0xff]  ;;  %2279 = vmatpush.msra.mxu0 %v1622_v39 }
 0x1ff   : > { %v1750_v41 = vld [vmem:[%s4159_s26 + $0x1500] sm:$0xff]  ;;  %2298 = vmatpush.msra.mxu1 %v1690_v40 }
 0x200   : > { %v1818_v42 = vld [vmem:[%s4159_s26 + $0x1720] sm:$0xff]  ;;  %2319 = vmatpush.msra.mxu2 %v1750_v41 }
 0x201   : > { %v1618_v43 = vld [vmem:[%s4159_s26 + $0x10e0] sm:$0xff]  ;;  %2338 = vmatpush.msra.mxu3 %v1818_v42 }
 0x202   : > { %v1686_v44 = vld [vmem:[%s4159_s26 + $0x1300] sm:$0xff]  ;;  %2280 = vmatpush.msra.mxu0 %v1618_v43 }
 0x203   : > { %v1746_v45 = vld [vmem:[%s4159_s26 + $0x14e0] sm:$0xff]  ;;  %2299 = vmatpush.msra.mxu1 %v1686_v44 }
 0x204   : > { %v1814_v46 = vld [vmem:[%s4159_s26 + $0x1700] sm:$0xff]  ;;  %2320 = vmatpush.msra.mxu2 %v1746_v45 }
 0x205   : > { %v1614_v47 = vld [vmem:[%s4159_s26 + $0x10c0] sm:$0xff]  ;;  %2339 = vmatpush.msra.mxu3 %v1814_v46 }
 0x206   : > { %v1682_v48 = vld [vmem:[%s4159_s26 + $0x12e0] sm:$0xff]  ;;  %2281 = vmatpush.msra.mxu0 %v1614_v47 }
 0x207   : > { %v1742_v49 = vld [vmem:[%s4159_s26 + $0x14c0] sm:$0xff]  ;;  %2300 = vmatpush.msra.mxu1 %v1682_v48 }
 0x208   : > { %v1810_v50 = vld [vmem:[%s4159_s26 + $0x16e0] sm:$0xff]  ;;  %2321 = vmatpush.msra.mxu2 %v1742_v49 }
 0x209   : > { %v1610_v51 = vld [vmem:[%s4159_s26 + $0x10a0] sm:$0xff]  ;;  %2340 = vmatpush.msra.mxu3 %v1810_v50 }
 0x20a   : > { %v1678_v52 = vld [vmem:[%s4159_s26 + $0x12c0] sm:$0xff]  ;;  %2282 = vmatpush.msra.mxu0 %v1610_v51 }
 0x20b   : > { %v1738_v53 = vld [vmem:[%s4159_s26 + $0x14a0] sm:$0xff]  ;;  %2301 = vmatpush.msra.mxu1 %v1678_v52 }
 0x20c   : > { %v1806_v54 = vld [vmem:[%s4159_s26 + $0x16c0] sm:$0xff]  ;;  %2322 = vmatpush.msra.mxu2 %v1738_v53 }
 0x20d   : > { %v1606_v55 = vld [vmem:[%s4159_s26 + $0x1080] sm:$0xff]  ;;  %2341 = vmatpush.msra.mxu3 %v1806_v54 }
 0x20e   : > { %v1674_v56 = vld [vmem:[%s4159_s26 + $0x12a0] sm:$0xff]  ;;  %2283 = vmatpush.msra.mxu0 %v1606_v55 }
 0x20f   : > { %v1734_v57 = vld [vmem:[%s4159_s26 + $0x1480] sm:$0xff]  ;;  %2302 = vmatpush.msra.mxu1 %v1674_v56 }
 0x210   : > { %v1802_v59 = vld [vmem:[%s4159_s26 + $0x16a0] sm:$0xff]  ;;  %2323 = vmatpush.msra.mxu2 %v1734_v57 }
 0x211   : > { %v1602_v60 = vld [vmem:[%s4159_s26 + $0x1060] sm:$0xff]  ;;  %2342 = vmatpush.msra.mxu3 %v1802_v59 }
 0x212   : > { %v1670_v61 = vld [vmem:[%s4159_s26 + $0x1280] sm:$0xff]  ;;  %2284 = vmatpush.msra.mxu0 %v1602_v60 }
 0x213   : > { %v1730_v62 = vld [vmem:[%s4159_s26 + $0x1460] sm:$0xff]  ;;  %2303 = vmatpush.msra.mxu1 %v1670_v61 }
 0x214   : > { %v1798_v63 = vld [vmem:[%s4159_s26 + $0x1680] sm:$0xff]  ;;  %2324 = vmatpush.msra.mxu2 %v1730_v62 }
 0x215   : > { %v1598_v0 = vld [vmem:[%s4159_s26 + $0x1040] sm:$0xff]  ;;  %2343 = vmatpush.msra.mxu3 %v1798_v63 }
 0x216   : > { %v1666_v1 = vld [vmem:[%s4159_s26 + $0x1260] sm:$0xff]  ;;  %2285 = vmatpush.msra.mxu0 %v1598_v0 }
 0x217   : > { %v1726_v2 = vld [vmem:[%s4159_s26 + $0x1440] sm:$0xff]  ;;  %2304 = vmatpush.msra.mxu1 %v1666_v1 }
 0x218   : > { %v1794_v3 = vld [vmem:[%s4159_s26 + $0x1660] sm:$0xff]  ;;  %2325 = vmatpush.msra.mxu2 %v1726_v2 }
 0x219   : > { %v1594_v4 = vld [vmem:[%s4159_s26 + $0x1020] sm:$0xff]  ;;  %2344 = vmatpush.msra.mxu3 %v1794_v3 }
 0x21a   : > { %v1662_v5 = vld [vmem:[%s4159_s26 + $0x1240] sm:$0xff]  ;;  %2286 = vmatpush.msra.mxu0 %v1594_v4 }
 0x21b   : > { %v1722_v6 = vld [vmem:[%s4159_s26 + $0x1420] sm:$0xff]  ;;  %2305 = vmatpush.msra.mxu1 %v1662_v5 }
 0x21c   : > { %v1790_v7 = vld [vmem:[%s4159_s26 + $0x1640] sm:$0xff]  ;;  %2326 = vmatpush.msra.mxu2 %v1722_v6 }
 0x21d   : > { %v1590_v8 = vld [vmem:[%s4159_s26 + $0x1000] sm:$0xff]  ;;  %2345 = vmatpush.msra.mxu3 %v1790_v7 }
 0x21e   : > { %v1658_v9 = vld [vmem:[%s4159_s26 + $0x1220] sm:$0xff]  ;;  %2287 = vmatpush.msra.mxu0 %v1590_v8 }
 0x21f   : > { %v1718_v10 = vld [vmem:[%s4159_s26 + $0x1400] sm:$0xff]  ;;  %2306 = vmatpush.msra.mxu1 %v1658_v9  ;;  %2288 = vmatmul.f32.vlgmr.msra.gmra.mxu0 %v1070_v12 }
 0x220   : > { %v1786_v11 = vld [vmem:[%s4159_s26 + $0x1620] sm:$0xff]  ;;  %2327 = vmatpush.msra.mxu2 %v1718_v10 }
 0x221   : > { %v1072_v13 = vld [vmem:[#allocation2 + $0x10] sm:$0xff]  ;;  %2346 = vmatpush.msra.mxu3 %v1786_v11 }
 0x222   : > { %v1906_v14 = vld [vmem:[%s4159_s26 + $0x19e0] sm:$0xff]  ;;  %2328 = vmatmul.f32.vlgmr.msra.gmra.mxu2 %v1072_v13 }
 0x223   : > { %v2034_v15 = vld [vmem:[%s4159_s26 + $0x1de0] sm:$0xff]  ;;  %2352 = vmatpush.msrb.mxu0 %v1906_v14 }
 0x224   : > { %v1654_v16 = vld [vmem:[%s4159_s26 + $0x1200] sm:$0xff]  ;;  %2392 = vmatpush.msrb.mxu2 %v2034_v15 }
 0x225   : > { %v1782_v17 = vld [vmem:[%s4159_s26 + $0x1600] sm:$0xff]  ;;  %2307 = vmatpush.msra.mxu1 %v1654_v16  ;;  %v1074_v16 = vld [vmem:[#allocation2 + $0x60] sm:$0xff] }
 0x226   : > { %v1902_v58 = vld [vmem:[%s4159_s26 + $0x19c0] sm:$0xff]  ;;  %2347 = vmatpush.msra.mxu3 %v1782_v17  ;;  %2308 = vmatmul.f32.vlgmr.msra.gmra.mxu1 %v1071_v18  ;;  %v1076_v17 = vld [vmem:[#allocation2 + $0x78] sm:$0xff] }
 0x227   : > { %v1970_v20 = vld [vmem:[%s4159_s26 + $0x1be0] sm:$0xff]  ;;  %2348 = vmatmul.f32.vlgmr.msra.gmra.mxu3 %v1073_v19  ;;  %2353 = vmatpush.msrb.mxu0 %v1902_v58  ;;  %v1139_v18 = vld [vmem:[%s4159_s26 + $0x1e8] sm:$0xff] }
 0x228   : > { %v2030_v21 = vld [vmem:[%s4159_s26 + $0x1dc0] sm:$0xff]  ;;  %2372 = vmatpush.msrb.mxu1 %v1970_v20  ;;  %v1267_v19 = vld [vmem:[%s4159_s26 + $0x5e8] sm:$0xff] }
 0x229   : > { %v2098_v22 = vld [vmem:[%s4159_s26 + $0x1fe0] sm:$0xff]  ;;  %2393 = vmatpush.msrb.mxu2 %v2030_v21 }
 0x22a   : > { %v1898_v23 = vld [vmem:[%s4159_s26 + $0x19a0] sm:$0xff]  ;;  %2412 = vmatpush.msrb.mxu3 %v2098_v22  ;;  %v1077_v22 = vld [vmem:[#allocation2 + $0x28] sm:$0xff] }
 0x22b   : > { %v1966_v24 = vld [vmem:[%s4159_s26 + $0x1bc0] sm:$0xff]  ;;  %2354 = vmatpush.msrb.mxu0 %v1898_v23  ;;  %v1135_v23 = vld [vmem:[%s4159_s26 + $0x1c8] sm:$0xff] }
 0x22c   : > { %v2026_v25 = vld [vmem:[%s4159_s26 + $0x1da0] sm:$0xff]  ;;  %2373 = vmatpush.msrb.mxu1 %v1966_v24  ;;  %v1203_v24 = vld [vmem:[%s4159_s26 + $0x3e8] sm:$0xff] }
 0x22d   : > { %v2094_v26 = vld [vmem:[%s4159_s26 + $0x1fc0] sm:$0xff]  ;;  %2394 = vmatpush.msrb.mxu2 %v2026_v25  ;;  %v1263_v25 = vld [vmem:[%s4159_s26 + $0x5c8] sm:$0xff] }
 0x22e   : > { %v1894_v27 = vld [vmem:[%s4159_s26 + $0x1980] sm:$0xff]  ;;  %2413 = vmatpush.msrb.mxu3 %v2094_v26  ;;  %v1331_v26 = vld [vmem:[%s4159_s26 + $0x7e8] sm:$0xff] }
 0x22f   : > { %v1962_v28 = vld [vmem:[%s4159_s26 + $0x1ba0] sm:$0xff]  ;;  %2355 = vmatpush.msrb.mxu0 %v1894_v27  ;;  %v1131_v27 = vld [vmem:[%s4159_s26 + $0x1a8] sm:$0xff] }
 0x230   : > { %v2022_v29 = vld [vmem:[%s4159_s26 + $0x1d80] sm:$0xff]  ;;  %2374 = vmatpush.msrb.mxu1 %v1962_v28  ;;  %v1199_v28 = vld [vmem:[%s4159_s26 + $0x3c8] sm:$0xff] }
 0x231   : > { %v2090_v30 = vld [vmem:[%s4159_s26 + $0x1fa0] sm:$0xff]  ;;  %2395 = vmatpush.msrb.mxu2 %v2022_v29  ;;  %v1259_v29 = vld [vmem:[%s4159_s26 + $0x5a8] sm:$0xff] }
 0x232   : > { %v1890_v31 = vld [vmem:[%s4159_s26 + $0x1960] sm:$0xff]  ;;  %2414 = vmatpush.msrb.mxu3 %v2090_v30  ;;  %v1327_v30 = vld [vmem:[%s4159_s26 + $0x7c8] sm:$0xff] }
 0x233   : > { %v1958_v32 = vld [vmem:[%s4159_s26 + $0x1b80] sm:$0xff]  ;;  %2356 = vmatpush.msrb.mxu0 %v1890_v31  ;;  %v1127_v31 = vld [vmem:[%s4159_s26 + $0x188] sm:$0xff] }
 0x234   : > { %v2018_v33 = vld [vmem:[%s4159_s26 + $0x1d60] sm:$0xff]  ;;  %2375 = vmatpush.msrb.mxu1 %v1958_v32  ;;  %v1195_v32 = vld [vmem:[%s4159_s26 + $0x3a8] sm:$0xff] }
 0x235   : > { %v2086_v34 = vld [vmem:[%s4159_s26 + $0x1f80] sm:$0xff]  ;;  %2396 = vmatpush.msrb.mxu2 %v2018_v33  ;;  %v1255_v33 = vld [vmem:[%s4159_s26 + $0x588] sm:$0xff] }
 0x236   : > { %v1886_v35 = vld [vmem:[%s4159_s26 + $0x1940] sm:$0xff]  ;;  %2415 = vmatpush.msrb.mxu3 %v2086_v34  ;;  %v1323_v34 = vld [vmem:[%s4159_s26 + $0x7a8] sm:$0xff] }
 0x237   : > { %v1954_v36 = vld [vmem:[%s4159_s26 + $0x1b60] sm:$0xff]  ;;  %2357 = vmatpush.msrb.mxu0 %v1886_v35  ;;  %v1123_v35 = vld [vmem:[%s4159_s26 + $0x168] sm:$0xff] }
 0x238   : > { %v2014_v37 = vld [vmem:[%s4159_s26 + $0x1d40] sm:$0xff]  ;;  %2376 = vmatpush.msrb.mxu1 %v1954_v36  ;;  %v1191_v36 = vld [vmem:[%s4159_s26 + $0x388] sm:$0xff] }
 0x239   : > { %v2082_v38 = vld [vmem:[%s4159_s26 + $0x1f60] sm:$0xff]  ;;  %2397 = vmatpush.msrb.mxu2 %v2014_v37  ;;  %v1251_v37 = vld [vmem:[%s4159_s26 + $0x568] sm:$0xff] }
 0x23a   : > { %v1882_v39 = vld [vmem:[%s4159_s26 + $0x1920] sm:$0xff]  ;;  %2416 = vmatpush.msrb.mxu3 %v2082_v38  ;;  %v1319_v38 = vld [vmem:[%s4159_s26 + $0x788] sm:$0xff] }
 0x23b   : > { %v1950_v40 = vld [vmem:[%s4159_s26 + $0x1b40] sm:$0xff]  ;;  %2358 = vmatpush.msrb.mxu0 %v1882_v39  ;;  %v1119_v39 = vld [vmem:[%s4159_s26 + $0x148] sm:$0xff] }
 0x23c   : > { %v2010_v41 = vld [vmem:[%s4159_s26 + $0x1d20] sm:$0xff]  ;;  %2377 = vmatpush.msrb.mxu1 %v1950_v40  ;;  %v1187_v40 = vld [vmem:[%s4159_s26 + $0x368] sm:$0xff] }
 0x23d   : > { %v2078_v42 = vld [vmem:[%s4159_s26 + $0x1f40] sm:$0xff]  ;;  %2398 = vmatpush.msrb.mxu2 %v2010_v41  ;;  %v1247_v41 = vld [vmem:[%s4159_s26 + $0x548] sm:$0xff] }
 0x23e   : > { %v1878_v43 = vld [vmem:[%s4159_s26 + $0x1900] sm:$0xff]  ;;  %2417 = vmatpush.msrb.mxu3 %v2078_v42  ;;  %v1315_v42 = vld [vmem:[%s4159_s26 + $0x768] sm:$0xff] }
 0x23f   : > { %v1946_v44 = vld [vmem:[%s4159_s26 + $0x1b20] sm:$0xff]  ;;  %2359 = vmatpush.msrb.mxu0 %v1878_v43  ;;  %v1115_v43 = vld [vmem:[%s4159_s26 + $0x128] sm:$0xff] }
 0x240   : > { %v2006_v45 = vld [vmem:[%s4159_s26 + $0x1d00] sm:$0xff]  ;;  %2378 = vmatpush.msrb.mxu1 %v1946_v44  ;;  %v1183_v44 = vld [vmem:[%s4159_s26 + $0x348] sm:$0xff] }
 0x241   : > { %v2074_v46 = vld [vmem:[%s4159_s26 + $0x1f20] sm:$0xff]  ;;  %2399 = vmatpush.msrb.mxu2 %v2006_v45  ;;  %v1243_v45 = vld [vmem:[%s4159_s26 + $0x528] sm:$0xff] }
 0x242   : > { %v1874_v47 = vld [vmem:[%s4159_s26 + $0x18e0] sm:$0xff]  ;;  %2418 = vmatpush.msrb.mxu3 %v2074_v46  ;;  %v1311_v46 = vld [vmem:[%s4159_s26 + $0x748] sm:$0xff] }
 0x243   : > { %v1942_v48 = vld [vmem:[%s4159_s26 + $0x1b00] sm:$0xff]  ;;  %2360 = vmatpush.msrb.mxu0 %v1874_v47  ;;  %v1111_v47 = vld [vmem:[%s4159_s26 + $0x108] sm:$0xff] }
 0x244   : > { %v2002_v49 = vld [vmem:[%s4159_s26 + $0x1ce0] sm:$0xff]  ;;  %2379 = vmatpush.msrb.mxu1 %v1942_v48  ;;  %v1179_v48 = vld [vmem:[%s4159_s26 + $0x328] sm:$0xff] }
 0x245   : > { %v2070_v50 = vld [vmem:[%s4159_s26 + $0x1f00] sm:$0xff]  ;;  %2400 = vmatpush.msrb.mxu2 %v2002_v49  ;;  %v1239_v49 = vld [vmem:[%s4159_s26 + $0x508] sm:$0xff] }
 0x246   : > { %v1870_v51 = vld [vmem:[%s4159_s26 + $0x18c0] sm:$0xff]  ;;  %2419 = vmatpush.msrb.mxu3 %v2070_v50  ;;  %v1307_v50 = vld [vmem:[%s4159_s26 + $0x728] sm:$0xff] }
 0x247   : > { %v1938_v52 = vld [vmem:[%s4159_s26 + $0x1ae0] sm:$0xff]  ;;  %2361 = vmatpush.msrb.mxu0 %v1870_v51  ;;  %v1107_v51 = vld [vmem:[%s4159_s26 + $0xe8] sm:$0xff] }
 0x248   : > { %v1998_v53 = vld [vmem:[%s4159_s26 + $0x1cc0] sm:$0xff]  ;;  %2380 = vmatpush.msrb.mxu1 %v1938_v52  ;;  %v1175_v52 = vld [vmem:[%s4159_s26 + $0x308] sm:$0xff] }
 0x249   : > { %v2066_v54 = vld [vmem:[%s4159_s26 + $0x1ee0] sm:$0xff]  ;;  %2401 = vmatpush.msrb.mxu2 %v1998_v53  ;;  %v1235_v53 = vld [vmem:[%s4159_s26 + $0x4e8] sm:$0xff] }
 0x24a   : > { %v1866_v55 = vld [vmem:[%s4159_s26 + $0x18a0] sm:$0xff]  ;;  %2420 = vmatpush.msrb.mxu3 %v2066_v54  ;;  %v1303_v54 = vld [vmem:[%s4159_s26 + $0x708] sm:$0xff] }
 0x24b   : > { %v1934_v56 = vld [vmem:[%s4159_s26 + $0x1ac0] sm:$0xff]  ;;  %2362 = vmatpush.msrb.mxu0 %v1866_v55  ;;  %v1103_v55 = vld [vmem:[%s4159_s26 + $0xc8] sm:$0xff] }
 0x24c   : > { %v1994_v57 = vld [vmem:[%s4159_s26 + $0x1ca0] sm:$0xff]  ;;  %2381 = vmatpush.msrb.mxu1 %v1934_v56  ;;  %v1171_v56 = vld [vmem:[%s4159_s26 + $0x2e8] sm:$0xff] }
 0x24d   : > { %v2062_v59 = vld [vmem:[%s4159_s26 + $0x1ec0] sm:$0xff]  ;;  %2402 = vmatpush.msrb.mxu2 %v1994_v57  ;;  %v1231_v57 = vld [vmem:[%s4159_s26 + $0x4c8] sm:$0xff] }
 0x24e   : > { %v1862_v60 = vld [vmem:[%s4159_s26 + $0x1880] sm:$0xff]  ;;  %2421 = vmatpush.msrb.mxu3 %v2062_v59  ;;  %v1299_v59 = vld [vmem:[%s4159_s26 + $0x6e8] sm:$0xff] }
 0x24f   : > { %v1930_v61 = vld [vmem:[%s4159_s26 + $0x1aa0] sm:$0xff]  ;;  %2363 = vmatpush.msrb.mxu0 %v1862_v60  ;;  %v1099_v60 = vld [vmem:[%s4159_s26 + $0xa8] sm:$0xff] }
 0x250   : > { %v1990_v62 = vld [vmem:[%s4159_s26 + $0x1c80] sm:$0xff]  ;;  %2382 = vmatpush.msrb.mxu1 %v1930_v61  ;;  %v1167_v61 = vld [vmem:[%s4159_s26 + $0x2c8] sm:$0xff] }
 0x251   : > { %v2058_v63 = vld [vmem:[%s4159_s26 + $0x1ea0] sm:$0xff]  ;;  %2403 = vmatpush.msrb.mxu2 %v1990_v62  ;;  %v1227_v62 = vld [vmem:[%s4159_s26 + $0x4a8] sm:$0xff] }
 0x252   : > { %v1858_v0 = vld [vmem:[%s4159_s26 + $0x1860] sm:$0xff]  ;;  %2422 = vmatpush.msrb.mxu3 %v2058_v63  ;;  %v1295_v63 = vld [vmem:[%s4159_s26 + $0x6c8] sm:$0xff] }
 0x253   : > { %v1926_v1 = vld [vmem:[%s4159_s26 + $0x1a80] sm:$0xff]  ;;  %2364 = vmatpush.msrb.mxu0 %v1858_v0  ;;  %v1095_v0 = vld [vmem:[%s4159_s26 + $0x88] sm:$0xff] }
 0x254   : > { %v1986_v2 = vld [vmem:[%s4159_s26 + $0x1c60] sm:$0xff]  ;;  %2383 = vmatpush.msrb.mxu1 %v1926_v1  ;;  %v1163_v1 = vld [vmem:[%s4159_s26 + $0x2a8] sm:$0xff] }
 0x255   : > { %v2054_v3 = vld [vmem:[%s4159_s26 + $0x1e80] sm:$0xff]  ;;  %2404 = vmatpush.msrb.mxu2 %v1986_v2  ;;  %v1223_v2 = vld [vmem:[%s4159_s26 + $0x488] sm:$0xff] }
 0x256   : > { %v1854_v4 = vld [vmem:[%s4159_s26 + $0x1840] sm:$0xff]  ;;  %2423 = vmatpush.msrb.mxu3 %v2054_v3  ;;  %v1291_v3 = vld [vmem:[%s4159_s26 + $0x6a8] sm:$0xff] }
 0x257   : > { %v1922_v5 = vld [vmem:[%s4159_s26 + $0x1a60] sm:$0xff]  ;;  %2365 = vmatpush.msrb.mxu0 %v1854_v4  ;;  %v1091_v4 = vld [vmem:[%s4159_s26 + $0x68] sm:$0xff] }
 0x258   : > { %v1982_v6 = vld [vmem:[%s4159_s26 + $0x1c40] sm:$0xff]  ;;  %2384 = vmatpush.msrb.mxu1 %v1922_v5  ;;  %v1159_v5 = vld [vmem:[%s4159_s26 + $0x288] sm:$0xff] }
 0x259   : > { %v2050_v7 = vld [vmem:[%s4159_s26 + $0x1e60] sm:$0xff]  ;;  %2405 = vmatpush.msrb.mxu2 %v1982_v6  ;;  %v1219_v6 = vld [vmem:[%s4159_s26 + $0x468] sm:$0xff] }
 0x25a   : > { %v1850_v8 = vld [vmem:[%s4159_s26 + $0x1820] sm:$0xff]  ;;  %2424 = vmatpush.msrb.mxu3 %v2050_v7  ;;  %v1287_v7 = vld [vmem:[%s4159_s26 + $0x688] sm:$0xff] }
 0x25b   : > { %v1918_v9 = vld [vmem:[%s4159_s26 + $0x1a40] sm:$0xff]  ;;  %2366 = vmatpush.msrb.mxu0 %v1850_v8  ;;  %v1087_v8 = vld [vmem:[%s4159_s26 + $0x48] sm:$0xff] }
 0x25c   : > { %v1978_v10 = vld [vmem:[%s4159_s26 + $0x1c20] sm:$0xff]  ;;  %2385 = vmatpush.msrb.mxu1 %v1918_v9  ;;  %v1155_v9 = vld [vmem:[%s4159_s26 + $0x268] sm:$0xff] }
 0x25d   : > { %v2046_v11 = vld [vmem:[%s4159_s26 + $0x1e40] sm:$0xff]  ;;  %2406 = vmatpush.msrb.mxu2 %v1978_v10  ;;  %v1215_v10 = vld [vmem:[%s4159_s26 + $0x448] sm:$0xff] }
 0x25e   : > { %v1846_v12 = vld [vmem:[%s4159_s26 + $0x1800] sm:$0xff]  ;;  %2425 = vmatpush.msrb.mxu3 %v2046_v11  ;;  %v1283_v11 = vld [vmem:[%s4159_s26 + $0x668] sm:$0xff] }
 0x25f   : > { %v1914_v13 = vld [vmem:[%s4159_s26 + $0x1a20] sm:$0xff]  ;;  %2367 = vmatpush.msrb.mxu0 %v1846_v12  ;;  %v1083_v12 = vld [vmem:[%s4159_s26 + $0x28] sm:$0xff] }
 0x260   : > { %v1974_v14 = vld [vmem:[%s4159_s26 + $0x1c00] sm:$0xff]  ;;  %2386 = vmatpush.msrb.mxu1 %v1914_v13  ;;  %2368 = vmatmul.f32.vlgmr.msrb.gmra.mxu0 %v1074_v16  ;;  %v1151_v13 = vld [vmem:[%s4159_s26 + $0x248] sm:$0xff] }
 0x261   : > { %v2042_v15 = vld [vmem:[%s4159_s26 + $0x1e20] sm:$0xff]  ;;  %2407 = vmatpush.msrb.mxu2 %v1974_v14  ;;  %2432 = vmatpush.msra.mxu0 %v1139_v18  ;;  %v1211_v14 = vld [vmem:[%s4159_s26 + $0x428] sm:$0xff] }
 0x262   : > { %2426 = vmatpush.msrb.mxu3 %v2042_v15  ;;  %v1910_v58 = vld [vmem:[%s4159_s26 + $0x1a00] sm:$0xff]  ;;  %2408 = vmatmul.f32.vlgmr.msrb.gmra.mxu2 %v1076_v17  ;;  %v1279_v15 = vld [vmem:[%s4159_s26 + $0x648] sm:$0xff] }
 0x263   : > { %v2038_v20 = vld [vmem:[%s4159_s26 + $0x1e00] sm:$0xff]  ;;  %2472 = vmatpush.msra.mxu2 %v1267_v19  ;;  %2387 = vmatpush.msrb.mxu1 %v1910_v58  ;;  %v1079_v16 = vld [vmem:[%s4159_s26 + $0x8] sm:$0xff] }
 0x264   : > { %v1075_v21 = vld [vmem:[#allocation2 + $0x70] sm:$0xff]  ;;  %2427 = vmatpush.msrb.mxu3 %v2038_v20  ;;  %2433 = vmatpush.msra.mxu0 %v1135_v23  ;;  %v1147_v17 = vld [vmem:[%s4159_s26 + $0x228] sm:$0xff] }
 0x265   : > { %2388 = vmatmul.f32.vlgmr.msrb.gmra.mxu1 %v1075_v21  ;;  %2428 = vmatmul.f32.vlgmr.msrb.gmra.mxu3 %v1077_v22  ;;  %v1207_v18 = vld [vmem:[%s4159_s26 + $0x408] sm:$0xff] }
 0x266   : > { %2452 = vmatpush.msra.mxu1 %v1203_v24  ;;  %2473 = vmatpush.msra.mxu2 %v1263_v25  ;;  %v1275_v19 = vld [vmem:[%s4159_s26 + $0x628] sm:$0xff] }
 0x267   : > { %2492 = vmatpush.msra.mxu3 %v1331_v26  ;;  %2434 = vmatpush.msra.mxu0 %v1131_v27  ;;  %v1395_v58 = vld [vmem:[%s4159_s26 + $0x9e8] sm:$0xff] }
 0x268   : > { %2453 = vmatpush.msra.mxu1 %v1199_v28  ;;  %2474 = vmatpush.msra.mxu2 %v1259_v29  ;;  %v1523_v20 = vld [vmem:[%s4159_s26 + $0xde8] sm:$0xff] }
 0x269   : > { %2493 = vmatpush.msra.mxu3 %v1327_v30  ;;  %2435 = vmatpush.msra.mxu0 %v1127_v31  ;;  %v1143_v21 = vld [vmem:[%s4159_s26 + $0x208] sm:$0xff] }
 0x26a   : > { %2454 = vmatpush.msra.mxu1 %v1195_v32  ;;  %2475 = vmatpush.msra.mxu2 %v1255_v33  ;;  %v1271_v22 = vld [vmem:[%s4159_s26 + $0x608] sm:$0xff] }
 0x26b   : > { %2494 = vmatpush.msra.mxu3 %v1323_v34  ;;  %2436 = vmatpush.msra.mxu0 %v1123_v35  ;;  %v1391_v23 = vld [vmem:[%s4159_s26 + $0x9c8] sm:$0xff] }
 0x26c   : > { %2455 = vmatpush.msra.mxu1 %v1191_v36  ;;  %2476 = vmatpush.msra.mxu2 %v1251_v37  ;;  %v1459_v24 = vld [vmem:[%s4159_s26 + $0xbe8] sm:$0xff] }
 0x26d   : > { %2495 = vmatpush.msra.mxu3 %v1319_v38  ;;  %2437 = vmatpush.msra.mxu0 %v1119_v39  ;;  %v1519_v25 = vld [vmem:[%s4159_s26 + $0xdc8] sm:$0xff] }
 0x26e   : > { %2456 = vmatpush.msra.mxu1 %v1187_v40  ;;  %2477 = vmatpush.msra.mxu2 %v1247_v41  ;;  %v1587_v26 = vld [vmem:[%s4159_s26 + $0xfe8] sm:$0xff] }
 0x26f   : > { %2496 = vmatpush.msra.mxu3 %v1315_v42  ;;  %2438 = vmatpush.msra.mxu0 %v1115_v43  ;;  %v1387_v27 = vld [vmem:[%s4159_s26 + $0x9a8] sm:$0xff] }
 0x270   : > { %2457 = vmatpush.msra.mxu1 %v1183_v44  ;;  %2478 = vmatpush.msra.mxu2 %v1243_v45  ;;  %v1455_v28 = vld [vmem:[%s4159_s26 + $0xbc8] sm:$0xff] }
 0x271   : > { %2497 = vmatpush.msra.mxu3 %v1311_v46  ;;  %2439 = vmatpush.msra.mxu0 %v1111_v47  ;;  %v1515_v29 = vld [vmem:[%s4159_s26 + $0xda8] sm:$0xff] }
 0x272   : > { %2458 = vmatpush.msra.mxu1 %v1179_v48  ;;  %2479 = vmatpush.msra.mxu2 %v1239_v49  ;;  %v1583_v30 = vld [vmem:[%s4159_s26 + $0xfc8] sm:$0xff] }
 0x273   : > { %2498 = vmatpush.msra.mxu3 %v1307_v50  ;;  %2440 = vmatpush.msra.mxu0 %v1107_v51  ;;  %v1383_v31 = vld [vmem:[%s4159_s26 + $0x988] sm:$0xff] }
 0x274   : > { %2459 = vmatpush.msra.mxu1 %v1175_v52  ;;  %2480 = vmatpush.msra.mxu2 %v1235_v53  ;;  %v1451_v32 = vld [vmem:[%s4159_s26 + $0xba8] sm:$0xff] }
 0x275   : > { %2499 = vmatpush.msra.mxu3 %v1303_v54  ;;  %2441 = vmatpush.msra.mxu0 %v1103_v55  ;;  %v1511_v33 = vld [vmem:[%s4159_s26 + $0xd88] sm:$0xff] }
 0x276   : > { %2460 = vmatpush.msra.mxu1 %v1171_v56  ;;  %2481 = vmatpush.msra.mxu2 %v1231_v57  ;;  %v1579_v34 = vld [vmem:[%s4159_s26 + $0xfa8] sm:$0xff]  ;;  %v2102_v57 = vld [vmem:[%s350_s22] sm:$0xf] }
 0x277   : > { %2500 = vmatpush.msra.mxu3 %v1299_v59  ;;  %2442 = vmatpush.msra.mxu0 %v1099_v60  ;;  %v1379_v35 = vld [vmem:[%s4159_s26 + $0x968] sm:$0xff] }
 0x278   : > { %2461 = vmatpush.msra.mxu1 %v1167_v61  ;;  %2482 = vmatpush.msra.mxu2 %v1227_v62  ;;  %v1447_v36 = vld [vmem:[%s4159_s26 + $0xb88] sm:$0xff] }
 0x279   : > { %2501 = vmatpush.msra.mxu3 %v1295_v63  ;;  %2443 = vmatpush.msra.mxu0 %v1095_v0  ;;  %v1507_v37 = vld [vmem:[%s4159_s26 + $0xd68] sm:$0xff] }
 0x27a   : > { %2462 = vmatpush.msra.mxu1 %v1163_v1  ;;  %2483 = vmatpush.msra.mxu2 %v1223_v2  ;;  %v1575_v38 = vld [vmem:[%s4159_s26 + $0xf88] sm:$0xff]  ;;  %v2104_v1 = vperm.slane %v2102_v57, 0 }
 0x27b   : > { %2502 = vmatpush.msra.mxu3 %v1291_v3  ;;  %2444 = vmatpush.msra.mxu0 %v1091_v4  ;;  %v1375_v39 = vld [vmem:[%s4159_s26 + $0x948] sm:$0xff] }
 0x27c   : > { %2463 = vmatpush.msra.mxu1 %v1159_v5  ;;  %2484 = vmatpush.msra.mxu2 %v1219_v6  ;;  %v1443_v40 = vld [vmem:[%s4159_s26 + $0xb68] sm:$0xff] }
 0x27d   : > { %2503 = vmatpush.msra.mxu3 %v1287_v7  ;;  %2445 = vmatpush.msra.mxu0 %v1087_v8  ;;  %v1503_v41 = vld [vmem:[%s4159_s26 + $0xd48] sm:$0xff]  ;;  %v2129_v8 = vpop.f32.mrf.mxu0 }
 0x27e   : > { %2464 = vmatpush.msra.mxu1 %v1155_v9  ;;  %2485 = vmatpush.msra.mxu2 %v1215_v10  ;;  %v1571_v42 = vld [vmem:[%s4159_s26 + $0xf68] sm:$0xff] }
 0x27f   : > { %2504 = vmatpush.msra.mxu3 %v1283_v11  ;;  %2446 = vmatpush.msra.mxu0 %v1083_v12  ;;  %v1371_v43 = vld [vmem:[%s4159_s26 + $0x928] sm:$0xff]  ;;  %v2130_v11 = vadd.f32 %v2129_v8, %v2104_v1 }
 0x280   : > { %2465 = vmatpush.msra.mxu1 %v1151_v13  ;;  %2486 = vmatpush.msra.mxu2 %v1211_v14  ;;  %v1439_v44 = vld [vmem:[%s4159_s26 + $0xb48] sm:$0xff] }
 0x281   : > { %2505 = vmatpush.msra.mxu3 %v1279_v15  ;;  %2447 = vmatpush.msra.mxu0 %v1079_v16  ;;  %v1499_v45 = vld [vmem:[%s4159_s26 + $0xd28] sm:$0xff]  ;;  %v2149_v16 = vpop.f32.mrf.mxu1 }
 0x282   : > { %2466 = vmatpush.msra.mxu1 %v1147_v17  ;;  %2487 = vmatpush.msra.mxu2 %v1207_v18  ;;  %v1567_v46 = vld [vmem:[%s4159_s26 + $0xf48] sm:$0xff] }
 0x283   : > { %2506 = vmatpush.msra.mxu3 %v1275_v19  ;;  %2512 = vmatpush.msrb.mxu0 %v1395_v58  ;;  %v1367_v47 = vld [vmem:[%s4159_s26 + $0x908] sm:$0xff]  ;;  %v2150_v19 = vadd.f32 %v2149_v16, %v2130_v11 }
 0x284   : > { %2552 = vmatpush.msrb.mxu2 %v1523_v20  ;;  %2467 = vmatpush.msra.mxu1 %v1143_v21  ;;  %v1435_v48 = vld [vmem:[%s4159_s26 + $0xb28] sm:$0xff] }
 0x285   : > { %2507 = vmatpush.msra.mxu3 %v1271_v22  ;;  %2513 = vmatpush.msrb.mxu0 %v1391_v23  ;;  %v1495_v49 = vld [vmem:[%s4159_s26 + $0xd08] sm:$0xff]  ;;  %v2169_v23 = vpop.f32.mrf.mxu2 }
 0x286   : > { %2532 = vmatpush.msrb.mxu1 %v1459_v24  ;;  %2553 = vmatpush.msrb.mxu2 %v1519_v25  ;;  %v1563_v50 = vld [vmem:[%s4159_s26 + $0xf28] sm:$0xff] }
 0x287   : > { %2572 = vmatpush.msrb.mxu3 %v1587_v26  ;;  %2514 = vmatpush.msrb.mxu0 %v1387_v27  ;;  %v1363_v51 = vld [vmem:[%s4159_s26 + $0x8e8] sm:$0xff]  ;;  %v2170_v26 = vadd.f32 %v2169_v23, %v2150_v19 }
 0x288   : > { %2533 = vmatpush.msrb.mxu1 %v1455_v28  ;;  %2554 = vmatpush.msrb.mxu2 %v1515_v29  ;;  %v1431_v52 = vld [vmem:[%s4159_s26 + $0xb08] sm:$0xff]  ;;  %v2189_v29 = vpop.f32.mrf.mxu3 }
 0x289   : > { %2573 = vmatpush.msrb.mxu3 %v1583_v30  ;;  %2515 = vmatpush.msrb.mxu0 %v1383_v31  ;;  %v1491_v53 = vld [vmem:[%s4159_s26 + $0xce8] sm:$0xff] }
 0x28a   : > { %2534 = vmatpush.msrb.mxu1 %v1451_v32  ;;  %2555 = vmatpush.msrb.mxu2 %v1511_v33  ;;  %v1559_v54 = vld [vmem:[%s4159_s26 + $0xf08] sm:$0xff]  ;;  %v2190_v32 = vadd.f32 %v2189_v29, %v2170_v26  ;;  %v3699_v33 = vld [vmem:[#allocation2 + $0x30] sm:$0xff] }
 0x28b   : > { %2574 = vmatpush.msrb.mxu3 %v1579_v34  ;;  %2516 = vmatpush.msrb.mxu0 %v1379_v35  ;;  %v1359_v55 = vld [vmem:[%s4159_s26 + $0x8c8] sm:$0xff] }
 0x28c   : > { %2535 = vmatpush.msrb.mxu1 %v1447_v36  ;;  %2556 = vmatpush.msrb.mxu2 %v1507_v37  ;;  %v1427_v56 = vld [vmem:[%s4159_s26 + $0xae8] sm:$0xff]  ;;  %v2209_v37 = vpop.f32.mrf.mxu0 }
 0x28d   : > { %2575 = vmatpush.msrb.mxu3 %v1575_v38  ;;  %2517 = vmatpush.msrb.mxu0 %v1375_v39  ;;  %v1487_v59 = vld [vmem:[%s4159_s26 + $0xcc8] sm:$0xff] }
 0x28e   : > { %2536 = vmatpush.msrb.mxu1 %v1443_v40  ;;  %2557 = vmatpush.msrb.mxu2 %v1503_v41  ;;  %v1555_v60 = vld [vmem:[%s4159_s26 + $0xee8] sm:$0xff]  ;;  %v2210_v40 = vadd.f32 %v2209_v37, %v2190_v32  ;;  %v3701_v41 = vld [vmem:[#allocation2] sm:$0xff] }
 0x28f   : > { %2576 = vmatpush.msrb.mxu3 %v1571_v42  ;;  %2518 = vmatpush.msrb.mxu0 %v1371_v43  ;;  %v1355_v61 = vld [vmem:[%s4159_s26 + $0x8a8] sm:$0xff] }
 0x290   : > { %2537 = vmatpush.msrb.mxu1 %v1439_v44  ;;  %2558 = vmatpush.msrb.mxu2 %v1499_v45  ;;  %v1423_v62 = vld [vmem:[%s4159_s26 + $0xac8] sm:$0xff] }
 0x291   : > { %2577 = vmatpush.msrb.mxu3 %v1567_v46  ;;  %2519 = vmatpush.msrb.mxu0 %v1367_v47  ;;  %v1483_v63 = vld [vmem:[%s4159_s26 + $0xca8] sm:$0xff]  ;;  %v2229_v47 = vpop.f32.mrf.mxu1 }
 0x292   : > { %2538 = vmatpush.msrb.mxu1 %v1435_v48  ;;  %2559 = vmatpush.msrb.mxu2 %v1495_v49  ;;  %v1551_v0 = vld [vmem:[%s4159_s26 + $0xec8] sm:$0xff] }
 0x293   : > { %2578 = vmatpush.msrb.mxu3 %v1563_v50  ;;  %2520 = vmatpush.msrb.mxu0 %v1363_v51  ;;  %v1351_v2 = vld [vmem:[%s4159_s26 + $0x888] sm:$0xff]  ;;  %v2230_v50 = vadd.f32 %v2229_v47, %v2210_v40  ;;  %v2249_v51 = vpop.f32.mrf.mxu2 }
 0x294   : > { %2539 = vmatpush.msrb.mxu1 %v1431_v52  ;;  %2560 = vmatpush.msrb.mxu2 %v1491_v53  ;;  %v1419_v3 = vld [vmem:[%s4159_s26 + $0xaa8] sm:$0xff] }
 0x295   : > { %2579 = vmatpush.msrb.mxu3 %v1559_v54  ;;  %2521 = vmatpush.msrb.mxu0 %v1359_v55  ;;  %v1479_v4 = vld [vmem:[%s4159_s26 + $0xc88] sm:$0xff]  ;;  %v2250_v55 = vadd.f32 %v2249_v51, %v2230_v50 }
 0x296   : > { %2540 = vmatpush.msrb.mxu1 %v1427_v56  ;;  %2561 = vmatpush.msrb.mxu2 %v1487_v59  ;;  %v1547_v5 = vld [vmem:[%s4159_s26 + $0xea8] sm:$0xff]  ;;  %v2269_v59 = vpop.f32.mrf.mxu3 }
 0x297   : > { %2580 = vmatpush.msrb.mxu3 %v1555_v60  ;;  %2522 = vmatpush.msrb.mxu0 %v1355_v61  ;;  %v1347_v6 = vld [vmem:[%s4159_s26 + $0x868] sm:$0xff]  ;;  %v4603_v61 = vadd.f32 %v2269_v59, %v2250_v55  ;;  %v3708_v59 = vld [vmem:[#allocation2 + $0x10] sm:$0xff] }
 0x298   : > { %2541 = vmatpush.msrb.mxu1 %v1423_v62  ;;  %2562 = vmatpush.msrb.mxu2 %v1483_v63  ;;  %v1415_v7 = vld [vmem:[%s4159_s26 + $0xa88] sm:$0xff]  ;;  %v3703_v62 = vld [vmem:[#allocation2 + $0x8] sm:$0xff] }
 0x299   : > { %2581 = vmatpush.msrb.mxu3 %v1551_v0  ;;  %2523 = vmatpush.msrb.mxu0 %v1351_v2  ;;  %v1475_v9 = vld [vmem:[%s4159_s26 + $0xc68] sm:$0xff]  ;;  %v3704_v2 = vld [vmem:[#allocation2 + $0x50] sm:$0xff] }
 0x29a   : > { %2542 = vmatpush.msrb.mxu1 %v1419_v3  ;;  %v1543_v10 = vld [vmem:[%s4159_s26 + $0xe88] sm:$0xff]  ;;  %2563 = vmatpush.msrb.mxu2 %v1479_v4  ;;  %v3705_v4 = vld [vmem:[#allocation2 + $0x48] sm:$0xff] }
 0x29b   : > { %2582 = vmatpush.msrb.mxu3 %v1547_v5  ;;  %v1343_v12 = vld [vmem:[%s4159_s26 + $0x848] sm:$0xff]  ;;  %2524 = vmatpush.msrb.mxu0 %v1347_v6 }
 0x29c   : > { %v1411_v13 = vld [vmem:[%s4159_s26 + $0xa68] sm:$0xff]  ;;  %2543 = vmatpush.msrb.mxu1 %v1415_v7  ;;  %2564 = vmatpush.msrb.mxu2 %v1475_v9  ;;  %v3706_v9 = vld [vmem:[#allocation2 + $0x68] sm:$0xff] }
 0x29d   : > { %v1471_v14 = vld [vmem:[%s4159_s26 + $0xc48] sm:$0xff]  ;;  %2583 = vmatpush.msrb.mxu3 %v1543_v10  ;;  %2525 = vmatpush.msrb.mxu0 %v1343_v12 }
 0x29e   : > { %v1539_v15 = vld [vmem:[%s4159_s26 + $0xe68] sm:$0xff]  ;;  %2544 = vmatpush.msrb.mxu1 %v1411_v13  ;;  %2565 = vmatpush.msrb.mxu2 %v1471_v14 }
 0x29f   : > { %v1339_v17 = vld [vmem:[%s4159_s26 + $0x828] sm:$0xff]  ;;  %2584 = vmatpush.msrb.mxu3 %v1539_v15  ;;  %2448 = vmatmul.f32.vlgmr.msra.gmra.mxu0 %v3699_v33 }
 0x2a0   : > { %v1407_v18 = vld [vmem:[%s4159_s26 + $0xa48] sm:$0xff]  ;;  %2526 = vmatpush.msrb.mxu0 %v1339_v17  ;;  %2468 = vmatmul.f32.vlgmr.msra.gmra.mxu1 %v3701_v41 }
 0x2a1   : > { %v1467_v58 = vld [vmem:[%s4159_s26 + $0xc28] sm:$0xff]  ;;  %2545 = vmatpush.msrb.mxu1 %v1407_v18 }
 0x2a2   : > { %v1535_v20 = vld [vmem:[%s4159_s26 + $0xe48] sm:$0xff]  ;;  %2566 = vmatpush.msrb.mxu2 %v1467_v58 }
 0x2a3   : > { %v1335_v21 = vld [vmem:[%s4159_s26 + $0x808] sm:$0xff]  ;;  %2585 = vmatpush.msrb.mxu3 %v1535_v20 }
 0x2a4   : > { %v1403_v22 = vld [vmem:[%s4159_s26 + $0xa28] sm:$0xff]  ;;  %2527 = vmatpush.msrb.mxu0 %v1335_v21 }
 0x2a5   : > { %v1463_v24 = vld [vmem:[%s4159_s26 + $0xc08] sm:$0xff]  ;;  %2546 = vmatpush.msrb.mxu1 %v1403_v22  ;;  %v2329_v47 = vpop.f32.mrf.mxu2 }
 0x2a6   : > { %v1531_v25 = vld [vmem:[%s4159_s26 + $0xe28] sm:$0xff]  ;;  %2567 = vmatpush.msrb.mxu2 %v1463_v24 }
 0x2a7   : > { %v1651_v27 = vld [vmem:[%s4159_s26 + $0x11e8] sm:$0xff]  ;;  %2586 = vmatpush.msrb.mxu3 %v1531_v25  ;;  %2528 = vmatmul.f32.vlgmr.msrb.gmra.mxu0 %v3704_v2 }
 0x2a8   : > { %v1779_v28 = vld [vmem:[%s4159_s26 + $0x15e8] sm:$0xff]  ;;  %2592 = vmatpush.msra.mxu0 %v1651_v27 }
 0x2a9   : > { %v1399_v30 = vld [vmem:[%s4159_s26 + $0xa08] sm:$0xff] }
 0x2aa   : > { %v1527_v31 = vld [vmem:[%s4159_s26 + $0xe08] sm:$0xff]  ;;  %2547 = vmatpush.msrb.mxu1 %v1399_v30 }
 0x2ab   : > { %v3700_v34 = vld [vmem:[#allocation2 + $0x58] sm:$0xff]  ;;  %2587 = vmatpush.msrb.mxu3 %v1527_v31  ;;  %2548 = vmatmul.f32.vlgmr.msrb.gmra.mxu1 %v3706_v9  ;;  %v2289_v31 = vpop.f32.mrf.mxu0 }
 0x2ac   : > { %2488 = vmatmul.f32.vlgmr.msra.gmra.mxu2 %v3700_v34  ;;  %v1647_v35 = vld [vmem:[%s4159_s26 + $0x11c8] sm:$0xff]  ;;  %v2290_v34 = vadd.f32 %v2289_v31, %v4603_v61 }
 0x2ad   : > { %2632 = vmatpush.msra.mxu2 %v1779_v28  ;;  %v1715_v36 = vld [vmem:[%s4159_s26 + $0x13e8] sm:$0xff]  ;;  %2593 = vmatpush.msra.mxu0 %v1647_v35 }
 0x2ae   : > { %v1775_v38 = vld [vmem:[%s4159_s26 + $0x15c8] sm:$0xff]  ;;  %2612 = vmatpush.msra.mxu1 %v1715_v36 }
 0x2af   : > { %v1843_v39 = vld [vmem:[%s4159_s26 + $0x17e8] sm:$0xff]  ;;  %2633 = vmatpush.msra.mxu2 %v1775_v38 }
 0x2b0   : > { %v3702_v42 = vld [vmem:[#allocation2 + $0x18] sm:$0xff] }
 0x2b1   : > { %2508 = vmatmul.f32.vlgmr.msra.gmra.mxu3 %v3702_v42  ;;  %v1643_v43 = vld [vmem:[%s4159_s26 + $0x11a8] sm:$0xff] }
 0x2b2   : > { %v1711_v44 = vld [vmem:[%s4159_s26 + $0x13c8] sm:$0xff]  ;;  %2652 = vmatpush.msra.mxu3 %v1843_v39  ;;  %2594 = vmatpush.msra.mxu0 %v1643_v43  ;;  %v2309_v39 = vpop.f32.mrf.mxu1 }
 0x2b3   : > { %v1771_v45 = vld [vmem:[%s4159_s26 + $0x15a8] sm:$0xff]  ;;  %2613 = vmatpush.msra.mxu1 %v1711_v44  ;;  %v2310_v42 = vadd.f32 %v2309_v39, %v2290_v34 }
 0x2b4   : > { %v1839_v46 = vld [vmem:[%s4159_s26 + $0x17c8] sm:$0xff]  ;;  %2634 = vmatpush.msra.mxu2 %v1771_v45 }
 0x2b5   : > { %v1639_v48 = vld [vmem:[%s4159_s26 + $0x1188] sm:$0xff]  ;;  %2653 = vmatpush.msra.mxu3 %v1839_v46  ;;  %2568 = vmatmul.f32.vlgmr.msrb.gmra.mxu2 %v3703_v62  ;;  %v2330_v50 = vadd.f32 %v2329_v47, %v2310_v42 }
 0x2b6   : > { %v1707_v49 = vld [vmem:[%s4159_s26 + $0x13a8] sm:$0xff]  ;;  %2595 = vmatpush.msra.mxu0 %v1639_v48 }
 0x2b7   : > { %v1767_v52 = vld [vmem:[%s4159_s26 + $0x1588] sm:$0xff]  ;;  %2614 = vmatpush.msra.mxu1 %v1707_v49 }
 0x2b8   : > { %v1835_v53 = vld [vmem:[%s4159_s26 + $0x17a8] sm:$0xff]  ;;  %2635 = vmatpush.msra.mxu2 %v1767_v52 }
 0x2b9   : > { %v1635_v54 = vld [vmem:[%s4159_s26 + $0x1168] sm:$0xff]  ;;  %2654 = vmatpush.msra.mxu3 %v1835_v53  ;;  %v2349_v53 = vpop.f32.mrf.mxu3 }
 0x2ba   : > { %v1703_v56 = vld [vmem:[%s4159_s26 + $0x1388] sm:$0xff]  ;;  %2596 = vmatpush.msra.mxu0 %v1635_v54  ;;  %2588 = vmatmul.f32.vlgmr.msrb.gmra.mxu3 %v3705_v4 }
 0x2bb   : > { %v1763_v57 = vld [vmem:[%s4159_s26 + $0x1568] sm:$0xff]  ;;  %2615 = vmatpush.msra.mxu1 %v1703_v56  ;;  %v4654_v56 = vadd.f32 %v2349_v53, %v2330_v50 }
 0x2bc   : > { %v1831_v60 = vld [vmem:[%s4159_s26 + $0x1788] sm:$0xff]  ;;  %2636 = vmatpush.msra.mxu2 %v1763_v57  ;;  %v3707_v57 = vld [vmem:[#allocation2 + $0x40] sm:$0xff] }
 0x2bd   : > { %v1631_v63 = vld [vmem:[%s4159_s26 + $0x1148] sm:$0xff]  ;;  %2655 = vmatpush.msra.mxu3 %v1831_v60 }
 0x2be   : > { %v1699_v0 = vld [vmem:[%s4159_s26 + $0x1368] sm:$0xff]  ;;  %2597 = vmatpush.msra.mxu0 %v1631_v63 }
 0x2bf   : > { %v1759_v1 = vld [vmem:[%s4159_s26 + $0x1548] sm:$0xff]  ;;  %2616 = vmatpush.msra.mxu1 %v1699_v0  ;;  %v3709_v0 = vld [vmem:[#allocation2 + $0x20] sm:$0xff] }
 0x2c0   : > { %v1827_v3 = vld [vmem:[%s4159_s26 + $0x1768] sm:$0xff]  ;;  %2637 = vmatpush.msra.mxu2 %v1759_v1 }
 0x2c1   : > { %v1627_v5 = vld [vmem:[%s4159_s26 + $0x1128] sm:$0xff]  ;;  %2656 = vmatpush.msra.mxu3 %v1827_v3 }
 0x2c2   : > { %v1695_v6 = vld [vmem:[%s4159_s26 + $0x1348] sm:$0xff]  ;;  %2598 = vmatpush.msra.mxu0 %v1627_v5 }
 0x2c3   : > { %v1755_v7 = vld [vmem:[%s4159_s26 + $0x1528] sm:$0xff]  ;;  %2617 = vmatpush.msra.mxu1 %v1695_v6 }
 0x2c4   : > { %v1823_v8 = vld [vmem:[%s4159_s26 + $0x1748] sm:$0xff]  ;;  %2638 = vmatpush.msra.mxu2 %v1755_v7 }
 0x2c5   : > { %v1623_v10 = vld [vmem:[%s4159_s26 + $0x1108] sm:$0xff]  ;;  %2657 = vmatpush.msra.mxu3 %v1823_v8 }
 0x2c6   : > { %v1691_v11 = vld [vmem:[%s4159_s26 + $0x1328] sm:$0xff]  ;;  %2599 = vmatpush.msra.mxu0 %v1623_v10 }
 0x2c7   : > { %v1751_v12 = vld [vmem:[%s4159_s26 + $0x1508] sm:$0xff]  ;;  %2618 = vmatpush.msra.mxu1 %v1691_v11 }
 0x2c8   : > { %v1819_v13 = vld [vmem:[%s4159_s26 + $0x1728] sm:$0xff]  ;;  %2639 = vmatpush.msra.mxu2 %v1751_v12 }
 0x2c9   : > { %v1619_v14 = vld [vmem:[%s4159_s26 + $0x10e8] sm:$0xff]  ;;  %2658 = vmatpush.msra.mxu3 %v1819_v13 }
 0x2ca   : > { %v1687_v15 = vld [vmem:[%s4159_s26 + $0x1308] sm:$0xff]  ;;  %2600 = vmatpush.msra.mxu0 %v1619_v14 }
 0x2cb   : > { %v1747_v16 = vld [vmem:[%s4159_s26 + $0x14e8] sm:$0xff]  ;;  %2619 = vmatpush.msra.mxu1 %v1687_v15 }
 0x2cc   : > { %v1815_v17 = vld [vmem:[%s4159_s26 + $0x1708] sm:$0xff]  ;;  %2640 = vmatpush.msra.mxu2 %v1747_v16 }
 0x2cd   : > { %v1615_v18 = vld [vmem:[%s4159_s26 + $0x10c8] sm:$0xff]  ;;  %2659 = vmatpush.msra.mxu3 %v1815_v17 }
 0x2ce   : > { %v1683_v19 = vld [vmem:[%s4159_s26 + $0x12e8] sm:$0xff]  ;;  %2601 = vmatpush.msra.mxu0 %v1615_v18 }
 0x2cf   : > { %v1743_v58 = vld [vmem:[%s4159_s26 + $0x14c8] sm:$0xff]  ;;  %2620 = vmatpush.msra.mxu1 %v1683_v19 }
 0x2d0   : > { %v1811_v20 = vld [vmem:[%s4159_s26 + $0x16e8] sm:$0xff]  ;;  %2641 = vmatpush.msra.mxu2 %v1743_v58 }
 0x2d1   : > { %v1611_v21 = vld [vmem:[%s4159_s26 + $0x10a8] sm:$0xff]  ;;  %2660 = vmatpush.msra.mxu3 %v1811_v20 }
 0x2d2   : > { %v1679_v22 = vld [vmem:[%s4159_s26 + $0x12c8] sm:$0xff]  ;;  %2602 = vmatpush.msra.mxu0 %v1611_v21 }
 0x2d3   : > { %v1739_v23 = vld [vmem:[%s4159_s26 + $0x14a8] sm:$0xff]  ;;  %2621 = vmatpush.msra.mxu1 %v1679_v22 }
 0x2d4   : > { %v1807_v24 = vld [vmem:[%s4159_s26 + $0x16c8] sm:$0xff]  ;;  %2642 = vmatpush.msra.mxu2 %v1739_v23 }
 0x2d5   : > { %v1607_v25 = vld [vmem:[%s4159_s26 + $0x1088] sm:$0xff]  ;;  %2661 = vmatpush.msra.mxu3 %v1807_v24 }
 0x2d6   : > { %v1675_v26 = vld [vmem:[%s4159_s26 + $0x12a8] sm:$0xff]  ;;  %2603 = vmatpush.msra.mxu0 %v1607_v25 }
 0x2d7   : > { %v1735_v27 = vld [vmem:[%s4159_s26 + $0x1488] sm:$0xff]  ;;  %2622 = vmatpush.msra.mxu1 %v1675_v26 }
 0x2d8   : > { %v1803_v28 = vld [vmem:[%s4159_s26 + $0x16a8] sm:$0xff]  ;;  %2643 = vmatpush.msra.mxu2 %v1735_v27 }
 0x2d9   : > { %v1603_v29 = vld [vmem:[%s4159_s26 + $0x1068] sm:$0xff]  ;;  %2662 = vmatpush.msra.mxu3 %v1803_v28 }
 0x2da   : > { %v1671_v30 = vld [vmem:[%s4159_s26 + $0x1288] sm:$0xff]  ;;  %2604 = vmatpush.msra.mxu0 %v1603_v29 }
 0x2db   : > { %v1731_v32 = vld [vmem:[%s4159_s26 + $0x1468] sm:$0xff]  ;;  %2623 = vmatpush.msra.mxu1 %v1671_v30 }
 0x2dc   : > { %v1799_v33 = vld [vmem:[%s4159_s26 + $0x1688] sm:$0xff]  ;;  %2644 = vmatpush.msra.mxu2 %v1731_v32 }
 0x2dd   : > { %v1599_v35 = vld [vmem:[%s4159_s26 + $0x1048] sm:$0xff]  ;;  %2663 = vmatpush.msra.mxu3 %v1799_v33 }
 0x2de   : > { %v1667_v36 = vld [vmem:[%s4159_s26 + $0x1268] sm:$0xff]  ;;  %2605 = vmatpush.msra.mxu0 %v1599_v35 }
 0x2df   : > { %v1727_v37 = vld [vmem:[%s4159_s26 + $0x1448] sm:$0xff]  ;;  %2624 = vmatpush.msra.mxu1 %v1667_v36 }
 0x2e0   : > { %v1795_v38 = vld [vmem:[%s4159_s26 + $0x1668] sm:$0xff]  ;;  %2645 = vmatpush.msra.mxu2 %v1727_v37 }
 0x2e1   : > { %v1595_v40 = vld [vmem:[%s4159_s26 + $0x1028] sm:$0xff]  ;;  %2664 = vmatpush.msra.mxu3 %v1795_v38 }
 0x2e2   : > { %v1663_v41 = vld [vmem:[%s4159_s26 + $0x1248] sm:$0xff]  ;;  %2606 = vmatpush.msra.mxu0 %v1595_v40 }
 0x2e3   : > { %v1723_v43 = vld [vmem:[%s4159_s26 + $0x1428] sm:$0xff]  ;;  %2625 = vmatpush.msra.mxu1 %v1663_v41 }
 0x2e4   : > { %v1791_v44 = vld [vmem:[%s4159_s26 + $0x1648] sm:$0xff]  ;;  %2646 = vmatpush.msra.mxu2 %v1723_v43 }
 0x2e5   : > { %v1591_v45 = vld [vmem:[%s4159_s26 + $0x1008] sm:$0xff]  ;;  %2665 = vmatpush.msra.mxu3 %v1791_v44 }
 0x2e6   : > { %v1659_v46 = vld [vmem:[%s4159_s26 + $0x1228] sm:$0xff]  ;;  %2607 = vmatpush.msra.mxu0 %v1591_v45 }
 0x2e7   : > { %v1719_v48 = vld [vmem:[%s4159_s26 + $0x1408] sm:$0xff]  ;;  %2626 = vmatpush.msra.mxu1 %v1659_v46  ;;  %2608 = vmatmul.f32.vlgmr.msra.gmra.mxu0 %v3707_v57 }
 0x2e8   : > { %v1787_v49 = vld [vmem:[%s4159_s26 + $0x1628] sm:$0xff]  ;;  %2647 = vmatpush.msra.mxu2 %v1719_v48 }
 0x2e9   : > { %v1907_v51 = vld [vmem:[%s4159_s26 + $0x19e8] sm:$0xff]  ;;  %2666 = vmatpush.msra.mxu3 %v1787_v49  ;;  %2648 = vmatmul.f32.vlgmr.msra.gmra.mxu2 %v3708_v59  ;;  %v1140_v59 = vld [vmem:[%s4159_s26 + $0x1f0] sm:$0xff] }
 0x2ea   : > { %v2035_v52 = vld [vmem:[%s4159_s26 + $0x1de8] sm:$0xff]  ;;  %2672 = vmatpush.msrb.mxu0 %v1907_v51 }
 0x2eb   : > { %v1655_v54 = vld [vmem:[%s4159_s26 + $0x1208] sm:$0xff]  ;;  %2712 = vmatpush.msrb.mxu2 %v2035_v52 }
 0x2ec   : > { %v1783_v55 = vld [vmem:[%s4159_s26 + $0x1608] sm:$0xff]  ;;  %2627 = vmatpush.msra.mxu1 %v1655_v54 }
 0x2ed   : > { %v1903_v60 = vld [vmem:[%s4159_s26 + $0x19c8] sm:$0xff]  ;;  %2667 = vmatpush.msra.mxu3 %v1783_v55  ;;  %2628 = vmatmul.f32.vlgmr.msra.gmra.mxu1 %v3709_v0 }
 0x2ee   : > { %v1971_v61 = vld [vmem:[%s4159_s26 + $0x1be8] sm:$0xff]  ;;  %2673 = vmatpush.msrb.mxu0 %v1903_v60  ;;  %v1268_v60 = vld [vmem:[%s4159_s26 + $0x5f0] sm:$0xff] }
 0x2ef   : > { %v2031_v62 = vld [vmem:[%s4159_s26 + $0x1dc8] sm:$0xff]  ;;  %2692 = vmatpush.msrb.mxu1 %v1971_v61 }
 0x2f0   : > { %v2099_v63 = vld [vmem:[%s4159_s26 + $0x1fe8] sm:$0xff]  ;;  %2713 = vmatpush.msrb.mxu2 %v2031_v62 }
 0x2f1   : > { %v3710_v1 = vld [vmem:[#allocation2 + $0x38] sm:$0xff]  ;;  %2732 = vmatpush.msrb.mxu3 %v2099_v63  ;;  %v3711_v63 = vld [vmem:[#allocation2 + $0x60] sm:$0xff] }
 0x2f2   : > { %2668 = vmatmul.f32.vlgmr.msra.gmra.mxu3 %v3710_v1  ;;  %v1899_v2 = vld [vmem:[%s4159_s26 + $0x19a8] sm:$0xff]  ;;  %v1136_v1 = vld [vmem:[%s4159_s26 + $0x1d0] sm:$0xff] }
 0x2f3   : > { %v1967_v3 = vld [vmem:[%s4159_s26 + $0x1bc8] sm:$0xff]  ;;  %2674 = vmatpush.msrb.mxu0 %v1899_v2  ;;  %v1204_v2 = vld [vmem:[%s4159_s26 + $0x3f0] sm:$0xff] }
 0x2f4   : > { %v2027_v4 = vld [vmem:[%s4159_s26 + $0x1da8] sm:$0xff]  ;;  %2693 = vmatpush.msrb.mxu1 %v1967_v3  ;;  %v1264_v3 = vld [vmem:[%s4159_s26 + $0x5d0] sm:$0xff] }
 0x2f5   : > { %v2095_v5 = vld [vmem:[%s4159_s26 + $0x1fc8] sm:$0xff]  ;;  %2714 = vmatpush.msrb.mxu2 %v2027_v4  ;;  %v1332_v4 = vld [vmem:[%s4159_s26 + $0x7f0] sm:$0xff] }
 0x2f6   : > { %v1895_v6 = vld [vmem:[%s4159_s26 + $0x1988] sm:$0xff]  ;;  %2733 = vmatpush.msrb.mxu3 %v2095_v5  ;;  %v3713_v5 = vld [vmem:[#allocation2 + $0x70] sm:$0xff] }
 0x2f7   : > { %v1963_v7 = vld [vmem:[%s4159_s26 + $0x1ba8] sm:$0xff]  ;;  %2675 = vmatpush.msrb.mxu0 %v1895_v6  ;;  %v3714_v6 = vld [vmem:[#allocation2 + $0x28] sm:$0xff] }
 0x2f8   : > { %v2023_v8 = vld [vmem:[%s4159_s26 + $0x1d88] sm:$0xff]  ;;  %2694 = vmatpush.msrb.mxu1 %v1963_v7  ;;  %v1132_v7 = vld [vmem:[%s4159_s26 + $0x1b0] sm:$0xff] }
 0x2f9   : > { %v2091_v9 = vld [vmem:[%s4159_s26 + $0x1fa8] sm:$0xff]  ;;  %2715 = vmatpush.msrb.mxu2 %v2023_v8  ;;  %v1200_v8 = vld [vmem:[%s4159_s26 + $0x3d0] sm:$0xff] }
 0x2fa   : > { %v1891_v10 = vld [vmem:[%s4159_s26 + $0x1968] sm:$0xff]  ;;  %2734 = vmatpush.msrb.mxu3 %v2091_v9  ;;  %v1260_v9 = vld [vmem:[%s4159_s26 + $0x5b0] sm:$0xff] }
 0x2fb   : > { %v1959_v11 = vld [vmem:[%s4159_s26 + $0x1b88] sm:$0xff]  ;;  %2676 = vmatpush.msrb.mxu0 %v1891_v10  ;;  %v1328_v10 = vld [vmem:[%s4159_s26 + $0x7d0] sm:$0xff] }
 0x2fc   : > { %v2019_v12 = vld [vmem:[%s4159_s26 + $0x1d68] sm:$0xff]  ;;  %2695 = vmatpush.msrb.mxu1 %v1959_v11  ;;  %v1128_v11 = vld [vmem:[%s4159_s26 + $0x190] sm:$0xff] }
 0x2fd   : > { %v2087_v13 = vld [vmem:[%s4159_s26 + $0x1f88] sm:$0xff]  ;;  %2716 = vmatpush.msrb.mxu2 %v2019_v12  ;;  %v1196_v12 = vld [vmem:[%s4159_s26 + $0x3b0] sm:$0xff] }
 0x2fe   : > { %v1887_v14 = vld [vmem:[%s4159_s26 + $0x1948] sm:$0xff]  ;;  %2735 = vmatpush.msrb.mxu3 %v2087_v13  ;;  %v1256_v13 = vld [vmem:[%s4159_s26 + $0x590] sm:$0xff] }
 0x2ff   : > { %v1955_v15 = vld [vmem:[%s4159_s26 + $0x1b68] sm:$0xff]  ;;  %2677 = vmatpush.msrb.mxu0 %v1887_v14  ;;  %v1324_v14 = vld [vmem:[%s4159_s26 + $0x7b0] sm:$0xff] }
 0x300   : > { %v2015_v16 = vld [vmem:[%s4159_s26 + $0x1d48] sm:$0xff]  ;;  %2696 = vmatpush.msrb.mxu1 %v1955_v15  ;;  %v1124_v15 = vld [vmem:[%s4159_s26 + $0x170] sm:$0xff] }
 0x301   : > { %v2083_v17 = vld [vmem:[%s4159_s26 + $0x1f68] sm:$0xff]  ;;  %2717 = vmatpush.msrb.mxu2 %v2015_v16  ;;  %v1192_v16 = vld [vmem:[%s4159_s26 + $0x390] sm:$0xff] }
 0x302   : > { %v1883_v18 = vld [vmem:[%s4159_s26 + $0x1928] sm:$0xff]  ;;  %2736 = vmatpush.msrb.mxu3 %v2083_v17  ;;  %v1252_v17 = vld [vmem:[%s4159_s26 + $0x570] sm:$0xff] }
 0x303   : > { %v1951_v19 = vld [vmem:[%s4159_s26 + $0x1b48] sm:$0xff]  ;;  %2678 = vmatpush.msrb.mxu0 %v1883_v18  ;;  %v1320_v18 = vld [vmem:[%s4159_s26 + $0x790] sm:$0xff] }
 0x304   : > { %v2011_v58 = vld [vmem:[%s4159_s26 + $0x1d28] sm:$0xff]  ;;  %2697 = vmatpush.msrb.mxu1 %v1951_v19  ;;  %v1120_v19 = vld [vmem:[%s4159_s26 + $0x150] sm:$0xff] }
 0x305   : > { %v2079_v20 = vld [vmem:[%s4159_s26 + $0x1f48] sm:$0xff]  ;;  %2718 = vmatpush.msrb.mxu2 %v2011_v58  ;;  %v1188_v58 = vld [vmem:[%s4159_s26 + $0x370] sm:$0xff] }
 0x306   : > { %v1879_v21 = vld [vmem:[%s4159_s26 + $0x1908] sm:$0xff]  ;;  %2737 = vmatpush.msrb.mxu3 %v2079_v20  ;;  %v1248_v20 = vld [vmem:[%s4159_s26 + $0x550] sm:$0xff] }
 0x307   : > { %v1947_v22 = vld [vmem:[%s4159_s26 + $0x1b28] sm:$0xff]  ;;  %2679 = vmatpush.msrb.mxu0 %v1879_v21  ;;  %v1316_v21 = vld [vmem:[%s4159_s26 + $0x770] sm:$0xff] }
 0x308   : > { %v2007_v23 = vld [vmem:[%s4159_s26 + $0x1d08] sm:$0xff]  ;;  %2698 = vmatpush.msrb.mxu1 %v1947_v22  ;;  %v1116_v22 = vld [vmem:[%s4159_s26 + $0x130] sm:$0xff] }
 0x309   : > { %v2075_v24 = vld [vmem:[%s4159_s26 + $0x1f28] sm:$0xff]  ;;  %2719 = vmatpush.msrb.mxu2 %v2007_v23  ;;  %v1184_v23 = vld [vmem:[%s4159_s26 + $0x350] sm:$0xff] }
 0x30a   : > { %v1875_v25 = vld [vmem:[%s4159_s26 + $0x18e8] sm:$0xff]  ;;  %2738 = vmatpush.msrb.mxu3 %v2075_v24  ;;  %v1244_v24 = vld [vmem:[%s4159_s26 + $0x530] sm:$0xff] }
 0x30b   : > { %v1943_v26 = vld [vmem:[%s4159_s26 + $0x1b08] sm:$0xff]  ;;  %2680 = vmatpush.msrb.mxu0 %v1875_v25  ;;  %v1312_v25 = vld [vmem:[%s4159_s26 + $0x750] sm:$0xff] }
 0x30c   : > { %v2003_v27 = vld [vmem:[%s4159_s26 + $0x1ce8] sm:$0xff]  ;;  %2699 = vmatpush.msrb.mxu1 %v1943_v26  ;;  %v1112_v26 = vld [vmem:[%s4159_s26 + $0x110] sm:$0xff] }
 0x30d   : > { %v2071_v28 = vld [vmem:[%s4159_s26 + $0x1f08] sm:$0xff]  ;;  %2720 = vmatpush.msrb.mxu2 %v2003_v27  ;;  %v1180_v27 = vld [vmem:[%s4159_s26 + $0x330] sm:$0xff] }
 0x30e   : > { %v1871_v29 = vld [vmem:[%s4159_s26 + $0x18c8] sm:$0xff]  ;;  %2739 = vmatpush.msrb.mxu3 %v2071_v28  ;;  %v1240_v28 = vld [vmem:[%s4159_s26 + $0x510] sm:$0xff] }
 0x30f   : > { %v1939_v30 = vld [vmem:[%s4159_s26 + $0x1ae8] sm:$0xff]  ;;  %2681 = vmatpush.msrb.mxu0 %v1871_v29  ;;  %v1308_v29 = vld [vmem:[%s4159_s26 + $0x730] sm:$0xff] }
 0x310   : > { %v1999_v31 = vld [vmem:[%s4159_s26 + $0x1cc8] sm:$0xff]  ;;  %2700 = vmatpush.msrb.mxu1 %v1939_v30  ;;  %v1108_v30 = vld [vmem:[%s4159_s26 + $0xf0] sm:$0xff] }
 0x311   : > { %v2067_v32 = vld [vmem:[%s4159_s26 + $0x1ee8] sm:$0xff]  ;;  %2721 = vmatpush.msrb.mxu2 %v1999_v31  ;;  %v1176_v31 = vld [vmem:[%s4159_s26 + $0x310] sm:$0xff] }
 0x312   : > { %v1867_v33 = vld [vmem:[%s4159_s26 + $0x18a8] sm:$0xff]  ;;  %2740 = vmatpush.msrb.mxu3 %v2067_v32  ;;  %v1236_v32 = vld [vmem:[%s4159_s26 + $0x4f0] sm:$0xff] }
 0x313   : > { %v1935_v34 = vld [vmem:[%s4159_s26 + $0x1ac8] sm:$0xff]  ;;  %2682 = vmatpush.msrb.mxu0 %v1867_v33  ;;  %v1304_v33 = vld [vmem:[%s4159_s26 + $0x710] sm:$0xff] }
 0x314   : > { %v1995_v35 = vld [vmem:[%s4159_s26 + $0x1ca8] sm:$0xff]  ;;  %2701 = vmatpush.msrb.mxu1 %v1935_v34  ;;  %v1104_v34 = vld [vmem:[%s4159_s26 + $0xd0] sm:$0xff] }
 0x315   : > { %v2063_v36 = vld [vmem:[%s4159_s26 + $0x1ec8] sm:$0xff]  ;;  %2722 = vmatpush.msrb.mxu2 %v1995_v35  ;;  %v1172_v35 = vld [vmem:[%s4159_s26 + $0x2f0] sm:$0xff] }
 0x316   : > { %v1863_v37 = vld [vmem:[%s4159_s26 + $0x1888] sm:$0xff]  ;;  %2741 = vmatpush.msrb.mxu3 %v2063_v36  ;;  %v1232_v36 = vld [vmem:[%s4159_s26 + $0x4d0] sm:$0xff] }
 0x317   : > { %v1931_v38 = vld [vmem:[%s4159_s26 + $0x1aa8] sm:$0xff]  ;;  %2683 = vmatpush.msrb.mxu0 %v1863_v37  ;;  %v1300_v37 = vld [vmem:[%s4159_s26 + $0x6f0] sm:$0xff] }
 0x318   : > { %v1991_v39 = vld [vmem:[%s4159_s26 + $0x1c88] sm:$0xff]  ;;  %2702 = vmatpush.msrb.mxu1 %v1931_v38  ;;  %v1100_v38 = vld [vmem:[%s4159_s26 + $0xb0] sm:$0xff] }
 0x319   : > { %v2059_v40 = vld [vmem:[%s4159_s26 + $0x1ea8] sm:$0xff]  ;;  %2723 = vmatpush.msrb.mxu2 %v1991_v39  ;;  %v1168_v39 = vld [vmem:[%s4159_s26 + $0x2d0] sm:$0xff] }
 0x31a   : > { %v1859_v41 = vld [vmem:[%s4159_s26 + $0x1868] sm:$0xff]  ;;  %2742 = vmatpush.msrb.mxu3 %v2059_v40  ;;  %v1228_v40 = vld [vmem:[%s4159_s26 + $0x4b0] sm:$0xff] }
 0x31b   : > { %v1927_v42 = vld [vmem:[%s4159_s26 + $0x1a88] sm:$0xff]  ;;  %2684 = vmatpush.msrb.mxu0 %v1859_v41  ;;  %v1296_v41 = vld [vmem:[%s4159_s26 + $0x6d0] sm:$0xff] }
 0x31c   : > { %v1987_v43 = vld [vmem:[%s4159_s26 + $0x1c68] sm:$0xff]  ;;  %2703 = vmatpush.msrb.mxu1 %v1927_v42  ;;  %v1096_v42 = vld [vmem:[%s4159_s26 + $0x90] sm:$0xff] }
 0x31d   : > { %v2055_v44 = vld [vmem:[%s4159_s26 + $0x1e88] sm:$0xff]  ;;  %2724 = vmatpush.msrb.mxu2 %v1987_v43  ;;  %v1164_v43 = vld [vmem:[%s4159_s26 + $0x2b0] sm:$0xff] }
 0x31e   : > { %v1855_v45 = vld [vmem:[%s4159_s26 + $0x1848] sm:$0xff]  ;;  %2743 = vmatpush.msrb.mxu3 %v2055_v44  ;;  %v1224_v44 = vld [vmem:[%s4159_s26 + $0x490] sm:$0xff] }
 0x31f   : > { %v1923_v46 = vld [vmem:[%s4159_s26 + $0x1a68] sm:$0xff]  ;;  %2685 = vmatpush.msrb.mxu0 %v1855_v45  ;;  %v1292_v45 = vld [vmem:[%s4159_s26 + $0x6b0] sm:$0xff] }
 0x320   : > { %v1983_v47 = vld [vmem:[%s4159_s26 + $0x1c48] sm:$0xff]  ;;  %2704 = vmatpush.msrb.mxu1 %v1923_v46  ;;  %v1092_v46 = vld [vmem:[%s4159_s26 + $0x70] sm:$0xff] }
 0x321   : > { %v2051_v48 = vld [vmem:[%s4159_s26 + $0x1e68] sm:$0xff]  ;;  %2725 = vmatpush.msrb.mxu2 %v1983_v47  ;;  %v1160_v47 = vld [vmem:[%s4159_s26 + $0x290] sm:$0xff] }
 0x322   : > { %v1851_v49 = vld [vmem:[%s4159_s26 + $0x1828] sm:$0xff]  ;;  %2744 = vmatpush.msrb.mxu3 %v2051_v48  ;;  %v1220_v48 = vld [vmem:[%s4159_s26 + $0x470] sm:$0xff] }
 0x323   : > { %v1919_v50 = vld [vmem:[%s4159_s26 + $0x1a48] sm:$0xff]  ;;  %2686 = vmatpush.msrb.mxu0 %v1851_v49  ;;  %v1288_v49 = vld [vmem:[%s4159_s26 + $0x690] sm:$0xff] }
 0x324   : > { %v1979_v51 = vld [vmem:[%s4159_s26 + $0x1c28] sm:$0xff]  ;;  %2705 = vmatpush.msrb.mxu1 %v1919_v50  ;;  %v1088_v50 = vld [vmem:[%s4159_s26 + $0x50] sm:$0xff] }
 0x325   : > { %v2047_v52 = vld [vmem:[%s4159_s26 + $0x1e48] sm:$0xff]  ;;  %2726 = vmatpush.msrb.mxu2 %v1979_v51  ;;  %v1156_v51 = vld [vmem:[%s4159_s26 + $0x270] sm:$0xff] }
 0x326   : > { %v1847_v53 = vld [vmem:[%s4159_s26 + $0x1808] sm:$0xff]  ;;  %2745 = vmatpush.msrb.mxu3 %v2047_v52  ;;  %v1216_v52 = vld [vmem:[%s4159_s26 + $0x450] sm:$0xff] }
 0x327   : > { %v1915_v54 = vld [vmem:[%s4159_s26 + $0x1a28] sm:$0xff]  ;;  %2687 = vmatpush.msrb.mxu0 %v1847_v53  ;;  %v1284_v53 = vld [vmem:[%s4159_s26 + $0x670] sm:$0xff] }
 0x328   : > { %v1975_v55 = vld [vmem:[%s4159_s26 + $0x1c08] sm:$0xff]  ;;  %2706 = vmatpush.msrb.mxu1 %v1915_v54  ;;  %2688 = vmatmul.f32.vlgmr.msrb.gmra.mxu0 %v3711_v63  ;;  %v1084_v54 = vld [vmem:[%s4159_s26 + $0x30] sm:$0xff] }
 0x329   : > { %v2043_v57 = vld [vmem:[%s4159_s26 + $0x1e28] sm:$0xff]  ;;  %2727 = vmatpush.msrb.mxu2 %v1975_v55  ;;  %2752 = vmatpush.msra.mxu0 %v1140_v59  ;;  %v1152_v55 = vld [vmem:[%s4159_s26 + $0x250] sm:$0xff] }
 0x32a   : > { %2746 = vmatpush.msrb.mxu3 %v2043_v57  ;;  %v1911_v61 = vld [vmem:[%s4159_s26 + $0x1a08] sm:$0xff]  ;;  %v1212_v57 = vld [vmem:[%s4159_s26 + $0x430] sm:$0xff] }
 0x32b   : > { %v2039_v62 = vld [vmem:[%s4159_s26 + $0x1e08] sm:$0xff]  ;;  %2792 = vmatpush.msra.mxu2 %v1268_v60  ;;  %2707 = vmatpush.msrb.mxu1 %v1911_v61  ;;  %v1280_v59 = vld [vmem:[%s4159_s26 + $0x650] sm:$0xff] }
 0x32c   : > { %v3712_v0 = vld [vmem:[#allocation2 + $0x78] sm:$0xff]  ;;  %2747 = vmatpush.msrb.mxu3 %v2039_v62  ;;  %2708 = vmatmul.f32.vlgmr.msrb.gmra.mxu1 %v3713_v5  ;;  %v1080_v60 = vld [vmem:[%s4159_s26 + $0x10] sm:$0xff] }
 0x32d   : > { %2728 = vmatmul.f32.vlgmr.msrb.gmra.mxu2 %v3712_v0  ;;  %2748 = vmatmul.f32.vlgmr.msrb.gmra.mxu3 %v3714_v6  ;;  %v1148_v61 = vld [vmem:[%s4159_s26 + $0x230] sm:$0xff] }
 0x32e   : > { %2753 = vmatpush.msra.mxu0 %v1136_v1  ;;  %2772 = vmatpush.msra.mxu1 %v1204_v2  ;;  %v1208_v62 = vld [vmem:[%s4159_s26 + $0x410] sm:$0xff] }
 0x32f   : > { %2793 = vmatpush.msra.mxu2 %v1264_v3  ;;  %2812 = vmatpush.msra.mxu3 %v1332_v4  ;;  %v1276_v63 = vld [vmem:[%s4159_s26 + $0x630] sm:$0xff] }
 0x330   : > { %2754 = vmatpush.msra.mxu0 %v1132_v7  ;;  %2773 = vmatpush.msra.mxu1 %v1200_v8  ;;  %v1396_v0 = vld [vmem:[%s4159_s26 + $0x9f0] sm:$0xff] }
 0x331   : > { %2794 = vmatpush.msra.mxu2 %v1260_v9  ;;  %2813 = vmatpush.msra.mxu3 %v1328_v10  ;;  %v1524_v1 = vld [vmem:[%s4159_s26 + $0xdf0] sm:$0xff] }
 0x332   : > { %2755 = vmatpush.msra.mxu0 %v1128_v11  ;;  %2774 = vmatpush.msra.mxu1 %v1196_v12  ;;  %v1144_v2 = vld [vmem:[%s4159_s26 + $0x210] sm:$0xff] }
 0x333   : > { %2795 = vmatpush.msra.mxu2 %v1256_v13  ;;  %2814 = vmatpush.msra.mxu3 %v1324_v14  ;;  %v1272_v3 = vld [vmem:[%s4159_s26 + $0x610] sm:$0xff] }
 0x334   : > { %2756 = vmatpush.msra.mxu0 %v1124_v15  ;;  %2775 = vmatpush.msra.mxu1 %v1192_v16  ;;  %v1392_v4 = vld [vmem:[%s4159_s26 + $0x9d0] sm:$0xff] }
 0x335   : > { %2796 = vmatpush.msra.mxu2 %v1252_v17  ;;  %2815 = vmatpush.msra.mxu3 %v1320_v18  ;;  %v1460_v5 = vld [vmem:[%s4159_s26 + $0xbf0] sm:$0xff] }
 0x336   : > { %2757 = vmatpush.msra.mxu0 %v1120_v19  ;;  %2776 = vmatpush.msra.mxu1 %v1188_v58  ;;  %v1520_v6 = vld [vmem:[%s4159_s26 + $0xdd0] sm:$0xff] }
 0x337   : > { %2797 = vmatpush.msra.mxu2 %v1248_v20  ;;  %2816 = vmatpush.msra.mxu3 %v1316_v21  ;;  %v1588_v7 = vld [vmem:[%s4159_s26 + $0xff0] sm:$0xff] }
 0x338   : > { %2758 = vmatpush.msra.mxu0 %v1116_v22  ;;  %2777 = vmatpush.msra.mxu1 %v1184_v23  ;;  %v1388_v8 = vld [vmem:[%s4159_s26 + $0x9b0] sm:$0xff] }
 0x339   : > { %2798 = vmatpush.msra.mxu2 %v1244_v24  ;;  %2817 = vmatpush.msra.mxu3 %v1312_v25  ;;  %v1456_v9 = vld [vmem:[%s4159_s26 + $0xbd0] sm:$0xff] }
 0x33a   : > { %2759 = vmatpush.msra.mxu0 %v1112_v26  ;;  %2778 = vmatpush.msra.mxu1 %v1180_v27  ;;  %v1516_v10 = vld [vmem:[%s4159_s26 + $0xdb0] sm:$0xff] }
 0x33b   : > { %2799 = vmatpush.msra.mxu2 %v1240_v28  ;;  %2818 = vmatpush.msra.mxu3 %v1308_v29  ;;  %v1584_v11 = vld [vmem:[%s4159_s26 + $0xfd0] sm:$0xff] }
 0x33c   : > { %2760 = vmatpush.msra.mxu0 %v1108_v30  ;;  %2779 = vmatpush.msra.mxu1 %v1176_v31  ;;  %v1384_v12 = vld [vmem:[%s4159_s26 + $0x990] sm:$0xff] }
 0x33d   : > { %2800 = vmatpush.msra.mxu2 %v1236_v32  ;;  %2819 = vmatpush.msra.mxu3 %v1304_v33  ;;  %v1452_v13 = vld [vmem:[%s4159_s26 + $0xbb0] sm:$0xff] }
 0x33e   : > { %2761 = vmatpush.msra.mxu0 %v1104_v34  ;;  %2780 = vmatpush.msra.mxu1 %v1172_v35  ;;  %v1512_v14 = vld [vmem:[%s4159_s26 + $0xd90] sm:$0xff] }
 0x33f   : > { %2801 = vmatpush.msra.mxu2 %v1232_v36  ;;  %2820 = vmatpush.msra.mxu3 %v1300_v37  ;;  %v1580_v15 = vld [vmem:[%s4159_s26 + $0xfb0] sm:$0xff] }
 0x340   : > { %2762 = vmatpush.msra.mxu0 %v1100_v38  ;;  %2781 = vmatpush.msra.mxu1 %v1168_v39  ;;  %v1380_v16 = vld [vmem:[%s4159_s26 + $0x970] sm:$0xff] }
 0x341   : > { %2802 = vmatpush.msra.mxu2 %v1228_v40  ;;  %2821 = vmatpush.msra.mxu3 %v1296_v41  ;;  %v1448_v17 = vld [vmem:[%s4159_s26 + $0xb90] sm:$0xff] }
 0x342   : > { %2763 = vmatpush.msra.mxu0 %v1096_v42  ;;  %2782 = vmatpush.msra.mxu1 %v1164_v43  ;;  %v1508_v18 = vld [vmem:[%s4159_s26 + $0xd70] sm:$0xff] }
 0x343   : > { %2803 = vmatpush.msra.mxu2 %v1224_v44  ;;  %2822 = vmatpush.msra.mxu3 %v1292_v45  ;;  %v1576_v19 = vld [vmem:[%s4159_s26 + $0xf90] sm:$0xff] }
 0x344   : > { %2764 = vmatpush.msra.mxu0 %v1092_v46  ;;  %2783 = vmatpush.msra.mxu1 %v1160_v47  ;;  %v1376_v58 = vld [vmem:[%s4159_s26 + $0x950] sm:$0xff] }
 0x345   : > { %2804 = vmatpush.msra.mxu2 %v1220_v48  ;;  %2823 = vmatpush.msra.mxu3 %v1288_v49  ;;  %v1444_v20 = vld [vmem:[%s4159_s26 + $0xb70] sm:$0xff] }
 0x346   : > { %2765 = vmatpush.msra.mxu0 %v1088_v50  ;;  %2784 = vmatpush.msra.mxu1 %v1156_v51  ;;  %v1504_v21 = vld [vmem:[%s4159_s26 + $0xd50] sm:$0xff] }
 0x347   : > { %2805 = vmatpush.msra.mxu2 %v1216_v52  ;;  %2824 = vmatpush.msra.mxu3 %v1284_v53  ;;  %v1572_v22 = vld [vmem:[%s4159_s26 + $0xf70] sm:$0xff] }
 0x348   : > { %2766 = vmatpush.msra.mxu0 %v1084_v54  ;;  %2785 = vmatpush.msra.mxu1 %v1152_v55  ;;  %v1372_v23 = vld [vmem:[%s4159_s26 + $0x930] sm:$0xff] }
 0x349   : > { %2806 = vmatpush.msra.mxu2 %v1212_v57  ;;  %2825 = vmatpush.msra.mxu3 %v1280_v59  ;;  %v1440_v24 = vld [vmem:[%s4159_s26 + $0xb50] sm:$0xff] }
 0x34a   : > { %2767 = vmatpush.msra.mxu0 %v1080_v60  ;;  %2786 = vmatpush.msra.mxu1 %v1148_v61  ;;  %v1500_v25 = vld [vmem:[%s4159_s26 + $0xd30] sm:$0xff] }
 0x34b   : > { %2807 = vmatpush.msra.mxu2 %v1208_v62  ;;  %2826 = vmatpush.msra.mxu3 %v1276_v63  ;;  %v1568_v26 = vld [vmem:[%s4159_s26 + $0xf50] sm:$0xff] }
 0x34c   : > { %2832 = vmatpush.msrb.mxu0 %v1396_v0  ;;  %2787 = vmatpush.msra.mxu1 %v1144_v2  ;;  %v1368_v27 = vld [vmem:[%s4159_s26 + $0x910] sm:$0xff] }
 0x34d   : > { %2872 = vmatpush.msrb.mxu2 %v1524_v1  ;;  %2827 = vmatpush.msra.mxu3 %v1272_v3  ;;  %v1436_v28 = vld [vmem:[%s4159_s26 + $0xb30] sm:$0xff] }
 0x34e   : > { %2833 = vmatpush.msrb.mxu0 %v1392_v4  ;;  %2852 = vmatpush.msrb.mxu1 %v1460_v5  ;;  %v1496_v29 = vld [vmem:[%s4159_s26 + $0xd10] sm:$0xff]  ;;  %v3715_v5 = vld [vmem:[#allocation2 + $0x30] sm:$0xff] }
 0x34f   : > { %2873 = vmatpush.msrb.mxu2 %v1520_v6  ;;  %2892 = vmatpush.msrb.mxu3 %v1588_v7  ;;  %v1564_v30 = vld [vmem:[%s4159_s26 + $0xf30] sm:$0xff]  ;;  %v3716_v6 = vld [vmem:[#allocation2 + $0x58] sm:$0xff] }
 0x350   : > { %2834 = vmatpush.msrb.mxu0 %v1388_v8  ;;  %2853 = vmatpush.msrb.mxu1 %v1456_v9  ;;  %v1364_v31 = vld [vmem:[%s4159_s26 + $0x8f0] sm:$0xff] }
 0x351   : > { %2874 = vmatpush.msrb.mxu2 %v1516_v10  ;;  %2893 = vmatpush.msrb.mxu3 %v1584_v11  ;;  %v1432_v32 = vld [vmem:[%s4159_s26 + $0xb10] sm:$0xff] }
 0x352   : > { %2835 = vmatpush.msrb.mxu0 %v1384_v12  ;;  %2854 = vmatpush.msrb.mxu1 %v1452_v13  ;;  %v1492_v33 = vld [vmem:[%s4159_s26 + $0xcf0] sm:$0xff]  ;;  %v3718_v12 = vld [vmem:[#allocation2 + $0x18] sm:$0xff] }
 0x353   : > { %2875 = vmatpush.msrb.mxu2 %v1512_v14  ;;  %2894 = vmatpush.msrb.mxu3 %v1580_v15  ;;  %v1560_v34 = vld [vmem:[%s4159_s26 + $0xf10] sm:$0xff] }
 0x354   : > { %2836 = vmatpush.msrb.mxu0 %v1380_v16  ;;  %2855 = vmatpush.msrb.mxu1 %v1448_v17  ;;  %v1360_v35 = vld [vmem:[%s4159_s26 + $0x8d0] sm:$0xff] }
 0x355   : > { %2876 = vmatpush.msrb.mxu2 %v1508_v18  ;;  %2895 = vmatpush.msrb.mxu3 %v1576_v19  ;;  %v1428_v36 = vld [vmem:[%s4159_s26 + $0xaf0] sm:$0xff] }
 0x356   : > { %2837 = vmatpush.msrb.mxu0 %v1376_v58  ;;  %2856 = vmatpush.msrb.mxu1 %v1444_v20  ;;  %v1488_v37 = vld [vmem:[%s4159_s26 + $0xcd0] sm:$0xff] }
 0x357   : > { %2877 = vmatpush.msrb.mxu2 %v1504_v21  ;;  %2896 = vmatpush.msrb.mxu3 %v1572_v22  ;;  %v1556_v38 = vld [vmem:[%s4159_s26 + $0xef0] sm:$0xff] }
 0x358   : > { %2838 = vmatpush.msrb.mxu0 %v1372_v23  ;;  %2857 = vmatpush.msrb.mxu1 %v1440_v24  ;;  %v1356_v39 = vld [vmem:[%s4159_s26 + $0x8b0] sm:$0xff]  ;;  %v3719_v24 = vld [vmem:[#allocation2 + $0x8] sm:$0xff] }
 0x359   : > { %2878 = vmatpush.msrb.mxu2 %v1500_v25  ;;  %2897 = vmatpush.msrb.mxu3 %v1568_v26  ;;  %v1424_v40 = vld [vmem:[%s4159_s26 + $0xad0] sm:$0xff] }
 0x35a   : > { %2839 = vmatpush.msrb.mxu0 %v1368_v27  ;;  %2858 = vmatpush.msrb.mxu1 %v1436_v28  ;;  %v1484_v41 = vld [vmem:[%s4159_s26 + $0xcb0] sm:$0xff]  ;;  %v3720_v28 = vld [vmem:[#allocation2 + $0x50] sm:$0xff] }
 0x35b   : > { %2879 = vmatpush.msrb.mxu2 %v1496_v29  ;;  %2898 = vmatpush.msrb.mxu3 %v1564_v30  ;;  %v1552_v42 = vld [vmem:[%s4159_s26 + $0xed0] sm:$0xff]  ;;  %v3721_v30 = vld [vmem:[#allocation2 + $0x48] sm:$0xff] }
 0x35c   : > { %2840 = vmatpush.msrb.mxu0 %v1364_v31  ;;  %2859 = vmatpush.msrb.mxu1 %v1432_v32  ;;  %v1352_v43 = vld [vmem:[%s4159_s26 + $0x890] sm:$0xff] }
 0x35d   : > { %2880 = vmatpush.msrb.mxu2 %v1492_v33  ;;  %2899 = vmatpush.msrb.mxu3 %v1560_v34  ;;  %v1420_v44 = vld [vmem:[%s4159_s26 + $0xab0] sm:$0xff] }
 0x35e   : > { %2841 = vmatpush.msrb.mxu0 %v1360_v35  ;;  %2860 = vmatpush.msrb.mxu1 %v1428_v36  ;;  %v1480_v45 = vld [vmem:[%s4159_s26 + $0xc90] sm:$0xff]  ;;  %v3722_v35 = vld [vmem:[#allocation2 + $0x68] sm:$0xff] }
 0x35f   : > { %2881 = vmatpush.msrb.mxu2 %v1488_v37  ;;  %2900 = vmatpush.msrb.mxu3 %v1556_v38  ;;  %v1548_v46 = vld [vmem:[%s4159_s26 + $0xeb0] sm:$0xff] }
 0x360   : > { %2842 = vmatpush.msrb.mxu0 %v1356_v39  ;;  %2861 = vmatpush.msrb.mxu1 %v1424_v40  ;;  %v1348_v47 = vld [vmem:[%s4159_s26 + $0x870] sm:$0xff] }
 0x361   : > { %2882 = vmatpush.msrb.mxu2 %v1484_v41  ;;  %2901 = vmatpush.msrb.mxu3 %v1552_v42  ;;  %v1416_v48 = vld [vmem:[%s4159_s26 + $0xa90] sm:$0xff] }
 0x362   : > { %2843 = vmatpush.msrb.mxu0 %v1352_v43  ;;  %2862 = vmatpush.msrb.mxu1 %v1420_v44  ;;  %v1476_v49 = vld [vmem:[%s4159_s26 + $0xc70] sm:$0xff] }
 0x363   : > { %v1544_v50 = vld [vmem:[%s4159_s26 + $0xe90] sm:$0xff]  ;;  %2883 = vmatpush.msrb.mxu2 %v1480_v45  ;;  %2902 = vmatpush.msrb.mxu3 %v1548_v46 }
 0x364   : > { %v1344_v51 = vld [vmem:[%s4159_s26 + $0x850] sm:$0xff]  ;;  %2844 = vmatpush.msrb.mxu0 %v1348_v47  ;;  %2863 = vmatpush.msrb.mxu1 %v1416_v48 }
 0x365   : > { %v1412_v52 = vld [vmem:[%s4159_s26 + $0xa70] sm:$0xff]  ;;  %2884 = vmatpush.msrb.mxu2 %v1476_v49  ;;  %2903 = vmatpush.msrb.mxu3 %v1544_v50 }
 0x366   : > { %v1472_v53 = vld [vmem:[%s4159_s26 + $0xc50] sm:$0xff]  ;;  %2845 = vmatpush.msrb.mxu0 %v1344_v51  ;;  %2864 = vmatpush.msrb.mxu1 %v1412_v52 }
 0x367   : > { %v1540_v54 = vld [vmem:[%s4159_s26 + $0xe70] sm:$0xff]  ;;  %2885 = vmatpush.msrb.mxu2 %v1472_v53  ;;  %2768 = vmatmul.f32.vlgmr.msra.gmra.mxu0 %v3715_v5 }
 0x368   : > { %v1340_v55 = vld [vmem:[%s4159_s26 + $0x830] sm:$0xff]  ;;  %2904 = vmatpush.msrb.mxu3 %v1540_v54  ;;  %2808 = vmatmul.f32.vlgmr.msra.gmra.mxu2 %v3716_v6 }
 0x369   : > { %v1408_v57 = vld [vmem:[%s4159_s26 + $0xa50] sm:$0xff]  ;;  %2846 = vmatpush.msrb.mxu0 %v1340_v55  ;;  %2828 = vmatmul.f32.vlgmr.msra.gmra.mxu3 %v3718_v12 }
 0x36a   : > { %v1468_v59 = vld [vmem:[%s4159_s26 + $0xc30] sm:$0xff]  ;;  %2865 = vmatpush.msrb.mxu1 %v1408_v57 }
 0x36b   : > { %v1536_v60 = vld [vmem:[%s4159_s26 + $0xe50] sm:$0xff]  ;;  %2886 = vmatpush.msrb.mxu2 %v1468_v59 }
 0x36c   : > { %v1336_v61 = vld [vmem:[%s4159_s26 + $0x810] sm:$0xff]  ;;  %2905 = vmatpush.msrb.mxu3 %v1536_v60 }
 0x36d   : > { %v1404_v62 = vld [vmem:[%s4159_s26 + $0xa30] sm:$0xff]  ;;  %2847 = vmatpush.msrb.mxu0 %v1336_v61 }
 0x36e   : > { %v1464_v63 = vld [vmem:[%s4159_s26 + $0xc10] sm:$0xff]  ;;  %2866 = vmatpush.msrb.mxu1 %v1404_v62 }
 0x36f   : > { %v1532_v0 = vld [vmem:[%s4159_s26 + $0xe30] sm:$0xff]  ;;  %2887 = vmatpush.msrb.mxu2 %v1464_v63  ;;  %2848 = vmatmul.f32.vlgmr.msrb.gmra.mxu0 %v3720_v28 }
 0x370   : > { %v1652_v1 = vld [vmem:[%s4159_s26 + $0x11f0] sm:$0xff]  ;;  %2906 = vmatpush.msrb.mxu3 %v1532_v0  ;;  %2888 = vmatmul.f32.vlgmr.msrb.gmra.mxu2 %v3719_v24 }
 0x371   : > { %v1780_v2 = vld [vmem:[%s4159_s26 + $0x15f0] sm:$0xff]  ;;  %2912 = vmatpush.msra.mxu0 %v1652_v1 }
 0x372   : > { %v1400_v3 = vld [vmem:[%s4159_s26 + $0xa10] sm:$0xff]  ;;  %2952 = vmatpush.msra.mxu2 %v1780_v2 }
 0x373   : > { %v1528_v4 = vld [vmem:[%s4159_s26 + $0xe10] sm:$0xff]  ;;  %2867 = vmatpush.msrb.mxu1 %v1400_v3 }
 0x374   : > { %v1648_v7 = vld [vmem:[%s4159_s26 + $0x11d0] sm:$0xff]  ;;  %2907 = vmatpush.msrb.mxu3 %v1528_v4 }
 0x375   : > { %v1716_v8 = vld [vmem:[%s4159_s26 + $0x13f0] sm:$0xff]  ;;  %2913 = vmatpush.msra.mxu0 %v1648_v7  ;;  %2908 = vmatmul.f32.vlgmr.msrb.gmra.mxu3 %v3721_v30 }
 0x376   : > { %v1776_v9 = vld [vmem:[%s4159_s26 + $0x15d0] sm:$0xff] }
 0x377   : > { %v1844_v10 = vld [vmem:[%s4159_s26 + $0x17f0] sm:$0xff]  ;;  %2953 = vmatpush.msra.mxu2 %v1776_v9 }
 0x378   : > { %v3717_v11 = vld [vmem:[#allocation2] sm:$0xff]  ;;  %2972 = vmatpush.msra.mxu3 %v1844_v10 }
 0x379   : > { %2788 = vmatmul.f32.vlgmr.msra.gmra.mxu1 %v3717_v11  ;;  %v1644_v13 = vld [vmem:[%s4159_s26 + $0x11b0] sm:$0xff] }
 0x37a   : > { %v1712_v14 = vld [vmem:[%s4159_s26 + $0x13d0] sm:$0xff]  ;;  %2932 = vmatpush.msra.mxu1 %v1716_v8  ;;  %2914 = vmatpush.msra.mxu0 %v1644_v13 }
 0x37b   : > { %v1772_v15 = vld [vmem:[%s4159_s26 + $0x15b0] sm:$0xff] }
 0x37c   : > { %v1840_v16 = vld [vmem:[%s4159_s26 + $0x17d0] sm:$0xff]  ;;  %2933 = vmatpush.msra.mxu1 %v1712_v14  ;;  %2954 = vmatpush.msra.mxu2 %v1772_v15  ;;  %v3724_v15 = vld [vmem:[#allocation2 + $0x10] sm:$0xff] }
 0x37d   : > { %v1640_v17 = vld [vmem:[%s4159_s26 + $0x1190] sm:$0xff]  ;;  %2973 = vmatpush.msra.mxu3 %v1840_v16 }
 0x37e   : > { %v1708_v18 = vld [vmem:[%s4159_s26 + $0x13b0] sm:$0xff]  ;;  %2915 = vmatpush.msra.mxu0 %v1640_v17 }
 0x37f   : > { %v1768_v19 = vld [vmem:[%s4159_s26 + $0x1590] sm:$0xff]  ;;  %2934 = vmatpush.msra.mxu1 %v1708_v18 }
 0x380   : > { %v1836_v58 = vld [vmem:[%s4159_s26 + $0x17b0] sm:$0xff]  ;;  %2955 = vmatpush.msra.mxu2 %v1768_v19 }
 0x381   : > { %v1636_v20 = vld [vmem:[%s4159_s26 + $0x1170] sm:$0xff]  ;;  %2974 = vmatpush.msra.mxu3 %v1836_v58  ;;  %2868 = vmatmul.f32.vlgmr.msrb.gmra.mxu1 %v3722_v35 }
 0x382   : > { %v1704_v21 = vld [vmem:[%s4159_s26 + $0x1390] sm:$0xff]  ;;  %2916 = vmatpush.msra.mxu0 %v1636_v20  ;;  %v3726_v20 = vld [vmem:[#allocation2 + $0x38] sm:$0xff] }
 0x383   : > { %v1764_v22 = vld [vmem:[%s4159_s26 + $0x1570] sm:$0xff]  ;;  %2935 = vmatpush.msra.mxu1 %v1704_v21 }
 0x384   : > { %v1832_v23 = vld [vmem:[%s4159_s26 + $0x1790] sm:$0xff]  ;;  %2956 = vmatpush.msra.mxu2 %v1764_v22 }
 0x385   : > { %v1632_v25 = vld [vmem:[%s4159_s26 + $0x1150] sm:$0xff]  ;;  %2975 = vmatpush.msra.mxu3 %v1832_v23 }
 0x386   : > { %v1700_v26 = vld [vmem:[%s4159_s26 + $0x1370] sm:$0xff]  ;;  %2917 = vmatpush.msra.mxu0 %v1632_v25 }
 0x387   : > { %v1760_v27 = vld [vmem:[%s4159_s26 + $0x1550] sm:$0xff]  ;;  %2936 = vmatpush.msra.mxu1 %v1700_v26 }
 0x388   : > { %v1828_v29 = vld [vmem:[%s4159_s26 + $0x1770] sm:$0xff]  ;;  %2957 = vmatpush.msra.mxu2 %v1760_v27 }
 0x389   : > { %v1628_v31 = vld [vmem:[%s4159_s26 + $0x1130] sm:$0xff]  ;;  %2976 = vmatpush.msra.mxu3 %v1828_v29 }
 0x38a   : > { %v1696_v32 = vld [vmem:[%s4159_s26 + $0x1350] sm:$0xff]  ;;  %2918 = vmatpush.msra.mxu0 %v1628_v31 }
 0x38b   : > { %v1756_v33 = vld [vmem:[%s4159_s26 + $0x1530] sm:$0xff]  ;;  %2937 = vmatpush.msra.mxu1 %v1696_v32 }
 0x38c   : > { %v1824_v34 = vld [vmem:[%s4159_s26 + $0x1750] sm:$0xff]  ;;  %2958 = vmatpush.msra.mxu2 %v1756_v33 }
 0x38d   : > { %v1624_v36 = vld [vmem:[%s4159_s26 + $0x1110] sm:$0xff]  ;;  %2977 = vmatpush.msra.mxu3 %v1824_v34 }
 0x38e   : > { %v1692_v37 = vld [vmem:[%s4159_s26 + $0x1330] sm:$0xff]  ;;  %2919 = vmatpush.msra.mxu0 %v1624_v36 }
 0x38f   : > { %v1752_v38 = vld [vmem:[%s4159_s26 + $0x1510] sm:$0xff]  ;;  %2938 = vmatpush.msra.mxu1 %v1692_v37 }
 0x390   : > { %v1820_v39 = vld [vmem:[%s4159_s26 + $0x1730] sm:$0xff]  ;;  %2959 = vmatpush.msra.mxu2 %v1752_v38 }
 0x391   : > { %v1620_v40 = vld [vmem:[%s4159_s26 + $0x10f0] sm:$0xff]  ;;  %2978 = vmatpush.msra.mxu3 %v1820_v39 }
 0x392   : > { %v1688_v41 = vld [vmem:[%s4159_s26 + $0x1310] sm:$0xff]  ;;  %2920 = vmatpush.msra.mxu0 %v1620_v40 }
 0x393   : > { %v1748_v42 = vld [vmem:[%s4159_s26 + $0x14f0] sm:$0xff]  ;;  %2939 = vmatpush.msra.mxu1 %v1688_v41 }
 0x394   : > { %v1816_v43 = vld [vmem:[%s4159_s26 + $0x1710] sm:$0xff]  ;;  %2960 = vmatpush.msra.mxu2 %v1748_v42 }
 0x395   : > { %v1616_v44 = vld [vmem:[%s4159_s26 + $0x10d0] sm:$0xff]  ;;  %2979 = vmatpush.msra.mxu3 %v1816_v43 }
 0x396   : > { %v1684_v45 = vld [vmem:[%s4159_s26 + $0x12f0] sm:$0xff]  ;;  %2921 = vmatpush.msra.mxu0 %v1616_v44 }
 0x397   : > { %v1744_v46 = vld [vmem:[%s4159_s26 + $0x14d0] sm:$0xff]  ;;  %2940 = vmatpush.msra.mxu1 %v1684_v45 }
 0x398   : > { %v1812_v47 = vld [vmem:[%s4159_s26 + $0x16f0] sm:$0xff]  ;;  %2961 = vmatpush.msra.mxu2 %v1744_v46 }
 0x399   : > { %v1612_v48 = vld [vmem:[%s4159_s26 + $0x10b0] sm:$0xff]  ;;  %2980 = vmatpush.msra.mxu3 %v1812_v47 }
 0x39a   : > { %v1680_v49 = vld [vmem:[%s4159_s26 + $0x12d0] sm:$0xff]  ;;  %2922 = vmatpush.msra.mxu0 %v1612_v48 }
 0x39b   : > { %v1740_v50 = vld [vmem:[%s4159_s26 + $0x14b0] sm:$0xff]  ;;  %2941 = vmatpush.msra.mxu1 %v1680_v49 }
 0x39c   : > { %v1808_v51 = vld [vmem:[%s4159_s26 + $0x16d0] sm:$0xff]  ;;  %2962 = vmatpush.msra.mxu2 %v1740_v50 }
 0x39d   : > { %v1608_v52 = vld [vmem:[%s4159_s26 + $0x1090] sm:$0xff]  ;;  %2981 = vmatpush.msra.mxu3 %v1808_v51 }
 0x39e   : > { %v1676_v53 = vld [vmem:[%s4159_s26 + $0x12b0] sm:$0xff]  ;;  %2923 = vmatpush.msra.mxu0 %v1608_v52 }
 0x39f   : > { %v1736_v54 = vld [vmem:[%s4159_s26 + $0x1490] sm:$0xff]  ;;  %2942 = vmatpush.msra.mxu1 %v1676_v53 }
 0x3a0   : > { %v1804_v55 = vld [vmem:[%s4159_s26 + $0x16b0] sm:$0xff]  ;;  %2963 = vmatpush.msra.mxu2 %v1736_v54 }
 0x3a1   : > { %v1604_v57 = vld [vmem:[%s4159_s26 + $0x1070] sm:$0xff]  ;;  %2982 = vmatpush.msra.mxu3 %v1804_v55 }
 0x3a2   : > { %v1672_v59 = vld [vmem:[%s4159_s26 + $0x1290] sm:$0xff]  ;;  %2924 = vmatpush.msra.mxu0 %v1604_v57 }
 0x3a3   : > { %v1732_v60 = vld [vmem:[%s4159_s26 + $0x1470] sm:$0xff]  ;;  %2943 = vmatpush.msra.mxu1 %v1672_v59 }
 0x3a4   : > { %v1800_v61 = vld [vmem:[%s4159_s26 + $0x1690] sm:$0xff]  ;;  %2964 = vmatpush.msra.mxu2 %v1732_v60 }
 0x3a5   : > { %v1600_v62 = vld [vmem:[%s4159_s26 + $0x1050] sm:$0xff]  ;;  %2983 = vmatpush.msra.mxu3 %v1800_v61 }
 0x3a6   : > { %v1668_v63 = vld [vmem:[%s4159_s26 + $0x1270] sm:$0xff]  ;;  %2925 = vmatpush.msra.mxu0 %v1600_v62 }
 0x3a7   : > { %v1728_v0 = vld [vmem:[%s4159_s26 + $0x1450] sm:$0xff]  ;;  %2944 = vmatpush.msra.mxu1 %v1668_v63 }
 0x3a8   : > { %v1796_v1 = vld [vmem:[%s4159_s26 + $0x1670] sm:$0xff]  ;;  %2965 = vmatpush.msra.mxu2 %v1728_v0 }
 0x3a9   : > { %v1596_v2 = vld [vmem:[%s4159_s26 + $0x1030] sm:$0xff]  ;;  %2984 = vmatpush.msra.mxu3 %v1796_v1 }
 0x3aa   : > { %v1664_v3 = vld [vmem:[%s4159_s26 + $0x1250] sm:$0xff]  ;;  %2926 = vmatpush.msra.mxu0 %v1596_v2 }
 0x3ab   : > { %v1724_v4 = vld [vmem:[%s4159_s26 + $0x1430] sm:$0xff]  ;;  %2945 = vmatpush.msra.mxu1 %v1664_v3 }
 0x3ac   : > { %v1792_v5 = vld [vmem:[%s4159_s26 + $0x1650] sm:$0xff]  ;;  %2966 = vmatpush.msra.mxu2 %v1724_v4 }
 0x3ad   : > { %v1592_v6 = vld [vmem:[%s4159_s26 + $0x1010] sm:$0xff]  ;;  %2985 = vmatpush.msra.mxu3 %v1792_v5 }
 0x3ae   : > { %v1660_v7 = vld [vmem:[%s4159_s26 + $0x1230] sm:$0xff]  ;;  %2927 = vmatpush.msra.mxu0 %v1592_v6 }
 0x3af   : > { %v1720_v8 = vld [vmem:[%s4159_s26 + $0x1410] sm:$0xff]  ;;  %2946 = vmatpush.msra.mxu1 %v1660_v7 }
 0x3b0   : > { %v1788_v9 = vld [vmem:[%s4159_s26 + $0x1630] sm:$0xff]  ;;  %2967 = vmatpush.msra.mxu2 %v1720_v8 }
 0x3b1   : > { %v1908_v10 = vld [vmem:[%s4159_s26 + $0x19f0] sm:$0xff]  ;;  %2986 = vmatpush.msra.mxu3 %v1788_v9  ;;  %2968 = vmatmul.f32.vlgmr.msra.gmra.mxu2 %v3724_v15  ;;  %v1141_v15 = vld [vmem:[%s4159_s26 + $0x1f8] sm:$0xff] }
 0x3b2   : > { %v2036_v11 = vld [vmem:[%s4159_s26 + $0x1df0] sm:$0xff]  ;;  %2992 = vmatpush.msrb.mxu0 %v1908_v10 }
 0x3b3   : > { %v1656_v12 = vld [vmem:[%s4159_s26 + $0x1210] sm:$0xff]  ;;  %3032 = vmatpush.msrb.mxu2 %v2036_v11 }
 0x3b4   : > { %v1784_v13 = vld [vmem:[%s4159_s26 + $0x1610] sm:$0xff]  ;;  %2947 = vmatpush.msra.mxu1 %v1656_v12 }
 0x3b5   : > { %v3723_v14 = vld [vmem:[#allocation2 + $0x40] sm:$0xff]  ;;  %2987 = vmatpush.msra.mxu3 %v1784_v13 }
 0x3b6   : > { %2928 = vmatmul.f32.vlgmr.msra.gmra.mxu0 %v3723_v14  ;;  %v1904_v16 = vld [vmem:[%s4159_s26 + $0x19d0] sm:$0xff]  ;;  %2988 = vmatmul.f32.vlgmr.msra.gmra.mxu3 %v3726_v20  ;;  %v1137_v20 = vld [vmem:[%s4159_s26 + $0x1d8] sm:$0xff] }
 0x3b7   : > { %v1972_v17 = vld [vmem:[%s4159_s26 + $0x1bf0] sm:$0xff]  ;;  %2993 = vmatpush.msrb.mxu0 %v1904_v16  ;;  %v1269_v16 = vld [vmem:[%s4159_s26 + $0x5f8] sm:$0xff] }
 0x3b8   : > { %v2032_v18 = vld [vmem:[%s4159_s26 + $0x1dd0] sm:$0xff]  ;;  %3012 = vmatpush.msrb.mxu1 %v1972_v17 }
 0x3b9   : > { %v2100_v19 = vld [vmem:[%s4159_s26 + $0x1ff0] sm:$0xff]  ;;  %3033 = vmatpush.msrb.mxu2 %v2032_v18 }
 0x3ba   : > { %v3725_v58 = vld [vmem:[#allocation2 + $0x20] sm:$0xff]  ;;  %3052 = vmatpush.msrb.mxu3 %v2100_v19 }
 0x3bb   : > { %2948 = vmatmul.f32.vlgmr.msra.gmra.mxu1 %v3725_v58  ;;  %v1900_v21 = vld [vmem:[%s4159_s26 + $0x19b0] sm:$0xff]  ;;  %v3728_v58 = vld [vmem:[#allocation2 + $0x78] sm:$0xff] }
 0x3bc   : > { %v1968_v22 = vld [vmem:[%s4159_s26 + $0x1bd0] sm:$0xff]  ;;  %2994 = vmatpush.msrb.mxu0 %v1900_v21  ;;  %v1205_v21 = vld [vmem:[%s4159_s26 + $0x3f8] sm:$0xff] }
 0x3bd   : > { %v2028_v23 = vld [vmem:[%s4159_s26 + $0x1db0] sm:$0xff]  ;;  %3013 = vmatpush.msrb.mxu1 %v1968_v22  ;;  %v1265_v22 = vld [vmem:[%s4159_s26 + $0x5d8] sm:$0xff] }
 0x3be   : > { %v2096_v24 = vld [vmem:[%s4159_s26 + $0x1fd0] sm:$0xff]  ;;  %3034 = vmatpush.msrb.mxu2 %v2028_v23  ;;  %v1333_v23 = vld [vmem:[%s4159_s26 + $0x7f8] sm:$0xff] }
 0x3bf   : > { %v1896_v25 = vld [vmem:[%s4159_s26 + $0x1990] sm:$0xff]  ;;  %3053 = vmatpush.msrb.mxu3 %v2096_v24  ;;  %v3729_v24 = vld [vmem:[#allocation2 + $0x70] sm:$0xff] }
 0x3c0   : > { %v1964_v26 = vld [vmem:[%s4159_s26 + $0x1bb0] sm:$0xff]  ;;  %2995 = vmatpush.msrb.mxu0 %v1896_v25  ;;  %v3730_v25 = vld [vmem:[#allocation2 + $0x28] sm:$0xff] }
 0x3c1   : > { %v2024_v27 = vld [vmem:[%s4159_s26 + $0x1d90] sm:$0xff]  ;;  %3014 = vmatpush.msrb.mxu1 %v1964_v26  ;;  %v1133_v26 = vld [vmem:[%s4159_s26 + $0x1b8] sm:$0xff] }
 0x3c2   : > { %v2092_v28 = vld [vmem:[%s4159_s26 + $0x1fb0] sm:$0xff]  ;;  %3035 = vmatpush.msrb.mxu2 %v2024_v27  ;;  %v1201_v27 = vld [vmem:[%s4159_s26 + $0x3d8] sm:$0xff] }
 0x3c3   : > { %v1892_v29 = vld [vmem:[%s4159_s26 + $0x1970] sm:$0xff]  ;;  %3054 = vmatpush.msrb.mxu3 %v2092_v28  ;;  %v1261_v28 = vld [vmem:[%s4159_s26 + $0x5b8] sm:$0xff] }
 0x3c4   : > { %v1960_v30 = vld [vmem:[%s4159_s26 + $0x1b90] sm:$0xff]  ;;  %2996 = vmatpush.msrb.mxu0 %v1892_v29  ;;  %v1329_v29 = vld [vmem:[%s4159_s26 + $0x7d8] sm:$0xff] }
 0x3c5   : > { %v2020_v31 = vld [vmem:[%s4159_s26 + $0x1d70] sm:$0xff]  ;;  %3015 = vmatpush.msrb.mxu1 %v1960_v30  ;;  %v1129_v30 = vld [vmem:[%s4159_s26 + $0x198] sm:$0xff] }
 0x3c6   : > { %v2088_v32 = vld [vmem:[%s4159_s26 + $0x1f90] sm:$0xff]  ;;  %3036 = vmatpush.msrb.mxu2 %v2020_v31  ;;  %v1197_v31 = vld [vmem:[%s4159_s26 + $0x3b8] sm:$0xff] }
 0x3c7   : > { %v1888_v33 = vld [vmem:[%s4159_s26 + $0x1950] sm:$0xff]  ;;  %3055 = vmatpush.msrb.mxu3 %v2088_v32  ;;  %v1257_v32 = vld [vmem:[%s4159_s26 + $0x598] sm:$0xff] }
 0x3c8   : > { %v1956_v34 = vld [vmem:[%s4159_s26 + $0x1b70] sm:$0xff]  ;;  %2997 = vmatpush.msrb.mxu0 %v1888_v33  ;;  %v1325_v33 = vld [vmem:[%s4159_s26 + $0x7b8] sm:$0xff] }
 0x3c9   : > { %v2016_v35 = vld [vmem:[%s4159_s26 + $0x1d50] sm:$0xff]  ;;  %3016 = vmatpush.msrb.mxu1 %v1956_v34  ;;  %v1125_v34 = vld [vmem:[%s4159_s26 + $0x178] sm:$0xff] }
 0x3ca   : > { %v2084_v36 = vld [vmem:[%s4159_s26 + $0x1f70] sm:$0xff]  ;;  %3037 = vmatpush.msrb.mxu2 %v2016_v35  ;;  %v1193_v35 = vld [vmem:[%s4159_s26 + $0x398] sm:$0xff] }
 0x3cb   : > { %v1884_v37 = vld [vmem:[%s4159_s26 + $0x1930] sm:$0xff]  ;;  %3056 = vmatpush.msrb.mxu3 %v2084_v36  ;;  %v1253_v36 = vld [vmem:[%s4159_s26 + $0x578] sm:$0xff] }
 0x3cc   : > { %v1952_v38 = vld [vmem:[%s4159_s26 + $0x1b50] sm:$0xff]  ;;  %2998 = vmatpush.msrb.mxu0 %v1884_v37  ;;  %v1321_v37 = vld [vmem:[%s4159_s26 + $0x798] sm:$0xff] }
 0x3cd   : > { %v2012_v39 = vld [vmem:[%s4159_s26 + $0x1d30] sm:$0xff]  ;;  %3017 = vmatpush.msrb.mxu1 %v1952_v38  ;;  %v1121_v38 = vld [vmem:[%s4159_s26 + $0x158] sm:$0xff] }
 0x3ce   : > { %v2080_v40 = vld [vmem:[%s4159_s26 + $0x1f50] sm:$0xff]  ;;  %3038 = vmatpush.msrb.mxu2 %v2012_v39  ;;  %v1189_v39 = vld [vmem:[%s4159_s26 + $0x378] sm:$0xff] }
 0x3cf   : > { %v1880_v41 = vld [vmem:[%s4159_s26 + $0x1910] sm:$0xff]  ;;  %3057 = vmatpush.msrb.mxu3 %v2080_v40  ;;  %v1249_v40 = vld [vmem:[%s4159_s26 + $0x558] sm:$0xff] }
 0x3d0   : > { %v1948_v42 = vld [vmem:[%s4159_s26 + $0x1b30] sm:$0xff]  ;;  %2999 = vmatpush.msrb.mxu0 %v1880_v41  ;;  %v1317_v41 = vld [vmem:[%s4159_s26 + $0x778] sm:$0xff] }
 0x3d1   : > { %v2008_v43 = vld [vmem:[%s4159_s26 + $0x1d10] sm:$0xff]  ;;  %3018 = vmatpush.msrb.mxu1 %v1948_v42  ;;  %v1117_v42 = vld [vmem:[%s4159_s26 + $0x138] sm:$0xff] }
 0x3d2   : > { %v2076_v44 = vld [vmem:[%s4159_s26 + $0x1f30] sm:$0xff]  ;;  %3039 = vmatpush.msrb.mxu2 %v2008_v43  ;;  %v1185_v43 = vld [vmem:[%s4159_s26 + $0x358] sm:$0xff] }
 0x3d3   : > { %v1876_v45 = vld [vmem:[%s4159_s26 + $0x18f0] sm:$0xff]  ;;  %3058 = vmatpush.msrb.mxu3 %v2076_v44  ;;  %v1245_v44 = vld [vmem:[%s4159_s26 + $0x538] sm:$0xff] }
 0x3d4   : > { %v1944_v46 = vld [vmem:[%s4159_s26 + $0x1b10] sm:$0xff]  ;;  %3000 = vmatpush.msrb.mxu0 %v1876_v45  ;;  %v1313_v45 = vld [vmem:[%s4159_s26 + $0x758] sm:$0xff] }
 0x3d5   : > { %v2004_v47 = vld [vmem:[%s4159_s26 + $0x1cf0] sm:$0xff]  ;;  %3019 = vmatpush.msrb.mxu1 %v1944_v46  ;;  %v1113_v46 = vld [vmem:[%s4159_s26 + $0x118] sm:$0xff] }
 0x3d6   : > { %v2072_v48 = vld [vmem:[%s4159_s26 + $0x1f10] sm:$0xff]  ;;  %3040 = vmatpush.msrb.mxu2 %v2004_v47  ;;  %v1181_v47 = vld [vmem:[%s4159_s26 + $0x338] sm:$0xff] }
 0x3d7   : > { %v1872_v49 = vld [vmem:[%s4159_s26 + $0x18d0] sm:$0xff]  ;;  %3059 = vmatpush.msrb.mxu3 %v2072_v48  ;;  %v1241_v48 = vld [vmem:[%s4159_s26 + $0x518] sm:$0xff] }
 0x3d8   : > { %v1940_v50 = vld [vmem:[%s4159_s26 + $0x1af0] sm:$0xff]  ;;  %3001 = vmatpush.msrb.mxu0 %v1872_v49  ;;  %v1309_v49 = vld [vmem:[%s4159_s26 + $0x738] sm:$0xff] }
 0x3d9   : > { %v2000_v51 = vld [vmem:[%s4159_s26 + $0x1cd0] sm:$0xff]  ;;  %3020 = vmatpush.msrb.mxu1 %v1940_v50  ;;  %v1109_v50 = vld [vmem:[%s4159_s26 + $0xf8] sm:$0xff] }
 0x3da   : > { %v2068_v52 = vld [vmem:[%s4159_s26 + $0x1ef0] sm:$0xff]  ;;  %3041 = vmatpush.msrb.mxu2 %v2000_v51  ;;  %v1177_v51 = vld [vmem:[%s4159_s26 + $0x318] sm:$0xff] }
 0x3db   : > { %v1868_v53 = vld [vmem:[%s4159_s26 + $0x18b0] sm:$0xff]  ;;  %3060 = vmatpush.msrb.mxu3 %v2068_v52  ;;  %v1237_v52 = vld [vmem:[%s4159_s26 + $0x4f8] sm:$0xff] }
 0x3dc   : > { %v1936_v54 = vld [vmem:[%s4159_s26 + $0x1ad0] sm:$0xff]  ;;  %3002 = vmatpush.msrb.mxu0 %v1868_v53  ;;  %v1305_v53 = vld [vmem:[%s4159_s26 + $0x718] sm:$0xff] }
 0x3dd   : > { %v1996_v55 = vld [vmem:[%s4159_s26 + $0x1cb0] sm:$0xff]  ;;  %3021 = vmatpush.msrb.mxu1 %v1936_v54  ;;  %v1105_v54 = vld [vmem:[%s4159_s26 + $0xd8] sm:$0xff] }
 0x3de   : > { %v2064_v57 = vld [vmem:[%s4159_s26 + $0x1ed0] sm:$0xff]  ;;  %3042 = vmatpush.msrb.mxu2 %v1996_v55  ;;  %v1173_v55 = vld [vmem:[%s4159_s26 + $0x2f8] sm:$0xff] }
 0x3df   : > { %v1864_v59 = vld [vmem:[%s4159_s26 + $0x1890] sm:$0xff]  ;;  %3061 = vmatpush.msrb.mxu3 %v2064_v57  ;;  %v1233_v57 = vld [vmem:[%s4159_s26 + $0x4d8] sm:$0xff] }
 0x3e0   : > { %v1932_v60 = vld [vmem:[%s4159_s26 + $0x1ab0] sm:$0xff]  ;;  %3003 = vmatpush.msrb.mxu0 %v1864_v59  ;;  %v1301_v59 = vld [vmem:[%s4159_s26 + $0x6f8] sm:$0xff] }
 0x3e1   : > { %v1992_v61 = vld [vmem:[%s4159_s26 + $0x1c90] sm:$0xff]  ;;  %3022 = vmatpush.msrb.mxu1 %v1932_v60  ;;  %v1101_v60 = vld [vmem:[%s4159_s26 + $0xb8] sm:$0xff] }
 0x3e2   : > { %v2060_v62 = vld [vmem:[%s4159_s26 + $0x1eb0] sm:$0xff]  ;;  %3043 = vmatpush.msrb.mxu2 %v1992_v61  ;;  %v1169_v61 = vld [vmem:[%s4159_s26 + $0x2d8] sm:$0xff] }
 0x3e3   : > { %v1860_v63 = vld [vmem:[%s4159_s26 + $0x1870] sm:$0xff]  ;;  %3062 = vmatpush.msrb.mxu3 %v2060_v62  ;;  %v1229_v62 = vld [vmem:[%s4159_s26 + $0x4b8] sm:$0xff] }
 0x3e4   : > { %v1928_v0 = vld [vmem:[%s4159_s26 + $0x1a90] sm:$0xff]  ;;  %3004 = vmatpush.msrb.mxu0 %v1860_v63  ;;  %v1297_v63 = vld [vmem:[%s4159_s26 + $0x6d8] sm:$0xff] }
 0x3e5   : > { %v1988_v1 = vld [vmem:[%s4159_s26 + $0x1c70] sm:$0xff]  ;;  %3023 = vmatpush.msrb.mxu1 %v1928_v0  ;;  %v1097_v0 = vld [vmem:[%s4159_s26 + $0x98] sm:$0xff] }
 0x3e6   : > { %v2056_v2 = vld [vmem:[%s4159_s26 + $0x1e90] sm:$0xff]  ;;  %3044 = vmatpush.msrb.mxu2 %v1988_v1  ;;  %v1165_v1 = vld [vmem:[%s4159_s26 + $0x2b8] sm:$0xff] }
 0x3e7   : > { %v1856_v3 = vld [vmem:[%s4159_s26 + $0x1850] sm:$0xff]  ;;  %3063 = vmatpush.msrb.mxu3 %v2056_v2  ;;  %v1225_v2 = vld [vmem:[%s4159_s26 + $0x498] sm:$0xff] }
 0x3e8   : > { %v1924_v4 = vld [vmem:[%s4159_s26 + $0x1a70] sm:$0xff]  ;;  %3005 = vmatpush.msrb.mxu0 %v1856_v3  ;;  %v1293_v3 = vld [vmem:[%s4159_s26 + $0x6b8] sm:$0xff] }
 0x3e9   : > { %v1984_v5 = vld [vmem:[%s4159_s26 + $0x1c50] sm:$0xff]  ;;  %3024 = vmatpush.msrb.mxu1 %v1924_v4  ;;  %v1093_v4 = vld [vmem:[%s4159_s26 + $0x78] sm:$0xff] }
 0x3ea   : > { %v2052_v6 = vld [vmem:[%s4159_s26 + $0x1e70] sm:$0xff]  ;;  %3045 = vmatpush.msrb.mxu2 %v1984_v5  ;;  %v1161_v5 = vld [vmem:[%s4159_s26 + $0x298] sm:$0xff] }
 0x3eb   : > { %v1852_v7 = vld [vmem:[%s4159_s26 + $0x1830] sm:$0xff]  ;;  %3064 = vmatpush.msrb.mxu3 %v2052_v6  ;;  %v1221_v6 = vld [vmem:[%s4159_s26 + $0x478] sm:$0xff] }
 0x3ec   : > { %v1920_v8 = vld [vmem:[%s4159_s26 + $0x1a50] sm:$0xff]  ;;  %3006 = vmatpush.msrb.mxu0 %v1852_v7  ;;  %v1289_v7 = vld [vmem:[%s4159_s26 + $0x698] sm:$0xff] }
 0x3ed   : > { %v1980_v9 = vld [vmem:[%s4159_s26 + $0x1c30] sm:$0xff]  ;;  %3025 = vmatpush.msrb.mxu1 %v1920_v8  ;;  %v1089_v8 = vld [vmem:[%s4159_s26 + $0x58] sm:$0xff] }
 0x3ee   : > { %v2048_v10 = vld [vmem:[%s4159_s26 + $0x1e50] sm:$0xff]  ;;  %3046 = vmatpush.msrb.mxu2 %v1980_v9  ;;  %v1157_v9 = vld [vmem:[%s4159_s26 + $0x278] sm:$0xff] }
 0x3ef   : > { %v1848_v11 = vld [vmem:[%s4159_s26 + $0x1810] sm:$0xff]  ;;  %3065 = vmatpush.msrb.mxu3 %v2048_v10  ;;  %v1217_v10 = vld [vmem:[%s4159_s26 + $0x458] sm:$0xff] }
 0x3f0   : > { %v1916_v12 = vld [vmem:[%s4159_s26 + $0x1a30] sm:$0xff]  ;;  %3007 = vmatpush.msrb.mxu0 %v1848_v11  ;;  %v1285_v11 = vld [vmem:[%s4159_s26 + $0x678] sm:$0xff] }
 0x3f1   : > { %v1976_v13 = vld [vmem:[%s4159_s26 + $0x1c10] sm:$0xff]  ;;  %3026 = vmatpush.msrb.mxu1 %v1916_v12  ;;  %v1085_v12 = vld [vmem:[%s4159_s26 + $0x38] sm:$0xff] }
 0x3f2   : > { %v2044_v14 = vld [vmem:[%s4159_s26 + $0x1e30] sm:$0xff]  ;;  %3047 = vmatpush.msrb.mxu2 %v1976_v13  ;;  %3072 = vmatpush.msra.mxu0 %v1141_v15  ;;  %v1153_v13 = vld [vmem:[%s4159_s26 + $0x258] sm:$0xff] }
 0x3f3   : > { %3066 = vmatpush.msrb.mxu3 %v2044_v14  ;;  %v1912_v17 = vld [vmem:[%s4159_s26 + $0x1a10] sm:$0xff]  ;;  %3048 = vmatmul.f32.vlgmr.msrb.gmra.mxu2 %v3728_v58  ;;  %v1213_v14 = vld [vmem:[%s4159_s26 + $0x438] sm:$0xff] }
 0x3f4   : > { %v2040_v18 = vld [vmem:[%s4159_s26 + $0x1e10] sm:$0xff]  ;;  %3112 = vmatpush.msra.mxu2 %v1269_v16  ;;  %3027 = vmatpush.msrb.mxu1 %v1912_v17  ;;  %v1281_v15 = vld [vmem:[%s4159_s26 + $0x658] sm:$0xff] }
 0x3f5   : > { %v3727_v19 = vld [vmem:[#allocation2 + $0x60] sm:$0xff]  ;;  %3067 = vmatpush.msrb.mxu3 %v2040_v18  ;;  %3028 = vmatmul.f32.vlgmr.msrb.gmra.mxu1 %v3729_v24  ;;  %v1081_v16 = vld [vmem:[%s4159_s26 + $0x18] sm:$0xff] }
 0x3f6   : > { %3008 = vmatmul.f32.vlgmr.msrb.gmra.mxu0 %v3727_v19  ;;  %3068 = vmatmul.f32.vlgmr.msrb.gmra.mxu3 %v3730_v25  ;;  %v1149_v17 = vld [vmem:[%s4159_s26 + $0x238] sm:$0xff] }
 0x3f7   : > { %3073 = vmatpush.msra.mxu0 %v1137_v20  ;;  %3092 = vmatpush.msra.mxu1 %v1205_v21  ;;  %v1209_v18 = vld [vmem:[%s4159_s26 + $0x418] sm:$0xff] }
 0x3f8   : > { %3113 = vmatpush.msra.mxu2 %v1265_v22  ;;  %3132 = vmatpush.msra.mxu3 %v1333_v23  ;;  %v1277_v19 = vld [vmem:[%s4159_s26 + $0x638] sm:$0xff] }
 0x3f9   : > { %3074 = vmatpush.msra.mxu0 %v1133_v26  ;;  %3093 = vmatpush.msra.mxu1 %v1201_v27  ;;  %v1397_v58 = vld [vmem:[%s4159_s26 + $0x9f8] sm:$0xff] }
 0x3fa   : > { %3114 = vmatpush.msra.mxu2 %v1261_v28  ;;  %3133 = vmatpush.msra.mxu3 %v1329_v29  ;;  %v1525_v20 = vld [vmem:[%s4159_s26 + $0xdf8] sm:$0xff] }
 0x3fb   : > { %3075 = vmatpush.msra.mxu0 %v1129_v30  ;;  %3094 = vmatpush.msra.mxu1 %v1197_v31  ;;  %v1145_v21 = vld [vmem:[%s4159_s26 + $0x218] sm:$0xff] }
 0x3fc   : > { %3115 = vmatpush.msra.mxu2 %v1257_v32  ;;  %3134 = vmatpush.msra.mxu3 %v1325_v33  ;;  %v1273_v22 = vld [vmem:[%s4159_s26 + $0x618] sm:$0xff] }
 0x3fd   : > { %3076 = vmatpush.msra.mxu0 %v1125_v34  ;;  %3095 = vmatpush.msra.mxu1 %v1193_v35  ;;  %v1393_v23 = vld [vmem:[%s4159_s26 + $0x9d8] sm:$0xff] }
 0x3fe   : > { %3116 = vmatpush.msra.mxu2 %v1253_v36  ;;  %3135 = vmatpush.msra.mxu3 %v1321_v37  ;;  %v1461_v24 = vld [vmem:[%s4159_s26 + $0xbf8] sm:$0xff] }
 0x3ff   : > { %3077 = vmatpush.msra.mxu0 %v1121_v38  ;;  %3096 = vmatpush.msra.mxu1 %v1189_v39  ;;  %v1521_v25 = vld [vmem:[%s4159_s26 + $0xdd8] sm:$0xff] }
 0x400   : > { %3117 = vmatpush.msra.mxu2 %v1249_v40  ;;  %3136 = vmatpush.msra.mxu3 %v1317_v41  ;;  %v1589_v26 = vld [vmem:[%s4159_s26 + $0xff8] sm:$0xff] }
 0x401   : > { %3078 = vmatpush.msra.mxu0 %v1117_v42  ;;  %3097 = vmatpush.msra.mxu1 %v1185_v43  ;;  %v1389_v27 = vld [vmem:[%s4159_s26 + $0x9b8] sm:$0xff] }
 0x402   : > { %3118 = vmatpush.msra.mxu2 %v1245_v44  ;;  %3137 = vmatpush.msra.mxu3 %v1313_v45  ;;  %v1457_v28 = vld [vmem:[%s4159_s26 + $0xbd8] sm:$0xff] }
 0x403   : > { %3079 = vmatpush.msra.mxu0 %v1113_v46  ;;  %3098 = vmatpush.msra.mxu1 %v1181_v47  ;;  %v1517_v29 = vld [vmem:[%s4159_s26 + $0xdb8] sm:$0xff] }
 0x404   : > { %3119 = vmatpush.msra.mxu2 %v1241_v48  ;;  %3138 = vmatpush.msra.mxu3 %v1309_v49  ;;  %v1585_v30 = vld [vmem:[%s4159_s26 + $0xfd8] sm:$0xff] }
 0x405   : > { %3080 = vmatpush.msra.mxu0 %v1109_v50  ;;  %3099 = vmatpush.msra.mxu1 %v1177_v51  ;;  %v1385_v31 = vld [vmem:[%s4159_s26 + $0x998] sm:$0xff] }
 0x406   : > { %3120 = vmatpush.msra.mxu2 %v1237_v52  ;;  %3139 = vmatpush.msra.mxu3 %v1305_v53  ;;  %v1453_v32 = vld [vmem:[%s4159_s26 + $0xbb8] sm:$0xff] }
 0x407   : > { %3081 = vmatpush.msra.mxu0 %v1105_v54  ;;  %3100 = vmatpush.msra.mxu1 %v1173_v55  ;;  %v1513_v33 = vld [vmem:[%s4159_s26 + $0xd98] sm:$0xff] }
 0x408   : > { %3121 = vmatpush.msra.mxu2 %v1233_v57  ;;  %3140 = vmatpush.msra.mxu3 %v1301_v59  ;;  %v1581_v34 = vld [vmem:[%s4159_s26 + $0xfb8] sm:$0xff] }
 0x409   : > { %3082 = vmatpush.msra.mxu0 %v1101_v60  ;;  %3101 = vmatpush.msra.mxu1 %v1169_v61  ;;  %v1381_v35 = vld [vmem:[%s4159_s26 + $0x978] sm:$0xff] }
 0x40a   : > { %3122 = vmatpush.msra.mxu2 %v1229_v62  ;;  %3141 = vmatpush.msra.mxu3 %v1297_v63  ;;  %v1449_v36 = vld [vmem:[%s4159_s26 + $0xb98] sm:$0xff] }
 0x40b   : > { %3083 = vmatpush.msra.mxu0 %v1097_v0  ;;  %3102 = vmatpush.msra.mxu1 %v1165_v1  ;;  %v1509_v37 = vld [vmem:[%s4159_s26 + $0xd78] sm:$0xff] }
 0x40c   : > { %3123 = vmatpush.msra.mxu2 %v1225_v2  ;;  %3142 = vmatpush.msra.mxu3 %v1293_v3  ;;  %v1577_v38 = vld [vmem:[%s4159_s26 + $0xf98] sm:$0xff] }
 0x40d   : > { %3084 = vmatpush.msra.mxu0 %v1093_v4  ;;  %3103 = vmatpush.msra.mxu1 %v1161_v5  ;;  %v1377_v39 = vld [vmem:[%s4159_s26 + $0x958] sm:$0xff] }
 0x40e   : > { %3124 = vmatpush.msra.mxu2 %v1221_v6  ;;  %3143 = vmatpush.msra.mxu3 %v1289_v7  ;;  %v1445_v40 = vld [vmem:[%s4159_s26 + $0xb78] sm:$0xff] }
 0x40f   : > { %3085 = vmatpush.msra.mxu0 %v1089_v8  ;;  %3104 = vmatpush.msra.mxu1 %v1157_v9  ;;  %v1505_v41 = vld [vmem:[%s4159_s26 + $0xd58] sm:$0xff] }
 0x410   : > { %3125 = vmatpush.msra.mxu2 %v1217_v10  ;;  %3144 = vmatpush.msra.mxu3 %v1285_v11  ;;  %v1573_v42 = vld [vmem:[%s4159_s26 + $0xf78] sm:$0xff] }
 0x411   : > { %3086 = vmatpush.msra.mxu0 %v1085_v12  ;;  %3105 = vmatpush.msra.mxu1 %v1153_v13  ;;  %v1373_v43 = vld [vmem:[%s4159_s26 + $0x938] sm:$0xff] }
 0x412   : > { %3126 = vmatpush.msra.mxu2 %v1213_v14  ;;  %3145 = vmatpush.msra.mxu3 %v1281_v15  ;;  %v1441_v44 = vld [vmem:[%s4159_s26 + $0xb58] sm:$0xff] }
 0x413   : > { %3087 = vmatpush.msra.mxu0 %v1081_v16  ;;  %3106 = vmatpush.msra.mxu1 %v1149_v17  ;;  %v1501_v45 = vld [vmem:[%s4159_s26 + $0xd38] sm:$0xff] }
 0x414   : > { %3127 = vmatpush.msra.mxu2 %v1209_v18  ;;  %3146 = vmatpush.msra.mxu3 %v1277_v19  ;;  %v1569_v46 = vld [vmem:[%s4159_s26 + $0xf58] sm:$0xff] }
 0x415   : > { %3152 = vmatpush.msrb.mxu0 %v1397_v58  ;;  %3107 = vmatpush.msra.mxu1 %v1145_v21  ;;  %v1369_v47 = vld [vmem:[%s4159_s26 + $0x918] sm:$0xff] }
 0x416   : > { %3192 = vmatpush.msrb.mxu2 %v1525_v20  ;;  %3147 = vmatpush.msra.mxu3 %v1273_v22  ;;  %v1437_v48 = vld [vmem:[%s4159_s26 + $0xb38] sm:$0xff] }
 0x417   : > { %3153 = vmatpush.msrb.mxu0 %v1393_v23  ;;  %3172 = vmatpush.msrb.mxu1 %v1461_v24  ;;  %v1497_v49 = vld [vmem:[%s4159_s26 + $0xd18] sm:$0xff]  ;;  %v3731_v24 = vld [vmem:[#allocation2 + $0x30] sm:$0xff] }
 0x418   : > { %3193 = vmatpush.msrb.mxu2 %v1521_v25  ;;  %3212 = vmatpush.msrb.mxu3 %v1589_v26  ;;  %v1565_v50 = vld [vmem:[%s4159_s26 + $0xf38] sm:$0xff]  ;;  %v3732_v25 = vld [vmem:[#allocation2 + $0x58] sm:$0xff] }
 0x419   : > { %3154 = vmatpush.msrb.mxu0 %v1389_v27  ;;  %3173 = vmatpush.msrb.mxu1 %v1457_v28  ;;  %v1365_v51 = vld [vmem:[%s4159_s26 + $0x8f8] sm:$0xff] }
 0x41a   : > { %3194 = vmatpush.msrb.mxu2 %v1517_v29  ;;  %3213 = vmatpush.msrb.mxu3 %v1585_v30  ;;  %v1433_v52 = vld [vmem:[%s4159_s26 + $0xb18] sm:$0xff]  ;;  %v3733_v30 = vld [vmem:[#allocation2] sm:$0xff] }
 0x41b   : > { %3155 = vmatpush.msrb.mxu0 %v1385_v31  ;;  %3174 = vmatpush.msrb.mxu1 %v1453_v32  ;;  %v1493_v53 = vld [vmem:[%s4159_s26 + $0xcf8] sm:$0xff]  ;;  %v3734_v31 = vld [vmem:[#allocation2 + $0x18] sm:$0xff] }
 0x41c   : > { %3195 = vmatpush.msrb.mxu2 %v1513_v33  ;;  %3214 = vmatpush.msrb.mxu3 %v1581_v34  ;;  %v1561_v54 = vld [vmem:[%s4159_s26 + $0xf18] sm:$0xff] }
 0x41d   : > { %3156 = vmatpush.msrb.mxu0 %v1381_v35  ;;  %3175 = vmatpush.msrb.mxu1 %v1449_v36  ;;  %v1361_v55 = vld [vmem:[%s4159_s26 + $0x8d8] sm:$0xff] }
 0x41e   : > { %3196 = vmatpush.msrb.mxu2 %v1509_v37  ;;  %3215 = vmatpush.msrb.mxu3 %v1577_v38  ;;  %v1429_v57 = vld [vmem:[%s4159_s26 + $0xaf8] sm:$0xff] }
 0x41f   : > { %3157 = vmatpush.msrb.mxu0 %v1377_v39  ;;  %3176 = vmatpush.msrb.mxu1 %v1445_v40  ;;  %v1489_v59 = vld [vmem:[%s4159_s26 + $0xcd8] sm:$0xff] }
 0x420   : > { %3197 = vmatpush.msrb.mxu2 %v1505_v41  ;;  %3216 = vmatpush.msrb.mxu3 %v1573_v42  ;;  %v1557_v60 = vld [vmem:[%s4159_s26 + $0xef8] sm:$0xff] }
 0x421   : > { %3158 = vmatpush.msrb.mxu0 %v1373_v43  ;;  %3177 = vmatpush.msrb.mxu1 %v1441_v44  ;;  %v1357_v61 = vld [vmem:[%s4159_s26 + $0x8b8] sm:$0xff] }
 0x422   : > { %3198 = vmatpush.msrb.mxu2 %v1501_v45  ;;  %3217 = vmatpush.msrb.mxu3 %v1569_v46  ;;  %v1425_v62 = vld [vmem:[%s4159_s26 + $0xad8] sm:$0xff] }
 0x423   : > { %3159 = vmatpush.msrb.mxu0 %v1369_v47  ;;  %3178 = vmatpush.msrb.mxu1 %v1437_v48  ;;  %v1485_v63 = vld [vmem:[%s4159_s26 + $0xcb8] sm:$0xff]  ;;  %v3736_v48 = vld [vmem:[#allocation2 + $0x50] sm:$0xff] }
 0x424   : > { %3199 = vmatpush.msrb.mxu2 %v1497_v49  ;;  %3218 = vmatpush.msrb.mxu3 %v1565_v50  ;;  %v1553_v0 = vld [vmem:[%s4159_s26 + $0xed8] sm:$0xff] }
 0x425   : > { %3160 = vmatpush.msrb.mxu0 %v1365_v51  ;;  %3179 = vmatpush.msrb.mxu1 %v1433_v52  ;;  %v1353_v1 = vld [vmem:[%s4159_s26 + $0x898] sm:$0xff] }
 0x426   : > { %3200 = vmatpush.msrb.mxu2 %v1493_v53  ;;  %3219 = vmatpush.msrb.mxu3 %v1561_v54  ;;  %v1421_v2 = vld [vmem:[%s4159_s26 + $0xab8] sm:$0xff] }
 0x427   : > { %3161 = vmatpush.msrb.mxu0 %v1361_v55  ;;  %3180 = vmatpush.msrb.mxu1 %v1429_v57  ;;  %v1481_v3 = vld [vmem:[%s4159_s26 + $0xc98] sm:$0xff] }
 0x428   : > { %3201 = vmatpush.msrb.mxu2 %v1489_v59  ;;  %3220 = vmatpush.msrb.mxu3 %v1557_v60  ;;  %v1549_v4 = vld [vmem:[%s4159_s26 + $0xeb8] sm:$0xff] }
 0x429   : > { %3162 = vmatpush.msrb.mxu0 %v1357_v61  ;;  %3181 = vmatpush.msrb.mxu1 %v1425_v62  ;;  %v1349_v5 = vld [vmem:[%s4159_s26 + $0x878] sm:$0xff] }
 0x42a   : > { %3202 = vmatpush.msrb.mxu2 %v1485_v63  ;;  %3221 = vmatpush.msrb.mxu3 %v1553_v0  ;;  %v1417_v6 = vld [vmem:[%s4159_s26 + $0xa98] sm:$0xff] }
 0x42b   : > { %3163 = vmatpush.msrb.mxu0 %v1353_v1  ;;  %3182 = vmatpush.msrb.mxu1 %v1421_v2  ;;  %v1477_v7 = vld [vmem:[%s4159_s26 + $0xc78] sm:$0xff] }
 0x42c   : > { %v1545_v8 = vld [vmem:[%s4159_s26 + $0xe98] sm:$0xff]  ;;  %3203 = vmatpush.msrb.mxu2 %v1481_v3  ;;  %3222 = vmatpush.msrb.mxu3 %v1549_v4 }
 0x42d   : > { %v1345_v9 = vld [vmem:[%s4159_s26 + $0x858] sm:$0xff]  ;;  %3164 = vmatpush.msrb.mxu0 %v1349_v5  ;;  %3183 = vmatpush.msrb.mxu1 %v1417_v6 }
 0x42e   : > { %v1413_v10 = vld [vmem:[%s4159_s26 + $0xa78] sm:$0xff]  ;;  %3204 = vmatpush.msrb.mxu2 %v1477_v7  ;;  %3223 = vmatpush.msrb.mxu3 %v1545_v8 }
 0x42f   : > { %v1473_v11 = vld [vmem:[%s4159_s26 + $0xc58] sm:$0xff]  ;;  %3165 = vmatpush.msrb.mxu0 %v1345_v9  ;;  %3184 = vmatpush.msrb.mxu1 %v1413_v10 }
 0x430   : > { %v1541_v12 = vld [vmem:[%s4159_s26 + $0xe78] sm:$0xff]  ;;  %3205 = vmatpush.msrb.mxu2 %v1473_v11  ;;  %3088 = vmatmul.f32.vlgmr.msra.gmra.mxu0 %v3731_v24 }
 0x431   : > { %v1341_v13 = vld [vmem:[%s4159_s26 + $0x838] sm:$0xff]  ;;  %3224 = vmatpush.msrb.mxu3 %v1541_v12  ;;  %3128 = vmatmul.f32.vlgmr.msra.gmra.mxu2 %v3732_v25 }
 0x432   : > { %v1409_v14 = vld [vmem:[%s4159_s26 + $0xa58] sm:$0xff]  ;;  %3166 = vmatpush.msrb.mxu0 %v1341_v13  ;;  %3108 = vmatmul.f32.vlgmr.msra.gmra.mxu1 %v3733_v30 }
 0x433   : > { %v1469_v15 = vld [vmem:[%s4159_s26 + $0xc38] sm:$0xff]  ;;  %3185 = vmatpush.msrb.mxu1 %v1409_v14  ;;  %3148 = vmatmul.f32.vlgmr.msra.gmra.mxu3 %v3734_v31 }
 0x434   : > { %v1537_v16 = vld [vmem:[%s4159_s26 + $0xe58] sm:$0xff]  ;;  %3206 = vmatpush.msrb.mxu2 %v1469_v15 }
 0x435   : > { %v1337_v17 = vld [vmem:[%s4159_s26 + $0x818] sm:$0xff]  ;;  %3225 = vmatpush.msrb.mxu3 %v1537_v16 }
 0x436   : > { %v1405_v18 = vld [vmem:[%s4159_s26 + $0xa38] sm:$0xff]  ;;  %3167 = vmatpush.msrb.mxu0 %v1337_v17 }
 0x437   : > { %v1465_v19 = vld [vmem:[%s4159_s26 + $0xc18] sm:$0xff]  ;;  %3186 = vmatpush.msrb.mxu1 %v1405_v18 }
 0x438   : > { %v1533_v58 = vld [vmem:[%s4159_s26 + $0xe38] sm:$0xff]  ;;  %3207 = vmatpush.msrb.mxu2 %v1465_v19  ;;  %3168 = vmatmul.f32.vlgmr.msrb.gmra.mxu0 %v3736_v48 }
 0x439   : > { %v1653_v20 = vld [vmem:[%s4159_s26 + $0x11f8] sm:$0xff]  ;;  %3226 = vmatpush.msrb.mxu3 %v1533_v58 }
 0x43a   : > { %v1781_v21 = vld [vmem:[%s4159_s26 + $0x15f8] sm:$0xff]  ;;  %3232 = vmatpush.msra.mxu0 %v1653_v20 }
 0x43b   : > { %v1401_v22 = vld [vmem:[%s4159_s26 + $0xa18] sm:$0xff]  ;;  %3272 = vmatpush.msra.mxu2 %v1781_v21 }
 0x43c   : > { %v1529_v23 = vld [vmem:[%s4159_s26 + $0xe18] sm:$0xff]  ;;  %3187 = vmatpush.msrb.mxu1 %v1401_v22 }
 0x43d   : > { %v1649_v26 = vld [vmem:[%s4159_s26 + $0x11d8] sm:$0xff]  ;;  %3227 = vmatpush.msrb.mxu3 %v1529_v23 }
 0x43e   : > { %v1717_v27 = vld [vmem:[%s4159_s26 + $0x13f8] sm:$0xff]  ;;  %3233 = vmatpush.msra.mxu0 %v1649_v26 }
 0x43f   : > { %v1777_v28 = vld [vmem:[%s4159_s26 + $0x15d8] sm:$0xff]  ;;  %3252 = vmatpush.msra.mxu1 %v1717_v27 }
 0x440   : > { %v1845_v29 = vld [vmem:[%s4159_s26 + $0x17f8] sm:$0xff]  ;;  %3273 = vmatpush.msra.mxu2 %v1777_v28 }
 0x441   : > { %v1645_v32 = vld [vmem:[%s4159_s26 + $0x11b8] sm:$0xff]  ;;  %3292 = vmatpush.msra.mxu3 %v1845_v29 }
 0x442   : > { %v1713_v33 = vld [vmem:[%s4159_s26 + $0x13d8] sm:$0xff]  ;;  %3234 = vmatpush.msra.mxu0 %v1645_v32 }
 0x443   : > { %v1773_v34 = vld [vmem:[%s4159_s26 + $0x15b8] sm:$0xff]  ;;  %3253 = vmatpush.msra.mxu1 %v1713_v33  ;;  %v3739_v33 = vld [vmem:[#allocation2 + $0x40] sm:$0xff] }
 0x444   : > { %v1841_v35 = vld [vmem:[%s4159_s26 + $0x17d8] sm:$0xff]  ;;  %3274 = vmatpush.msra.mxu2 %v1773_v34  ;;  %v3740_v34 = vld [vmem:[#allocation2 + $0x10] sm:$0xff] }
 0x445   : > { %v1641_v36 = vld [vmem:[%s4159_s26 + $0x1198] sm:$0xff]  ;;  %3293 = vmatpush.msra.mxu3 %v1841_v35 }
 0x446   : > { %v1709_v37 = vld [vmem:[%s4159_s26 + $0x13b8] sm:$0xff]  ;;  %3235 = vmatpush.msra.mxu0 %v1641_v36 }
 0x447   : > { %v1769_v38 = vld [vmem:[%s4159_s26 + $0x1598] sm:$0xff]  ;;  %3254 = vmatpush.msra.mxu1 %v1709_v37 }
 0x448   : > { %v1837_v39 = vld [vmem:[%s4159_s26 + $0x17b8] sm:$0xff]  ;;  %3275 = vmatpush.msra.mxu2 %v1769_v38 }
 0x449   : > { %v1637_v40 = vld [vmem:[%s4159_s26 + $0x1178] sm:$0xff]  ;;  %3294 = vmatpush.msra.mxu3 %v1837_v39  ;;  %v3741_v39 = vld [vmem:[#allocation2 + $0x20] sm:$0xff] }
 0x44a   : > { %v1705_v41 = vld [vmem:[%s4159_s26 + $0x1398] sm:$0xff]  ;;  %3236 = vmatpush.msra.mxu0 %v1637_v40  ;;  %v3742_v40 = vld [vmem:[#allocation2 + $0x38] sm:$0xff] }
 0x44b   : > { %v1765_v42 = vld [vmem:[%s4159_s26 + $0x1578] sm:$0xff]  ;;  %3255 = vmatpush.msra.mxu1 %v1705_v41 }
 0x44c   : > { %v1833_v43 = vld [vmem:[%s4159_s26 + $0x1798] sm:$0xff]  ;;  %3276 = vmatpush.msra.mxu2 %v1765_v42 }
 0x44d   : > { %v3735_v44 = vld [vmem:[#allocation2 + $0x8] sm:$0xff]  ;;  %3295 = vmatpush.msra.mxu3 %v1833_v43 }
 0x44e   : > { %3208 = vmatmul.f32.vlgmr.msrb.gmra.mxu2 %v3735_v44  ;;  %v1633_v45 = vld [vmem:[%s4159_s26 + $0x1158] sm:$0xff] }
 0x44f   : > { %v1701_v46 = vld [vmem:[%s4159_s26 + $0x1378] sm:$0xff]  ;;  %3237 = vmatpush.msra.mxu0 %v1633_v45 }
 0x450   : > { %v1761_v47 = vld [vmem:[%s4159_s26 + $0x1558] sm:$0xff]  ;;  %3256 = vmatpush.msra.mxu1 %v1701_v46 }
 0x451   : > { %v1829_v49 = vld [vmem:[%s4159_s26 + $0x1778] sm:$0xff]  ;;  %3277 = vmatpush.msra.mxu2 %v1761_v47 }
 0x452   : > { %v3737_v50 = vld [vmem:[#allocation2 + $0x48] sm:$0xff]  ;;  %3296 = vmatpush.msra.mxu3 %v1829_v49 }
 0x453   : > { %3228 = vmatmul.f32.vlgmr.msrb.gmra.mxu3 %v3737_v50  ;;  %v1629_v51 = vld [vmem:[%s4159_s26 + $0x1138] sm:$0xff] }
 0x454   : > { %v1697_v52 = vld [vmem:[%s4159_s26 + $0x1358] sm:$0xff]  ;;  %3238 = vmatpush.msra.mxu0 %v1629_v51 }
 0x455   : > { %v1757_v53 = vld [vmem:[%s4159_s26 + $0x1538] sm:$0xff]  ;;  %3257 = vmatpush.msra.mxu1 %v1697_v52 }
 0x456   : > { %v1825_v54 = vld [vmem:[%s4159_s26 + $0x1758] sm:$0xff]  ;;  %3278 = vmatpush.msra.mxu2 %v1757_v53 }
 0x457   : > { %v3738_v55 = vld [vmem:[#allocation2 + $0x68] sm:$0xff]  ;;  %3297 = vmatpush.msra.mxu3 %v1825_v54 }
 0x458   : > { %3188 = vmatmul.f32.vlgmr.msrb.gmra.mxu1 %v3738_v55  ;;  %v1625_v57 = vld [vmem:[%s4159_s26 + $0x1118] sm:$0xff] }
 0x459   : > { %v1693_v59 = vld [vmem:[%s4159_s26 + $0x1338] sm:$0xff]  ;;  %3239 = vmatpush.msra.mxu0 %v1625_v57 }
 0x45a   : > { %v1753_v60 = vld [vmem:[%s4159_s26 + $0x1518] sm:$0xff]  ;;  %3258 = vmatpush.msra.mxu1 %v1693_v59 }
 0x45b   : > { %v1821_v61 = vld [vmem:[%s4159_s26 + $0x1738] sm:$0xff]  ;;  %3279 = vmatpush.msra.mxu2 %v1753_v60 }
 0x45c   : > { %v1621_v62 = vld [vmem:[%s4159_s26 + $0x10f8] sm:$0xff]  ;;  %3298 = vmatpush.msra.mxu3 %v1821_v61 }
 0x45d   : > { %v1689_v63 = vld [vmem:[%s4159_s26 + $0x1318] sm:$0xff]  ;;  %3240 = vmatpush.msra.mxu0 %v1621_v62 }
 0x45e   : > { %v1749_v0 = vld [vmem:[%s4159_s26 + $0x14f8] sm:$0xff]  ;;  %3259 = vmatpush.msra.mxu1 %v1689_v63 }
 0x45f   : > { %v1817_v1 = vld [vmem:[%s4159_s26 + $0x1718] sm:$0xff]  ;;  %3280 = vmatpush.msra.mxu2 %v1749_v0 }
 0x460   : > { %v1617_v2 = vld [vmem:[%s4159_s26 + $0x10d8] sm:$0xff]  ;;  %3299 = vmatpush.msra.mxu3 %v1817_v1 }
 0x461   : > { %v1685_v3 = vld [vmem:[%s4159_s26 + $0x12f8] sm:$0xff]  ;;  %3241 = vmatpush.msra.mxu0 %v1617_v2 }
 0x462   : > { %v1745_v4 = vld [vmem:[%s4159_s26 + $0x14d8] sm:$0xff]  ;;  %3260 = vmatpush.msra.mxu1 %v1685_v3 }
 0x463   : > { %v1813_v5 = vld [vmem:[%s4159_s26 + $0x16f8] sm:$0xff]  ;;  %3281 = vmatpush.msra.mxu2 %v1745_v4 }
 0x464   : > { %v1613_v6 = vld [vmem:[%s4159_s26 + $0x10b8] sm:$0xff]  ;;  %3300 = vmatpush.msra.mxu3 %v1813_v5 }
 0x465   : > { %v1681_v7 = vld [vmem:[%s4159_s26 + $0x12d8] sm:$0xff]  ;;  %3242 = vmatpush.msra.mxu0 %v1613_v6 }
 0x466   : > { %v1741_v8 = vld [vmem:[%s4159_s26 + $0x14b8] sm:$0xff]  ;;  %3261 = vmatpush.msra.mxu1 %v1681_v7 }
 0x467   : > { %v1809_v9 = vld [vmem:[%s4159_s26 + $0x16d8] sm:$0xff]  ;;  %3282 = vmatpush.msra.mxu2 %v1741_v8 }
 0x468   : > { %v1609_v10 = vld [vmem:[%s4159_s26 + $0x1098] sm:$0xff]  ;;  %3301 = vmatpush.msra.mxu3 %v1809_v9 }
 0x469   : > { %v1677_v11 = vld [vmem:[%s4159_s26 + $0x12b8] sm:$0xff]  ;;  %3243 = vmatpush.msra.mxu0 %v1609_v10 }
 0x46a   : > { %v1737_v12 = vld [vmem:[%s4159_s26 + $0x1498] sm:$0xff]  ;;  %3262 = vmatpush.msra.mxu1 %v1677_v11 }
 0x46b   : > { %v1805_v13 = vld [vmem:[%s4159_s26 + $0x16b8] sm:$0xff]  ;;  %3283 = vmatpush.msra.mxu2 %v1737_v12 }
 0x46c   : > { %v1605_v14 = vld [vmem:[%s4159_s26 + $0x1078] sm:$0xff]  ;;  %3302 = vmatpush.msra.mxu3 %v1805_v13 }
 0x46d   : > { %v1673_v15 = vld [vmem:[%s4159_s26 + $0x1298] sm:$0xff]  ;;  %3244 = vmatpush.msra.mxu0 %v1605_v14 }
 0x46e   : > { %v1733_v16 = vld [vmem:[%s4159_s26 + $0x1478] sm:$0xff]  ;;  %3263 = vmatpush.msra.mxu1 %v1673_v15 }
 0x46f   : > { %v1801_v17 = vld [vmem:[%s4159_s26 + $0x1698] sm:$0xff]  ;;  %3284 = vmatpush.msra.mxu2 %v1733_v16 }
 0x470   : > { %v1601_v18 = vld [vmem:[%s4159_s26 + $0x1058] sm:$0xff]  ;;  %3303 = vmatpush.msra.mxu3 %v1801_v17 }
 0x471   : > { %v1669_v19 = vld [vmem:[%s4159_s26 + $0x1278] sm:$0xff]  ;;  %3245 = vmatpush.msra.mxu0 %v1601_v18 }
 0x472   : > { %v1729_v58 = vld [vmem:[%s4159_s26 + $0x1458] sm:$0xff]  ;;  %3264 = vmatpush.msra.mxu1 %v1669_v19 }
 0x473   : > { %v1797_v20 = vld [vmem:[%s4159_s26 + $0x1678] sm:$0xff]  ;;  %3285 = vmatpush.msra.mxu2 %v1729_v58 }
 0x474   : > { %v1597_v21 = vld [vmem:[%s4159_s26 + $0x1038] sm:$0xff]  ;;  %3304 = vmatpush.msra.mxu3 %v1797_v20 }
 0x475   : > { %v1665_v22 = vld [vmem:[%s4159_s26 + $0x1258] sm:$0xff]  ;;  %3246 = vmatpush.msra.mxu0 %v1597_v21 }
 0x476   : > { %v1725_v23 = vld [vmem:[%s4159_s26 + $0x1438] sm:$0xff]  ;;  %3265 = vmatpush.msra.mxu1 %v1665_v22 }
 0x477   : > { %v1793_v24 = vld [vmem:[%s4159_s26 + $0x1658] sm:$0xff]  ;;  %3286 = vmatpush.msra.mxu2 %v1725_v23 }
 0x478   : > { %v1593_v25 = vld [vmem:[%s4159_s26 + $0x1018] sm:$0xff]  ;;  %3305 = vmatpush.msra.mxu3 %v1793_v24 }
 0x479   : > { %v1661_v26 = vld [vmem:[%s4159_s26 + $0x1238] sm:$0xff]  ;;  %3247 = vmatpush.msra.mxu0 %v1593_v25 }
 0x47a   : > { %v1721_v27 = vld [vmem:[%s4159_s26 + $0x1418] sm:$0xff]  ;;  %3266 = vmatpush.msra.mxu1 %v1661_v26  ;;  %3248 = vmatmul.f32.vlgmr.msra.gmra.mxu0 %v3739_v33 }
 0x47b   : > { %v1789_v28 = vld [vmem:[%s4159_s26 + $0x1638] sm:$0xff]  ;;  %3287 = vmatpush.msra.mxu2 %v1721_v27 }
 0x47c   : > { %v1909_v29 = vld [vmem:[%s4159_s26 + $0x19f8] sm:$0xff]  ;;  %3306 = vmatpush.msra.mxu3 %v1789_v28  ;;  %3288 = vmatmul.f32.vlgmr.msra.gmra.mxu2 %v3740_v34 }
 0x47d   : > { %v2037_v30 = vld [vmem:[%s4159_s26 + $0x1df8] sm:$0xff]  ;;  %3312 = vmatpush.msrb.mxu0 %v1909_v29 }
 0x47e   : > { %v1657_v31 = vld [vmem:[%s4159_s26 + $0x1218] sm:$0xff]  ;;  %3352 = vmatpush.msrb.mxu2 %v2037_v30 }
 0x47f   : > { %v1785_v32 = vld [vmem:[%s4159_s26 + $0x1618] sm:$0xff]  ;;  %3267 = vmatpush.msra.mxu1 %v1657_v31 }
 0x480   : > { %v1905_v35 = vld [vmem:[%s4159_s26 + $0x19d8] sm:$0xff]  ;;  %3307 = vmatpush.msra.mxu3 %v1785_v32  ;;  %3268 = vmatmul.f32.vlgmr.msra.gmra.mxu1 %v3741_v39 }
 0x481   : > { %v1973_v36 = vld [vmem:[%s4159_s26 + $0x1bf8] sm:$0xff]  ;;  %3308 = vmatmul.f32.vlgmr.msra.gmra.mxu3 %v3742_v40  ;;  %3313 = vmatpush.msrb.mxu0 %v1905_v35  ;;  %v5230_v40 = vpop.f32.mrf.mxu0 }
 0x482   : > { %v2033_v37 = vld [vmem:[%s4159_s26 + $0x1dd8] sm:$0xff]  ;;  %3332 = vmatpush.msrb.mxu1 %v1973_v36  ;;  %v3743_v36 = vld [vmem:[#allocation2 + $0x60] sm:$0xff] }
 0x483   : > { %v2101_v38 = vld [vmem:[%s4159_s26 + $0x1ff8] sm:$0xff]  ;;  %3353 = vmatpush.msrb.mxu2 %v2033_v37  ;;  %v3744_v37 = vld [vmem:[#allocation2 + $0x78] sm:$0xff] }
 0x484   : > { %v1901_v41 = vld [vmem:[%s4159_s26 + $0x19b8] sm:$0xff]  ;;  %3372 = vmatpush.msrb.mxu3 %v2101_v38  ;;  %v3745_v38 = vld [vmem:[#allocation2 + $0x70] sm:$0xff] }
 0x485   : > { %v1969_v42 = vld [vmem:[%s4159_s26 + $0x1bd8] sm:$0xff]  ;;  %3314 = vmatpush.msrb.mxu0 %v1901_v41  ;;  %v5232_v41 = vpop.f32.mrf.mxu1 }
 0x486   : > { %v2029_v43 = vld [vmem:[%s4159_s26 + $0x1db8] sm:$0xff]  ;;  %3333 = vmatpush.msrb.mxu1 %v1969_v42  ;;  %v5234_v42 = vpop.f32.mrf.mxu2 }
 0x487   : > { %v2097_v44 = vld [vmem:[%s4159_s26 + $0x1fd8] sm:$0xff]  ;;  %3354 = vmatpush.msrb.mxu2 %v2029_v43 }
 0x488   : > { %v1897_v45 = vld [vmem:[%s4159_s26 + $0x1998] sm:$0xff]  ;;  %3373 = vmatpush.msrb.mxu3 %v2097_v44  ;;  %v5236_v44 = vpop.f32.mrf.mxu3 }
 0x489   : > { %v1965_v46 = vld [vmem:[%s4159_s26 + $0x1bb8] sm:$0xff]  ;;  %3315 = vmatpush.msrb.mxu0 %v1897_v45  ;;  %v2449_v43 = vpop.f32.mrf.mxu0 }
 0x48a   : > { %v2025_v47 = vld [vmem:[%s4159_s26 + $0x1d98] sm:$0xff]  ;;  %3334 = vmatpush.msrb.mxu1 %v1965_v46 }
 0x48b   : > { %v2093_v48 = vld [vmem:[%s4159_s26 + $0x1fb8] sm:$0xff]  ;;  %3355 = vmatpush.msrb.mxu2 %v2025_v47 }
 0x48c   : > { %v1893_v49 = vld [vmem:[%s4159_s26 + $0x1978] sm:$0xff]  ;;  %3374 = vmatpush.msrb.mxu3 %v2093_v48 }
 0x48d   : > { %v1961_v50 = vld [vmem:[%s4159_s26 + $0x1b98] sm:$0xff]  ;;  %3316 = vmatpush.msrb.mxu0 %v1893_v49  ;;  %v2469_v45 = vpop.f32.mrf.mxu1 }
 0x48e   : > { %v2021_v51 = vld [vmem:[%s4159_s26 + $0x1d78] sm:$0xff]  ;;  %3335 = vmatpush.msrb.mxu1 %v1961_v50  ;;  %v2489_v46 = vpop.f32.mrf.mxu2 }
 0x48f   : > { %v2089_v52 = vld [vmem:[%s4159_s26 + $0x1f98] sm:$0xff]  ;;  %3356 = vmatpush.msrb.mxu2 %v2021_v51 }
 0x490   : > { %v1889_v53 = vld [vmem:[%s4159_s26 + $0x1958] sm:$0xff]  ;;  %3375 = vmatpush.msrb.mxu3 %v2089_v52  ;;  %v2509_v48 = vpop.f32.mrf.mxu3 }
 0x491   : > { %v1957_v54 = vld [vmem:[%s4159_s26 + $0x1b78] sm:$0xff]  ;;  %3317 = vmatpush.msrb.mxu0 %v1889_v53  ;;  %v2529_v47 = vpop.f32.mrf.mxu0 }
 0x492   : > { %v2017_v55 = vld [vmem:[%s4159_s26 + $0x1d58] sm:$0xff]  ;;  %3336 = vmatpush.msrb.mxu1 %v1957_v54 }
 0x493   : > { %v2085_v57 = vld [vmem:[%s4159_s26 + $0x1f78] sm:$0xff]  ;;  %3357 = vmatpush.msrb.mxu2 %v2017_v55 }
 0x494   : > { %v1885_v59 = vld [vmem:[%s4159_s26 + $0x1938] sm:$0xff]  ;;  %3376 = vmatpush.msrb.mxu3 %v2085_v57 }
 0x495   : > { %v1953_v60 = vld [vmem:[%s4159_s26 + $0x1b58] sm:$0xff]  ;;  %3318 = vmatpush.msrb.mxu0 %v1885_v59  ;;  %v2549_v49 = vpop.f32.mrf.mxu1 }
 0x496   : > { %v2013_v61 = vld [vmem:[%s4159_s26 + $0x1d38] sm:$0xff]  ;;  %3337 = vmatpush.msrb.mxu1 %v1953_v60  ;;  %v2569_v50 = vpop.f32.mrf.mxu2 }
 0x497   : > { %v2081_v62 = vld [vmem:[%s4159_s26 + $0x1f58] sm:$0xff]  ;;  %3358 = vmatpush.msrb.mxu2 %v2013_v61 }
 0x498   : > { %v1881_v63 = vld [vmem:[%s4159_s26 + $0x1918] sm:$0xff]  ;;  %3377 = vmatpush.msrb.mxu3 %v2081_v62  ;;  %v2589_v52 = vpop.f32.mrf.mxu3 }
 0x499   : > { %v1949_v0 = vld [vmem:[%s4159_s26 + $0x1b38] sm:$0xff]  ;;  %3319 = vmatpush.msrb.mxu0 %v1881_v63  ;;  %v2609_v51 = vpop.f32.mrf.mxu0 }
 0x49a   : > { %v2009_v1 = vld [vmem:[%s4159_s26 + $0x1d18] sm:$0xff]  ;;  %3338 = vmatpush.msrb.mxu1 %v1949_v0 }
 0x49b   : > { %v2077_v2 = vld [vmem:[%s4159_s26 + $0x1f38] sm:$0xff]  ;;  %3359 = vmatpush.msrb.mxu2 %v2009_v1 }
 0x49c   : > { %v1877_v3 = vld [vmem:[%s4159_s26 + $0x18f8] sm:$0xff]  ;;  %3378 = vmatpush.msrb.mxu3 %v2077_v2 }
 0x49d   : > { %v1945_v4 = vld [vmem:[%s4159_s26 + $0x1b18] sm:$0xff]  ;;  %3320 = vmatpush.msrb.mxu0 %v1877_v3  ;;  %v2629_v53 = vpop.f32.mrf.mxu1 }
 0x49e   : > { %v2005_v5 = vld [vmem:[%s4159_s26 + $0x1cf8] sm:$0xff]  ;;  %3339 = vmatpush.msrb.mxu1 %v1945_v4  ;;  %v2649_v54 = vpop.f32.mrf.mxu2 }
 0x49f   : > { %v2073_v6 = vld [vmem:[%s4159_s26 + $0x1f18] sm:$0xff]  ;;  %3360 = vmatpush.msrb.mxu2 %v2005_v5 }
 0x4a0   : > { %v1873_v7 = vld [vmem:[%s4159_s26 + $0x18d8] sm:$0xff]  ;;  %3379 = vmatpush.msrb.mxu3 %v2073_v6  ;;  %v2669_v57 = vpop.f32.mrf.mxu3  ;;  %v3747_v6 = vld [vmem:[%s350_s22] sm:$0xf] }
 0x4a1   : > { %v1941_v8 = vld [vmem:[%s4159_s26 + $0x1af8] sm:$0xff]  ;;  %3321 = vmatpush.msrb.mxu0 %v1873_v7  ;;  %v5238_v55 = vpop.f32.mrf.mxu0  ;;  %v2105_v7 = vperm.slane %v3747_v6, 1 }
 0x4a2   : > { %v2001_v9 = vld [vmem:[%s4159_s26 + $0x1cd8] sm:$0xff]  ;;  %3340 = vmatpush.msrb.mxu1 %v1941_v8 }
 0x4a3   : > { %v2069_v10 = vld [vmem:[%s4159_s26 + $0x1ef8] sm:$0xff]  ;;  %3361 = vmatpush.msrb.mxu2 %v2001_v9 }
 0x4a4   : > { %v1869_v11 = vld [vmem:[%s4159_s26 + $0x18b8] sm:$0xff]  ;;  %3380 = vmatpush.msrb.mxu3 %v2069_v10  ;;  %v2106_v10 = vperm.slane %v3747_v6, 2 }
 0x4a5   : > { %v1937_v12 = vld [vmem:[%s4159_s26 + $0x1ad8] sm:$0xff]  ;;  %3322 = vmatpush.msrb.mxu0 %v1869_v11  ;;  %v5240_v59 = vpop.f32.mrf.mxu1  ;;  %v2450_v11 = vadd.f32 %v2449_v43, %v2105_v7 }
 0x4a6   : > { %v1997_v13 = vld [vmem:[%s4159_s26 + $0x1cb8] sm:$0xff]  ;;  %3341 = vmatpush.msrb.mxu1 %v1937_v12  ;;  %v5242_v60 = vpop.f32.mrf.mxu2 }
 0x4a7   : > { %v2065_v14 = vld [vmem:[%s4159_s26 + $0x1ed8] sm:$0xff]  ;;  %3362 = vmatpush.msrb.mxu2 %v1997_v13 }
 0x4a8   : > { %v1865_v15 = vld [vmem:[%s4159_s26 + $0x1898] sm:$0xff]  ;;  %3381 = vmatpush.msrb.mxu3 %v2065_v14  ;;  %v5244_v62 = vpop.f32.mrf.mxu3 }
 0x4a9   : > { %v1933_v16 = vld [vmem:[%s4159_s26 + $0x1ab8] sm:$0xff]  ;;  %3323 = vmatpush.msrb.mxu0 %v1865_v15  ;;  %v2769_v61 = vpop.f32.mrf.mxu0  ;;  %v2470_v15 = vadd.f32 %v2469_v45, %v2450_v11 }
 0x4aa   : > { %v1993_v17 = vld [vmem:[%s4159_s26 + $0x1c98] sm:$0xff]  ;;  %3342 = vmatpush.msrb.mxu1 %v1933_v16  ;;  %v2770_v14 = vadd.f32 %v2769_v61, %v2106_v10 }
 0x4ab   : > { %v2061_v18 = vld [vmem:[%s4159_s26 + $0x1eb8] sm:$0xff]  ;;  %3363 = vmatpush.msrb.mxu2 %v1993_v17 }
 0x4ac   : > { %v1861_v19 = vld [vmem:[%s4159_s26 + $0x1878] sm:$0xff]  ;;  %3382 = vmatpush.msrb.mxu3 %v2061_v18 }
 0x4ad   : > { %v1929_v58 = vld [vmem:[%s4159_s26 + $0x1a98] sm:$0xff]  ;;  %3324 = vmatpush.msrb.mxu0 %v1861_v19  ;;  %v2789_v63 = vpop.f32.mrf.mxu1  ;;  %v2490_v19 = vadd.f32 %v2489_v46, %v2470_v15 }
 0x4ae   : > { %v1989_v20 = vld [vmem:[%s4159_s26 + $0x1c78] sm:$0xff]  ;;  %3343 = vmatpush.msrb.mxu1 %v1929_v58  ;;  %v2809_v0 = vpop.f32.mrf.mxu2  ;;  %v2790_v18 = vadd.f32 %v2789_v63, %v2770_v14  ;;  %v2107_v58 = vperm.slane %v3747_v6, 3 }
 0x4af   : > { %v2057_v21 = vld [vmem:[%s4159_s26 + $0x1e98] sm:$0xff]  ;;  %3364 = vmatpush.msrb.mxu2 %v1989_v20 }
 0x4b0   : > { %v1857_v22 = vld [vmem:[%s4159_s26 + $0x1858] sm:$0xff]  ;;  %3383 = vmatpush.msrb.mxu3 %v2057_v21  ;;  %v2829_v2 = vpop.f32.mrf.mxu3 }
 0x4b1   : > { %v1925_v23 = vld [vmem:[%s4159_s26 + $0x1a78] sm:$0xff]  ;;  %3325 = vmatpush.msrb.mxu0 %v1857_v22  ;;  %v2849_v1 = vpop.f32.mrf.mxu0  ;;  %v2810_v22 = vadd.f32 %v2809_v0, %v2790_v18 }
 0x4b2   : > { %v1985_v24 = vld [vmem:[%s4159_s26 + $0x1c58] sm:$0xff]  ;;  %3344 = vmatpush.msrb.mxu1 %v1925_v23  ;;  %v2510_v23 = vadd.f32 %v2509_v48, %v2490_v19 }
 0x4b3   : > { %v2053_v25 = vld [vmem:[%s4159_s26 + $0x1e78] sm:$0xff]  ;;  %3365 = vmatpush.msrb.mxu2 %v1985_v24 }
 0x4b4   : > { %v1853_v26 = vld [vmem:[%s4159_s26 + $0x1838] sm:$0xff]  ;;  %3384 = vmatpush.msrb.mxu3 %v2053_v25 }
 0x4b5   : > { %v1921_v27 = vld [vmem:[%s4159_s26 + $0x1a58] sm:$0xff]  ;;  %3326 = vmatpush.msrb.mxu0 %v1853_v26  ;;  %v2869_v3 = vpop.f32.mrf.mxu1 }
 0x4b6   : > { %v1981_v28 = vld [vmem:[%s4159_s26 + $0x1c38] sm:$0xff]  ;;  %3345 = vmatpush.msrb.mxu1 %v1921_v27  ;;  %v2889_v4 = vpop.f32.mrf.mxu2  ;;  %v2830_v27 = vadd.f32 %v2829_v2, %v2810_v22 }
 0x4b7   : > { %v2049_v29 = vld [vmem:[%s4159_s26 + $0x1e58] sm:$0xff]  ;;  %3366 = vmatpush.msrb.mxu2 %v1981_v28  ;;  %v2530_v28 = vadd.f32 %v2529_v47, %v2510_v23 }
 0x4b8   : > { %v1849_v30 = vld [vmem:[%s4159_s26 + $0x1818] sm:$0xff]  ;;  %3385 = vmatpush.msrb.mxu3 %v2049_v29  ;;  %v2909_v8 = vpop.f32.mrf.mxu3 }
 0x4b9   : > { %v1917_v31 = vld [vmem:[%s4159_s26 + $0x1a38] sm:$0xff]  ;;  %3327 = vmatpush.msrb.mxu0 %v1849_v30  ;;  %v2929_v5 = vpop.f32.mrf.mxu0 }
 0x4ba   : > { %v1977_v32 = vld [vmem:[%s4159_s26 + $0x1c18] sm:$0xff]  ;;  %3346 = vmatpush.msrb.mxu1 %v1917_v31  ;;  %3328 = vmatmul.f32.vlgmr.msrb.gmra.mxu0 %v3743_v36  ;;  %v2850_v31 = vadd.f32 %v2849_v1, %v2830_v27 }
 0x4bb   : > { %v2045_v33 = vld [vmem:[%s4159_s26 + $0x1e38] sm:$0xff]  ;;  %3367 = vmatpush.msrb.mxu2 %v1977_v32  ;;  %v2550_v32 = vadd.f32 %v2549_v49, %v2530_v28 }
 0x4bc   : > { %v1913_v34 = vld [vmem:[%s4159_s26 + $0x1a18] sm:$0xff]  ;;  %3386 = vmatpush.msrb.mxu3 %v2045_v33  ;;  %3368 = vmatmul.f32.vlgmr.msrb.gmra.mxu2 %v3744_v37 }
 0x4bd   : > { %v2041_v35 = vld [vmem:[%s4159_s26 + $0x1e18] sm:$0xff]  ;;  %3347 = vmatpush.msrb.mxu1 %v1913_v34  ;;  %v2949_v9 = vpop.f32.mrf.mxu1  ;;  %v2570_v36 = vadd.f32 %v2569_v50, %v2550_v32 }
 0x4be   : > { %3387 = vmatpush.msrb.mxu3 %v2041_v35  ;;  %3348 = vmatmul.f32.vlgmr.msrb.gmra.mxu1 %v3745_v38  ;;  %v3746_v39 = vld [vmem:[#allocation2 + $0x28] sm:$0xff]  ;;  %v2969_v12 = vpop.f32.mrf.mxu2  ;;  %v2870_v35 = vadd.f32 %v2869_v3, %v2850_v31 }
 0x4bf   : > { %3388 = vmatmul.f32.vlgmr.msrb.gmra.mxu3 %v3746_v39  ;;  %v2590_v43 = vadd.f32 %v2589_v52, %v2570_v36 }
 0x4c0   : > { %v2989_v16 = vpop.f32.mrf.mxu3  ;;  %v2890_v39 = vadd.f32 %v2889_v4, %v2870_v35 }
 0x4c1   : > { %v3009_v13 = vpop.f32.mrf.mxu0  ;;  %v2610_v48 = vadd.f32 %v2609_v51, %v2590_v43  ;;  %v2370_v51 = vadd.f32 %v5230_v40, %v4654_v56 }
 0x4c2   : > { %v2910_v61 = vadd.f32 %v2909_v8, %v2890_v39 }
 0x4c3   : > { %v2630_v47 = vadd.f32 %v2629_v53, %v2610_v48 }
 0x4c4   : > { %v2930_v63 = vadd.f32 %v2929_v5, %v2910_v61 }
 0x4c5   : > { %v3029_v17 = vpop.f32.mrf.mxu1  ;;  %v2650_v6 = vadd.f32 %v2649_v54, %v2630_v47 }
 0x4c6   : > { %v3049_v20 = vpop.f32.mrf.mxu2  ;;  %v2950_v7 = vadd.f32 %v2949_v9, %v2930_v63  ;;  %v2390_v9 = vadd.f32 %v5232_v41, %v2370_v51 }
 0x4c7   : > { %v2670_v3 = vadd.f32 %v2669_v57, %v2650_v6 }
 0x4c8   : > { %v3069_v25 = vpop.f32.mrf.mxu3  ;;  %v2970_v10 = vadd.f32 %v2969_v12, %v2950_v7 }
 0x4c9   : > { %v3089_v21 = vpop.f32.mrf.mxu0  ;;  %v2690_v14 = vadd.f32 %v5238_v55, %v2670_v3  ;;  %v2410_v55 = vadd.f32 %v5234_v42, %v2390_v9 }
 0x4ca   : > { %v3090_v24 = vadd.f32 %v3089_v21, %v2107_v58  ;;  %v2990_v4 = vadd.f32 %v2989_v16, %v2970_v10 }
 0x4cb   : > { %v2710_v53 = vadd.f32 %v5240_v59, %v2690_v14  ;;  %v2430_v40 = vadd.f32 %v5236_v44, %v2410_v55 }
 0x4cc   : > { %v3010_v5 = vadd.f32 %v3009_v13, %v2990_v4  ;;  %v3396_v13 = vld [vmem:[%s360_s24] sm:$0xf] }
 0x4cd   : > { %v3109_v26 = vpop.f32.mrf.mxu1  ;;  %v2730_v12 = vadd.f32 %v5242_v60, %v2710_v53  ;;  %v3398_v60 = vperm.slane %v3396_v13, 0  ;;  %v3400_v27 = vperm.slane %v3396_v13, 2  ;;  %v3401_v32 = vperm.slane %v3396_v13, 3 }
 0x4ce   : > { %v3110_v29 = vadd.f32 %v3109_v26, %v3090_v24  ;;  %v3129_v30 = vpop.f32.mrf.mxu2  ;;  %v3030_v57 = vadd.f32 %v3029_v17, %v3010_v5  ;;  %v3399_v24 = vperm.slane %v3396_v13, 1  ;;  %v3392_v17 = vmax.f32 %v2430_v40, 0.0 }
 0x4cf   : > { %v2750_v58 = vadd.f32 %v5244_v62, %v2730_v12 }
 0x4d0   : > { %v3130_v33 = vadd.f32 %v3129_v30, %v3110_v29  ;;  %v3149_v34 = vpop.f32.mrf.mxu3  ;;  %v3050_v16 = vadd.f32 %v3049_v20, %v3030_v57  ;;  %v3406_v30 = vmul.f32 %v3398_v60, %v3392_v17 }
 0x4d1   : > { %v3169_v38 = vpop.f32.mrf.mxu0  ;;  %v3393_v41 = vmax.f32 %v2750_v58, 0.0 }
 0x4d2   : > { %v3150_v37 = vadd.f32 %v3149_v34, %v3130_v33  ;;  %v3070_v59 = vadd.f32 %v3069_v25, %v3050_v16 }
 0x4d3   : > { %v3407_v28 = vmul.f32 %v3399_v24, %v3393_v41 }
 0x4d4   : > { %v3170_v45 = vadd.f32 %v3169_v38, %v3150_v37  ;;  %v3394_v26 = vmax.f32 %v3070_v59, 0.0  ;;  %v3415_v37 = vld [vmem:[%s4172_s21] sm:$0xff] }
 0x4d5   : > { %v3189_v46 = vpop.f32.mrf.mxu1  ;;  %v3410_v33 = vadd.f32 %v3407_v28, %v3406_v30 }
 0x4d6   : > { %v3190_v0 = vadd.f32 %v3189_v46, %v3170_v45  ;;  %v3209_v2 = vpop.f32.mrf.mxu2  ;;  %v3408_v44 = vmul.f32 %v3400_v27, %v3394_v26 }
 0x4d8   : > { %v3210_v1 = vadd.f32 %v3209_v2, %v3190_v0  ;;  %v3229_v49 = vpop.f32.mrf.mxu3  ;;  %v3411_v35 = vadd.f32 %v3410_v33, %v3408_v44 }
 0x4da   : > { %v3230_v50 = vadd.f32 %v3229_v49, %v3210_v1 }
 0x4f7   : > { %v3249_v11 = vpop.f32.mrf.mxu0 }
 0x4f8   : > { %v3250_v52 = vadd.f32 %v3249_v11, %v3230_v50 }
 0x4fd   : > { %v3269_v15 = vpop.f32.mrf.mxu1 }
 0x4fe   : > { %v3270_v54 = vadd.f32 %v3269_v15, %v3250_v52 }
 0x4ff   : > { %v3289_v8 = vpop.f32.mrf.mxu2 }
 0x500   : > { %v3290_v18 = vadd.f32 %v3289_v8, %v3270_v54 }
 0x504   : > { %v3309_v19 = vpop.f32.mrf.mxu3 }
 0x505   : > { %v3310_v21 = vadd.f32 %v3309_v19, %v3290_v18 }
 0x537   : > { %v3329_v56 = vpop.f32.mrf.mxu0 }
 0x538   : > { %v3330_v22 = vadd.f32 %v3329_v56, %v3310_v21 }
 0x53b   : > { %v3349_v23 = vpop.f32.mrf.mxu1 }
 0x53c   : > { %v3350_v42 = vadd.f32 %v3349_v23, %v3330_v22 }
 0x53f   : > { %v3369_v20 = vpop.f32.mrf.mxu2 }
 0x540   : > { %v3370_v62 = vadd.f32 %v3369_v20, %v3350_v42 }
 0x542   : > { %v3389_v29 = vpop.f32.mrf.mxu3 }
 0x543   : > { %v3390_v31 = vadd.f32 %v3389_v29, %v3370_v62 }
 0x545   : > { %v3395_v25 = vmax.f32 %v3390_v31, 0.0 }
 0x547   : > { %v3409_v34 = vmul.f32 %v3401_v32, %v3395_v25 }
 0x549   : > { %v3412_v36 = vadd.f32 %v3411_v35, %v3409_v34 }
 0x54b   : > { %3413 = vadd.xlane.f32.xlu0 %v3412_v36 }
 0x5be   : > { %v3414_v38 = vpop.xlane.xlu0 %3413 }
 0x5bf   : > { %v3416_v39 = vadd.f32 %v3415_v37, %v3414_v38 }
 0x5c1   : > { %3417 = vst [vmem:[%s4172_s21] sm:$0xff] %v3416_v39 }
 0x5c2 PF: > { %s5327_s1 = sld [smem:[#allocation18_spill]]  ;;  %s5331_s22 = smov %s3952_s23 }
 0x5c3   : > { %s5328_s21 = sld [smem:[#allocation13_spill]]  ;;  %s5332_s23 = smov %s4125_s6 }
 0x5c4   : > { %s5329_s24 = sld [smem:[#allocation16_spill]]  ;;  %s5333_s26 = smov %s5336_s19 }
 0x5c5   : > { %s5330_s25 = sld [smem:[#allocation17_spill]]  ;;  %s5334_s27 = smov %s5340_s20 }
 0x5c8   : > { %s18_s28 = sadd.s32 1, %s5327_s1  }
 0x5c9   : > { %p15_p4 = scmp.ge.s32.totalorder %s18_s28, 6  }
 0x5cb   :  { %17 = sbr.rel (!%p15_p4) target bundleno = 9 (0x9), region = 117 }
 0x5d0   :  { %3437 = vsyncpa [#allocation4], 1 }
 0x5d1   :  { %3439 = vsyncpa [#allocation4 + $0x1], 1 }
 0x5d2   :  { %3440 = vsyncpa [#allocation6], 1 }

</bundles_post_ra>
